<compile_context>
chip_gen: v6e
topology: v6e:2x2x1
jax: 0.10.0
libtpu: 0.0.40
codegen_flags: <defaults>
</compile_context>

<pallas_src>
import functools

import jax
import jax.numpy as jnp
import numpy as np
from jax.experimental import pallas as pl
from jax.experimental.pallas import tpu as pltpu

# PixelCNN mask taps (dy, dx) of a 7x7 kernel.  Type 'B' uses all 25 taps
# (rows strictly above the centre plus the centre row up to and including the
# centre); type 'A' uses the first 24 (everything except the centre tap).
_TAPS_B = tuple((dy, dx) for dy in (-3, -2, -1) for dx in range(-3, 4)) + \
          tuple((0, dx) for dx in (-3, -2, -1, 0))
_TAPS_A = _TAPS_B[:-1]          # centre tap (0, 0) excluded


# ----------------------------- fused Pallas kernel ---------------------------

def _pixelcnn_kernel(x_ref, ma_ref, wa_ref, ba_ref, mb_ref,
                     lng_ref, lnb_ref, w1_ref, b1_ref, w7_ref, b7_ref,
                     w3_ref, b3_ref, ow1_ref, ob1_ref, ow2_ref, ob2_ref,
                     out_ref, *, img_w, n_layers, ln_eps):
    f32, bf16 = jnp.float32, jnp.bfloat16
    mask_a = ma_ref[...]                     # (HW, 24*D)  0/1 f32, resident
    mask_b = mb_ref[...]                     # (HW, 25*Fh) 0/1 f32, resident

    def im2col(a, taps, mask):
        # a: (HW, C) f32 activation of ONE image.  For tap (dy, dx) the source
        # row of output row r is r + dy*img_w + dx; pltpu.roll (XLU) brings it
        # to row r and the precomputed 0/1 mask (VPU) zeroes taps that fall
        # outside the image (which also kills the roll's wrap-around rows).
        cols = []
        for (dy, dx) in taps:
            shift = -(dy * img_w + dx)       # >= 0 for every PixelCNN tap
            cols.append(a if shift == 0 else pltpu.roll(a, shift, axis=0))
        return (jnp.concatenate(cols, axis=-1) * mask).astype(bf16)

    # ---- masked type-'A' 7x7 conv on the embedded codes (one wide matmul) ---
    x = jnp.dot(im2col(x_ref[...], _TAPS_A, mask_a), wa_ref[...],
                preferred_element_type=f32) + ba_ref[...]          # (HW, F)

    # ---- 10 x [LayerNorm -> ReLU -> ResBlock], weights indexed per layer ----
    def layer(l, x):
        mean = jnp.mean(x, axis=-1, keepdims=True)
        var = jnp.mean(jnp.square(x - mean), axis=-1, keepdims=True)
        a = (x - mean) * jax.lax.rsqrt(var + ln_eps) * lng_ref[l] + lnb_ref[l]
        a = jnp.maximum(a, 0.0)              # skip input of the ResBlock
        # ResBlock: ReLU (idempotent on a) -> 1x1 (F->F/2) -> ReLU ->
        #           masked-'B' 7x7 (F/2->F/2) -> ReLU -> 1x1 (F/2->F); + skip
        h = jnp.dot(a.astype(bf16), w1_ref[l],
                    preferred_element_type=f32) + b1_ref[l]
        h = jnp.maximum(h, 0.0)
        h = jnp.dot(im2col(h, _TAPS_B, mask_b), w7_ref[l],
                    preferred_element_type=f32) + b7_ref[l]
        h = jnp.maximum(h, 0.0)
        h = jnp.dot(h.astype(bf16), w3_ref[l],
                    preferred_element_type=f32) + b3_ref[l]
        return h + a

    x = jax.lax.fori_loop(0, n_layers, layer, x)

    # ---- head: ReLU -> 1x1 (F->512) -> ReLU -> 1x1 (512->n_colors) ----------
    h = jnp.dot(jnp.maximum(x, 0.0).astype(bf16), ow1_ref[...],
                preferred_element_type=f32) + ob1_ref[...]
    h = jnp.maximum(h, 0.0).astype(bf16)
    out_ref[...] = jnp.dot(h, ow2_ref[...],
                           preferred_element_type=f32) + ob2_ref[...]


# ----------------------------- parameter preparation -------------------------

def _pack_taps(w_pt, taps):
    # (cout, cin, 7, 7) PyTorch layout -> (len(taps)*cin, cout) bf16, with the
    # row blocks in the same tap order the kernel's im2col uses.
    return jnp.concatenate(
        [w_pt[:, :, dy + 3, dx + 3].T for (dy, dx) in taps],
        axis=0).astype(jnp.bfloat16)


def _tap_masks(H, W, taps, cin):
    # mask[r, t*cin:(t+1)*cin] = 1 iff tap t of output pixel r stays inside
    # the image; pre-broadcast over that tap's cin input channels.
    m = np.zeros((H * W, len(taps) * cin), np.float32)
    for t, (dy, dx) in enumerate(taps):
        for y in range(H):
            for x in range(W):
                if 0 <= y + dy < H and 0 <= x + dx < W:
                    m[y * W + x, t * cin:(t + 1) * cin] = 1.0
    return jnp.asarray(m)


def prepare_params(params, H, W):
    """One-time repack of PyTorch-layout params into kernel-ready arrays."""
    layers = params['layers']
    L = len(layers)
    F, D = params['convA_w'].shape[:2]
    half = F // 2
    f32, bf16 = jnp.float32, jnp.bfloat16
    stack = lambda k: jnp.stack([lp[k] for lp in layers], axis=0)
    return {
        'emb': params['emb'].astype(f32),                            # (K, D)
        'maskA': _tap_masks(H, W, _TAPS_A, D),                       # (HW, 24*D)
        'wa': _pack_taps(params['convA_w'], _TAPS_A),                # (24*D, F)
        'ba': params['convA_b'].reshape(1, F).astype(f32),
        'maskB': _tap_masks(H, W, _TAPS_B, half),                    # (HW, 25*Fh)
        'lng': stack('ln_g').reshape(L, 1, F).astype(f32),
        'lnb': stack('ln_b').reshape(L, 1, F).astype(f32),
        'w1': jnp.stack([lp['w1'].reshape(half, F).T for lp in layers]).astype(bf16),
        'b1': stack('b1').reshape(L, 1, half).astype(f32),
        'w7': jnp.stack([_pack_taps(lp['w7'], _TAPS_B) for lp in layers]),
        'b7': stack('b7').reshape(L, 1, half).astype(f32),
        'w3': jnp.stack([lp['w3'].reshape(F, half).T for lp in layers]).astype(bf16),
        'b3': stack('b3').reshape(L, 1, F).astype(f32),
        'ow1': params['out1_w'].reshape(-1, F).T.astype(bf16),       # (F, 512)
        'ob1': params['out1_b'].reshape(1, -1).astype(f32),
        'ow2': params['out2_w'].reshape(params['out2_w'].shape[0], -1).T.astype(bf16),
        'ob2': params['out2_b'].reshape(1, -1).astype(f32),
    }


# ----------------------------- forward wrapper --------------------------------

def pixelcnn_forward(prep, x_idx, *, input_shape=(8, 8), ln_eps=1e-5):
    B = x_idx.shape[0]
    H, W = input_shape
    HW = H * W
    assert HW % 8 == 0, "H*W must be a multiple of 8 (sublane tiling)"
    K, D = prep['emb'].shape
    F = prep['ba'].shape[1]
    Fh = prep['w1'].shape[2]
    L = prep['lng'].shape[0]
    n_hidden = prep['ow1'].shape[1]
    n_colors = prep['ow2'].shape[1]
    assert prep['maskA'].shape[0] == HW, "prepare_params built for different H/W"

    # Codebook embedding lookup: trivial XLA gather -> (B*HW, D) f32.
    x_emb = prep['emb'][x_idx.reshape(-1).astype(jnp.int32)]

    kernel = functools.partial(_pixelcnn_kernel, img_w=W, n_layers=L,
                               ln_eps=ln_eps)

    img2 = lambda b: (b, 0)       # per-image blocks
    res2 = lambda b: (0, 0)       # resident (shared) 2-D blocks
    res3 = lambda b: (0, 0, 0)    # resident (stacked per-layer) 3-D blocks

    grid_spec = pl.GridSpec(
        grid=(B,),
        in_specs=[
            pl.BlockSpec((HW, D), img2),                     # embedded codes
            pl.BlockSpec((HW, len(_TAPS_A) * D), res2),      # conv-A boundary mask
            pl.BlockSpec((len(_TAPS_A) * D, F), res2),       # conv-A packed taps
            pl.BlockSpec((1, F), res2),                      # conv-A bias
            pl.BlockSpec((HW, len(_TAPS_B) * Fh), res2),     # conv-B boundary mask
            pl.BlockSpec((L, 1, F), res3),                   # ln gamma
            pl.BlockSpec((L, 1, F), res3),                   # ln beta
            pl.BlockSpec((L, F, Fh), res3),                  # 1x1 F->F/2
            pl.BlockSpec((L, 1, Fh), res3),
            pl.BlockSpec((L, len(_TAPS_B) * Fh, Fh), res3),  # masked-B 7x7 taps
            pl.BlockSpec((L, 1, Fh), res3),
            pl.BlockSpec((L, Fh, F), res3),                  # 1x1 F/2->F
            pl.BlockSpec((L, 1, F), res3),
            pl.BlockSpec((F, n_hidden), res2),               # head F->512
            pl.BlockSpec((1, n_hidden), res2),
            pl.BlockSpec((n_hidden, n_colors), res2),        # head 512->n_colors
            pl.BlockSpec((1, n_colors), res2),
        ],
        out_specs=pl.BlockSpec((HW, n_colors), img2),
    )

    out = pl.pallas_call(
        kernel,
        out_shape=jax.ShapeDtypeStruct((B * HW, n_colors), jnp.float32),
        grid_spec=grid_spec,
        compiler_params=pltpu.CompilerParams(
            dimension_semantics=("parallel",),
        ),
    )(x_emb, prep['maskA'], prep['wa'], prep['ba'], prep['maskB'],
      prep['lng'], prep['lnb'], prep['w1'], prep['b1'],
      prep['w7'], prep['b7'], prep['w3'], prep['b3'],
      prep['ow1'], prep['ob1'], prep['ow2'], prep['ob2'])

    # (B*HW, n_colors) -> (B, H, W, n_colors) -> NCHW logits.
    return out.reshape(B, H, W, n_colors).transpose(0, 3, 1, 2)


# ----------------------------- parameters --------------------------------------

def init_params(key, n_filters=64, n_layers=10, n_colors=128, K=128, D=64):
    keys = jax.random.split(key, 8 + n_layers * 8)
    it = iter(keys)

    def u(shape, scale):
        return jax.random.uniform(next(it), shape, jnp.float32, -scale, scale)

    params = {}
    params['emb'] = u((K, D), 1.0 / K)                        # codebook (128, 64)
    fanA = D * 49
    params['convA_w'] = u((n_filters, D, 7, 7), 1.0 / np.sqrt(fanA))
    params['convA_b'] = u((n_filters,), 1.0 / np.sqrt(fanA))
    half = n_filters // 2
    layers = []
    for _ in range(n_layers):
        layers.append({
            'ln_g': jnp.ones((n_filters,), jnp.float32),
            'ln_b': jnp.zeros((n_filters,), jnp.float32),
            'w1': u((half, n_filters, 1, 1), 1.0 / np.sqrt(n_filters)),
            'b1': u((half,), 1.0 / np.sqrt(n_filters)),
            'w7': u((half, half, 7, 7), 1.0 / np.sqrt(half * 49)),
            'b7': u((half,), 1.0 / np.sqrt(half * 49)),
            'w3': u((n_filters, half, 1, 1), 1.0 / np.sqrt(half)),
            'b3': u((n_filters,), 1.0 / np.sqrt(half)),
        })
    params['layers'] = layers
    params['out1_w'] = u((512, n_filters, 1, 1), 1.0 / np.sqrt(n_filters))
    params['out1_b'] = u((512,), 1.0 / np.sqrt(n_filters))
    params['out2_w'] = u((n_colors, 512, 1, 1), 1.0 / np.sqrt(512))
    params['out2_b'] = u((n_colors,), 1.0 / np.sqrt(512))
    return params


# ----------------------------- pure-JAX reference (validation only) -----------

def _dense_masked_weight(w_pt, mask_type):
    cout, cin, k, _ = w_pt.shape
    m = np.zeros((k, k), np.float32)
    m[:k // 2, :] = 1.0
    m[k // 2, :k // 2] = 1.0
    if mask_type == 'B':
        m[k // 2, k // 2] = 1.0
    return w_pt * jnp.asarray(m)[None, None]


def reference_forward(params, x_idx, *, input_shape=(8, 8), ln_eps=1e-5):
    hp = jax.lax.Precision.HIGHEST

    def conv7(x, w_pt, b, mask_type):
        w = _dense_masked_weight(w_pt, mask_type).transpose(2, 3, 1, 0)  # HWIO
        y = jax.lax.conv_general_dilated(
            x, w, (1, 1), 'SAME',
            dimension_numbers=('NHWC', 'HWIO', 'NHWC'), precision=hp)
        return y + b

    def conv1(x, w_pt, b):
        cout, cin = w_pt.shape[:2]
        return jnp.einsum('bhwc,oc->bhwo', x, w_pt.reshape(cout, cin),
                          precision=hp) + b

    def ln(x, g, bta):
        mean = x.mean(-1, keepdims=True)
        var = ((x - mean) ** 2).mean(-1, keepdims=True)
        return (x - mean) * jax.lax.rsqrt(var + ln_eps) * g + bta

    out = params['emb'][x_idx.astype(jnp.int32)]              # NHWC (B,H,W,D)
    out = conv7(out, params['convA_w'], params['convA_b'], 'A')
    for lp in params['layers']:
        a = jax.nn.relu(ln(out, lp['ln_g'], lp['ln_b']))
        h = jax.nn.relu(a)
        h = jax.nn.relu(conv1(h, lp['w1'], lp['b1']))
        h = jax.nn.relu(conv7(h, lp['w7'], lp['b7'], 'B'))
        h = conv1(h, lp['w3'], lp['b3'])
        out = h + a
    out = conv1(jax.nn.relu(out), params['out1_w'], params['out1_b'])
    out = conv1(jax.nn.relu(out), params['out2_w'], params['out2_b'])
    return out.transpose(0, 3, 1, 2)                          # NCHW logits


if __name__ == "__main__":
    key = jax.random.PRNGKey(0)
    kp, kx = jax.random.split(key)
    params = init_params(kp)
    B, H, W = 2, 8, 8
    # Input matches PixelCNN.forward: integer codes (B, 8, 8) in [0, 128).
    x = jax.random.randint(kx, (B, H, W), 0, 128, dtype=jnp.int32)

    prep = prepare_params(params, H, W)           # one-time weight repack
    logits = pixelcnn_forward(prep, x, input_shape=(H, W))
    logits = jax.block_until_ready(logits)

    assert logits.shape == (B, 128, H, W), logits.shape
    assert bool(jnp.all(jnp.isfinite(logits)))

    # Validate against a pure-JAX f32 reference (kernel uses bf16 matmul
    # operands -> small relative error; tolerance tightened per review).
    ref = reference_forward(params, x, input_shape=(H, W))
    rel = float(jnp.linalg.norm(logits - ref) / (jnp.linalg.norm(ref) + 1e-12))
    assert rel < 0.03, f"kernel deviates from reference: rel L2 err = {rel}"
    print("KERNEL_OK")
</pallas_src>

<mosaic_0001>
module attributes {stable_mosaic.version = 11 : i64} {
  func.func @_pixelcnn_kernel(%arg0: i32, %arg1: memref<64x64xf32, #tpu.memory_space<vmem>>, %arg2: memref<64x1536xf32, #tpu.memory_space<vmem>>, %arg3: memref<1536x64xbf16, #tpu.memory_space<vmem>>, %arg4: memref<1x64xf32, #tpu.memory_space<vmem>>, %arg5: memref<64x800xf32, #tpu.memory_space<vmem>>, %arg6: memref<10x1x64xf32, #tpu.memory_space<vmem>>, %arg7: memref<10x1x64xf32, #tpu.memory_space<vmem>>, %arg8: memref<10x64x32xbf16, #tpu.memory_space<vmem>>, %arg9: memref<10x1x32xf32, #tpu.memory_space<vmem>>, %arg10: memref<10x800x32xbf16, #tpu.memory_space<vmem>>, %arg11: memref<10x1x32xf32, #tpu.memory_space<vmem>>, %arg12: memref<10x32x64xbf16, #tpu.memory_space<vmem>>, %arg13: memref<10x1x64xf32, #tpu.memory_space<vmem>>, %arg14: memref<64x512xbf16, #tpu.memory_space<vmem>>, %arg15: memref<1x512xf32, #tpu.memory_space<vmem>>, %arg16: memref<512x128xbf16, #tpu.memory_space<vmem>>, %arg17: memref<1x128xf32, #tpu.memory_space<vmem>>, %arg18: memref<64x128xf32, #tpu.memory_space<vmem>>) attributes {dimension_semantics = [#tpu.dimension_semantics<parallel>], iteration_bounds = array<i64: 2>, scalar_prefetch = 0 : i64, scratch_operands = 0 : i64, tpu.core_type = #tpu.core_type<tc>, window_params = [{transform_indices = @transform_0, window_bounds = array<i64: 64, 64>}, {pipeline_mode = #tpu.pipeline_mode<synchronous>, transform_indices = @transform_1, window_bounds = array<i64: 64, 1536>}, {pipeline_mode = #tpu.pipeline_mode<synchronous>, transform_indices = @transform_2, window_bounds = array<i64: 1536, 64>}, {pipeline_mode = #tpu.pipeline_mode<synchronous>, transform_indices = @transform_3, window_bounds = array<i64: 1, 64>}, {pipeline_mode = #tpu.pipeline_mode<synchronous>, transform_indices = @transform_4, window_bounds = array<i64: 64, 800>}, {pipeline_mode = #tpu.pipeline_mode<synchronous>, transform_indices = @transform_5, window_bounds = array<i64: 10, 1, 64>}, {pipeline_mode = #tpu.pipeline_mode<synchronous>, transform_indices = @transform_6, window_bounds = array<i64: 10, 1, 64>}, {pipeline_mode = #tpu.pipeline_mode<synchronous>, transform_indices = @transform_7, window_bounds = array<i64: 10, 64, 32>}, {pipeline_mode = #tpu.pipeline_mode<synchronous>, transform_indices = @transform_8, window_bounds = array<i64: 10, 1, 32>}, {pipeline_mode = #tpu.pipeline_mode<synchronous>, transform_indices = @transform_9, window_bounds = array<i64: 10, 800, 32>}, {pipeline_mode = #tpu.pipeline_mode<synchronous>, transform_indices = @transform_10, window_bounds = array<i64: 10, 1, 32>}, {pipeline_mode = #tpu.pipeline_mode<synchronous>, transform_indices = @transform_11, window_bounds = array<i64: 10, 32, 64>}, {pipeline_mode = #tpu.pipeline_mode<synchronous>, transform_indices = @transform_12, window_bounds = array<i64: 10, 1, 64>}, {pipeline_mode = #tpu.pipeline_mode<synchronous>, transform_indices = @transform_13, window_bounds = array<i64: 64, 512>}, {pipeline_mode = #tpu.pipeline_mode<synchronous>, transform_indices = @transform_14, window_bounds = array<i64: 1, 512>}, {pipeline_mode = #tpu.pipeline_mode<synchronous>, transform_indices = @transform_15, window_bounds = array<i64: 512, 128>}, {pipeline_mode = #tpu.pipeline_mode<synchronous>, transform_indices = @transform_16, window_bounds = array<i64: 1, 128>}, {transform_indices = @transform_17, window_bounds = array<i64: 64, 128>}]} {
    %c0 = arith.constant 0 : index
    %c0_0 = arith.constant 0 : index
    %0 = vector.load %arg2[%c0, %c0_0] : memref<64x1536xf32, #tpu.memory_space<vmem>>, vector<64x1536xf32>
    %c0_1 = arith.constant 0 : index
    %c0_2 = arith.constant 0 : index
    %1 = vector.load %arg5[%c0_1, %c0_2] : memref<64x800xf32, #tpu.memory_space<vmem>>, vector<64x800xf32>
    %c0_3 = arith.constant 0 : index
    %c0_4 = arith.constant 0 : index
    %2 = vector.load %arg1[%c0_3, %c0_4] : memref<64x64xf32, #tpu.memory_space<vmem>>, vector<64x64xf32>
    %c27_i32 = arith.constant 27 : i32
    %3 = tpu.dynamic_rotate %2 by %c27_i32 dim 0 : vector<64x64xf32>, i32 -> vector<64x64xf32>
    %c26_i32 = arith.constant 26 : i32
    %4 = tpu.dynamic_rotate %2 by %c26_i32 dim 0 : vector<64x64xf32>, i32 -> vector<64x64xf32>
    %c25_i32 = arith.constant 25 : i32
    %5 = tpu.dynamic_rotate %2 by %c25_i32 dim 0 : vector<64x64xf32>, i32 -> vector<64x64xf32>
    %c24_i32 = arith.constant 24 : i32
    %6 = tpu.dynamic_rotate %2 by %c24_i32 dim 0 : vector<64x64xf32>, i32 -> vector<64x64xf32>
    %c23_i32 = arith.constant 23 : i32
    %7 = tpu.dynamic_rotate %2 by %c23_i32 dim 0 : vector<64x64xf32>, i32 -> vector<64x64xf32>
    %c22_i32 = arith.constant 22 : i32
    %8 = tpu.dynamic_rotate %2 by %c22_i32 dim 0 : vector<64x64xf32>, i32 -> vector<64x64xf32>
    %c21_i32 = arith.constant 21 : i32
    %9 = tpu.dynamic_rotate %2 by %c21_i32 dim 0 : vector<64x64xf32>, i32 -> vector<64x64xf32>
    %c19_i32 = arith.constant 19 : i32
    %10 = tpu.dynamic_rotate %2 by %c19_i32 dim 0 : vector<64x64xf32>, i32 -> vector<64x64xf32>
    %c18_i32 = arith.constant 18 : i32
    %11 = tpu.dynamic_rotate %2 by %c18_i32 dim 0 : vector<64x64xf32>, i32 -> vector<64x64xf32>
    %c17_i32 = arith.constant 17 : i32
    %12 = tpu.dynamic_rotate %2 by %c17_i32 dim 0 : vector<64x64xf32>, i32 -> vector<64x64xf32>
    %c16_i32 = arith.constant 16 : i32
    %13 = tpu.dynamic_rotate %2 by %c16_i32 dim 0 : vector<64x64xf32>, i32 -> vector<64x64xf32>
    %c15_i32 = arith.constant 15 : i32
    %14 = tpu.dynamic_rotate %2 by %c15_i32 dim 0 : vector<64x64xf32>, i32 -> vector<64x64xf32>
    %c14_i32 = arith.constant 14 : i32
    %15 = tpu.dynamic_rotate %2 by %c14_i32 dim 0 : vector<64x64xf32>, i32 -> vector<64x64xf32>
    %c13_i32 = arith.constant 13 : i32
    %16 = tpu.dynamic_rotate %2 by %c13_i32 dim 0 : vector<64x64xf32>, i32 -> vector<64x64xf32>
    %c11_i32 = arith.constant 11 : i32
    %17 = tpu.dynamic_rotate %2 by %c11_i32 dim 0 : vector<64x64xf32>, i32 -> vector<64x64xf32>
    %c10_i32 = arith.constant 10 : i32
    %18 = tpu.dynamic_rotate %2 by %c10_i32 dim 0 : vector<64x64xf32>, i32 -> vector<64x64xf32>
    %c9_i32 = arith.constant 9 : i32
    %19 = tpu.dynamic_rotate %2 by %c9_i32 dim 0 : vector<64x64xf32>, i32 -> vector<64x64xf32>
    %c8_i32 = arith.constant 8 : i32
    %20 = tpu.dynamic_rotate %2 by %c8_i32 dim 0 : vector<64x64xf32>, i32 -> vector<64x64xf32>
    %c7_i32 = arith.constant 7 : i32
    %21 = tpu.dynamic_rotate %2 by %c7_i32 dim 0 : vector<64x64xf32>, i32 -> vector<64x64xf32>
    %c6_i32 = arith.constant 6 : i32
    %22 = tpu.dynamic_rotate %2 by %c6_i32 dim 0 : vector<64x64xf32>, i32 -> vector<64x64xf32>
    %c5_i32 = arith.constant 5 : i32
    %23 = tpu.dynamic_rotate %2 by %c5_i32 dim 0 : vector<64x64xf32>, i32 -> vector<64x64xf32>
    %c3_i32 = arith.constant 3 : i32
    %24 = tpu.dynamic_rotate %2 by %c3_i32 dim 0 : vector<64x64xf32>, i32 -> vector<64x64xf32>
    %c2_i32 = arith.constant 2 : i32
    %25 = tpu.dynamic_rotate %2 by %c2_i32 dim 0 : vector<64x64xf32>, i32 -> vector<64x64xf32>
    %c1_i32 = arith.constant 1 : i32
    %26 = tpu.dynamic_rotate %2 by %c1_i32 dim 0 : vector<64x64xf32>, i32 -> vector<64x64xf32>
    %27 = tpu.concatenate %3, %4, %5, %6, %7, %8, %9, %10, %11, %12, %13, %14, %15, %16, %17, %18 in 1 : vector<64x64xf32>, vector<64x64xf32>, vector<64x64xf32>, vector<64x64xf32>, vector<64x64xf32>, vector<64x64xf32>, vector<64x64xf32>, vector<64x64xf32>, vector<64x64xf32>, vector<64x64xf32>, vector<64x64xf32>, vector<64x64xf32>, vector<64x64xf32>, vector<64x64xf32>, vector<64x64xf32>, vector<64x64xf32> -> vector<64x1024xf32>
    %28 = tpu.concatenate %19, %20, %21, %22, %23, %24, %25, %26 in 1 : vector<64x64xf32>, vector<64x64xf32>, vector<64x64xf32>, vector<64x64xf32>, vector<64x64xf32>, vector<64x64xf32>, vector<64x64xf32>, vector<64x64xf32> -> vector<64x512xf32>
    %29 = tpu.concatenate %27, %28 in 1 : vector<64x1024xf32>, vector<64x512xf32> -> vector<64x1536xf32>
    %30 = arith.mulf %29, %0 : vector<64x1536xf32>
    %31 = arith.truncf %30 : vector<64x1536xf32> to vector<64x1536xbf16>
    %c0_5 = arith.constant 0 : index
    %c0_6 = arith.constant 0 : index
    %32 = vector.load %arg3[%c0_5, %c0_6] : memref<1536x64xbf16, #tpu.memory_space<vmem>>, vector<1536x64xbf16>
    %cst = arith.constant dense<0.000000e+00> : vector<64x64xf32>
    %33 = tpu.matmul %31, %32, %cst {dimension_numbers = #tpu.dot_dimension_numbers<[1], [0], [0], [1], [0, 0, 1, 1], [], []>} : vector<64x1536xbf16>, vector<1536x64xbf16>, vector<64x64xf32> -> vector<64x64xf32>
    %c0_7 = arith.constant 0 : index
    %c0_8 = arith.constant 0 : index
    %34 = vector.load %arg4[%c0_7, %c0_8] : memref<1x64xf32, #tpu.memory_space<vmem>>, vector<1x64xf32>
    %35 = vector.broadcast %34 : vector<1x64xf32> to vector<64x64xf32>
    %36 = arith.addf %33, %35 : vector<64x64xf32>
    %c0_i32 = arith.constant 0 : i32
    %c10_i32_9 = arith.constant 10 : i32
    %37 = arith.addi %c0_i32, %c10_i32_9 : i32
    %c1_i32_10 = arith.constant 1 : i32
    %38 = scf.for %arg19 = %c0_i32 to %37 step %c1_i32_10 iter_args(%arg20 = %36) -> (vector<64x64xf32>)  : i32 {
      %cst_26 = arith.constant dense<0.000000e+00> : vector<64xf32>
      %56 = vector.multi_reduction <add>, %arg20, %cst_26 [1] : vector<64x64xf32> to vector<64xf32>
      %57 = vector.shape_cast %56 : vector<64xf32> to vector<64x1xf32>
      %cst_27 = arith.constant 6.400000e+01 : f32
      %58 = vector.broadcast %cst_27 : f32 to vector<64x1xf32>
      %59 = arith.divf %57, %58 : vector<64x1xf32>
      %60 = vector.broadcast %59 : vector<64x1xf32> to vector<64x64xf32>
      %61 = arith.subf %arg20, %60 : vector<64x64xf32>
      %62 = arith.mulf %61, %61 : vector<64x64xf32>
      %cst_28 = arith.constant dense<0.000000e+00> : vector<64xf32>
      %63 = vector.multi_reduction <add>, %62, %cst_28 [1] : vector<64x64xf32> to vector<64xf32>
      %64 = vector.shape_cast %63 : vector<64xf32> to vector<64x1xf32>
      %cst_29 = arith.constant 6.400000e+01 : f32
      %65 = vector.broadcast %cst_29 : f32 to vector<64x1xf32>
      %66 = arith.divf %64, %65 : vector<64x1xf32>
      %67 = vector.broadcast %59 : vector<64x1xf32> to vector<64x64xf32>
      %68 = arith.subf %arg20, %67 : vector<64x64xf32>
      %cst_30 = arith.constant 9.99999974E-6 : f32
      %69 = vector.broadcast %cst_30 : f32 to vector<64x1xf32>
      %70 = arith.addf %66, %69 : vector<64x1xf32>
      %71 = math.rsqrt %70 : vector<64x1xf32>
      %72 = vector.broadcast %71 : vector<64x1xf32> to vector<64x64xf32>
      %73 = arith.mulf %68, %72 : vector<64x64xf32>
      %74 = arith.index_cast %arg19 : i32 to index
      %c0_31 = arith.constant 0 : index
      %c0_32 = arith.constant 0 : index
      %75 = vector.load %arg6[%74, %c0_31, %c0_32] : memref<10x1x64xf32, #tpu.memory_space<vmem>>, vector<1x1x64xf32>
      %76 = vector.shape_cast %75 : vector<1x1x64xf32> to vector<1x64xf32>
      %77 = vector.broadcast %76 : vector<1x64xf32> to vector<64x64xf32>
      %78 = arith.mulf %73, %77 : vector<64x64xf32>
      %79 = arith.index_cast %arg19 : i32 to index
      %c0_33 = arith.constant 0 : index
      %c0_34 = arith.constant 0 : index
      %80 = vector.load %arg7[%79, %c0_33, %c0_34] : memref<10x1x64xf32, #tpu.memory_space<vmem>>, vector<1x1x64xf32>
      %81 = vector.shape_cast %80 : vector<1x1x64xf32> to vector<1x64xf32>
      %82 = vector.broadcast %81 : vector<1x64xf32> to vector<64x64xf32>
      %83 = arith.addf %78, %82 : vector<64x64xf32>
      %cst_35 = arith.constant 0.000000e+00 : f32
      %84 = vector.broadcast %cst_35 : f32 to vector<64x64xf32>
      %85 = arith.maximumf %83, %84 : vector<64x64xf32>
      %86 = arith.truncf %85 : vector<64x64xf32> to vector<64x64xbf16>
      %87 = arith.index_cast %arg19 : i32 to index
      %c0_36 = arith.constant 0 : index
      %c0_37 = arith.constant 0 : index
      %88 = vector.load %arg8[%87, %c0_36, %c0_37] : memref<10x64x32xbf16, #tpu.memory_space<vmem>>, vector<1x64x32xbf16>
      %89 = vector.shape_cast %88 : vector<1x64x32xbf16> to vector<64x32xbf16>
      %cst_38 = arith.constant dense<0.000000e+00> : vector<64x32xf32>
      %90 = tpu.matmul %86, %89, %cst_38 {dimension_numbers = #tpu.dot_dimension_numbers<[1], [0], [0], [1], [0, 0, 1, 1], [], []>} : vector<64x64xbf16>, vector<64x32xbf16>, vector<64x32xf32> -> vector<64x32xf32>
      %91 = arith.index_cast %arg19 : i32 to index
      %c0_39 = arith.constant 0 : index
      %c0_40 = arith.constant 0 : index
      %92 = vector.load %arg9[%91, %c0_39, %c0_40] : memref<10x1x32xf32, #tpu.memory_space<vmem>>, vector<1x1x32xf32>
      %93 = vector.shape_cast %92 : vector<1x1x32xf32> to vector<1x32xf32>
      %94 = vector.broadcast %93 : vector<1x32xf32> to vector<64x32xf32>
      %95 = arith.addf %90, %94 : vector<64x32xf32>
      %cst_41 = arith.constant 0.000000e+00 : f32
      %96 = vector.broadcast %cst_41 : f32 to vector<64x32xf32>
      %97 = arith.maximumf %95, %96 : vector<64x32xf32>
      %c27_i32_42 = arith.constant 27 : i32
      %98 = tpu.dynamic_rotate %97 by %c27_i32_42 dim 0 : vector<64x32xf32>, i32 -> vector<64x32xf32>
      %c26_i32_43 = arith.constant 26 : i32
      %99 = tpu.dynamic_rotate %97 by %c26_i32_43 dim 0 : vector<64x32xf32>, i32 -> vector<64x32xf32>
      %c25_i32_44 = arith.constant 25 : i32
      %100 = tpu.dynamic_rotate %97 by %c25_i32_44 dim 0 : vector<64x32xf32>, i32 -> vector<64x32xf32>
      %c24_i32_45 = arith.constant 24 : i32
      %101 = tpu.dynamic_rotate %97 by %c24_i32_45 dim 0 : vector<64x32xf32>, i32 -> vector<64x32xf32>
      %c23_i32_46 = arith.constant 23 : i32
      %102 = tpu.dynamic_rotate %97 by %c23_i32_46 dim 0 : vector<64x32xf32>, i32 -> vector<64x32xf32>
      %c22_i32_47 = arith.constant 22 : i32
      %103 = tpu.dynamic_rotate %97 by %c22_i32_47 dim 0 : vector<64x32xf32>, i32 -> vector<64x32xf32>
      %c21_i32_48 = arith.constant 21 : i32
      %104 = tpu.dynamic_rotate %97 by %c21_i32_48 dim 0 : vector<64x32xf32>, i32 -> vector<64x32xf32>
      %c19_i32_49 = arith.constant 19 : i32
      %105 = tpu.dynamic_rotate %97 by %c19_i32_49 dim 0 : vector<64x32xf32>, i32 -> vector<64x32xf32>
      %c18_i32_50 = arith.constant 18 : i32
      %106 = tpu.dynamic_rotate %97 by %c18_i32_50 dim 0 : vector<64x32xf32>, i32 -> vector<64x32xf32>
      %c17_i32_51 = arith.constant 17 : i32
      %107 = tpu.dynamic_rotate %97 by %c17_i32_51 dim 0 : vector<64x32xf32>, i32 -> vector<64x32xf32>
      %c16_i32_52 = arith.constant 16 : i32
      %108 = tpu.dynamic_rotate %97 by %c16_i32_52 dim 0 : vector<64x32xf32>, i32 -> vector<64x32xf32>
      %c15_i32_53 = arith.constant 15 : i32
      %109 = tpu.dynamic_rotate %97 by %c15_i32_53 dim 0 : vector<64x32xf32>, i32 -> vector<64x32xf32>
      %c14_i32_54 = arith.constant 14 : i32
      %110 = tpu.dynamic_rotate %97 by %c14_i32_54 dim 0 : vector<64x32xf32>, i32 -> vector<64x32xf32>
      %c13_i32_55 = arith.constant 13 : i32
      %111 = tpu.dynamic_rotate %97 by %c13_i32_55 dim 0 : vector<64x32xf32>, i32 -> vector<64x32xf32>
      %c11_i32_56 = arith.constant 11 : i32
      %112 = tpu.dynamic_rotate %97 by %c11_i32_56 dim 0 : vector<64x32xf32>, i32 -> vector<64x32xf32>
      %c10_i32_57 = arith.constant 10 : i32
      %113 = tpu.dynamic_rotate %97 by %c10_i32_57 dim 0 : vector<64x32xf32>, i32 -> vector<64x32xf32>
      %c9_i32_58 = arith.constant 9 : i32
      %114 = tpu.dynamic_rotate %97 by %c9_i32_58 dim 0 : vector<64x32xf32>, i32 -> vector<64x32xf32>
      %c8_i32_59 = arith.constant 8 : i32
      %115 = tpu.dynamic_rotate %97 by %c8_i32_59 dim 0 : vector<64x32xf32>, i32 -> vector<64x32xf32>
      %c7_i32_60 = arith.constant 7 : i32
      %116 = tpu.dynamic_rotate %97 by %c7_i32_60 dim 0 : vector<64x32xf32>, i32 -> vector<64x32xf32>
      %c6_i32_61 = arith.constant 6 : i32
      %117 = tpu.dynamic_rotate %97 by %c6_i32_61 dim 0 : vector<64x32xf32>, i32 -> vector<64x32xf32>
      %c5_i32_62 = arith.constant 5 : i32
      %118 = tpu.dynamic_rotate %97 by %c5_i32_62 dim 0 : vector<64x32xf32>, i32 -> vector<64x32xf32>
      %c3_i32_63 = arith.constant 3 : i32
      %119 = tpu.dynamic_rotate %97 by %c3_i32_63 dim 0 : vector<64x32xf32>, i32 -> vector<64x32xf32>
      %c2_i32_64 = arith.constant 2 : i32
      %120 = tpu.dynamic_rotate %97 by %c2_i32_64 dim 0 : vector<64x32xf32>, i32 -> vector<64x32xf32>
      %c1_i32_65 = arith.constant 1 : i32
      %121 = tpu.dynamic_rotate %97 by %c1_i32_65 dim 0 : vector<64x32xf32>, i32 -> vector<64x32xf32>
      %122 = tpu.concatenate %98, %99, %100, %101, %102, %103, %104, %105, %106, %107, %108, %109, %110, %111, %112, %113 in 1 : vector<64x32xf32>, vector<64x32xf32>, vector<64x32xf32>, vector<64x32xf32>, vector<64x32xf32>, vector<64x32xf32>, vector<64x32xf32>, vector<64x32xf32>, vector<64x32xf32>, vector<64x32xf32>, vector<64x32xf32>, vector<64x32xf32>, vector<64x32xf32>, vector<64x32xf32>, vector<64x32xf32>, vector<64x32xf32> -> vector<64x512xf32>
      %123 = tpu.concatenate %114, %115, %116, %117, %118, %119, %120, %121, %97 in 1 : vector<64x32xf32>, vector<64x32xf32>, vector<64x32xf32>, vector<64x32xf32>, vector<64x32xf32>, vector<64x32xf32>, vector<64x32xf32>, vector<64x32xf32>, vector<64x32xf32> -> vector<64x288xf32>
      %124 = tpu.concatenate %122, %123 in 1 : vector<64x512xf32>, vector<64x288xf32> -> vector<64x800xf32>
      %125 = arith.mulf %124, %1 : vector<64x800xf32>
      %126 = arith.truncf %125 : vector<64x800xf32> to vector<64x800xbf16>
      %127 = arith.index_cast %arg19 : i32 to index
      %c0_66 = arith.constant 0 : index
      %c0_67 = arith.constant 0 : index
      %128 = vector.load %arg10[%127, %c0_66, %c0_67] : memref<10x800x32xbf16, #tpu.memory_space<vmem>>, vector<1x800x32xbf16>
      %129 = vector.shape_cast %128 : vector<1x800x32xbf16> to vector<800x32xbf16>
      %cst_68 = arith.constant dense<0.000000e+00> : vector<64x32xf32>
      %130 = tpu.matmul %126, %129, %cst_68 {dimension_numbers = #tpu.dot_dimension_numbers<[1], [0], [0], [1], [0, 0, 1, 1], [], []>} : vector<64x800xbf16>, vector<800x32xbf16>, vector<64x32xf32> -> vector<64x32xf32>
      %131 = arith.index_cast %arg19 : i32 to index
      %c0_69 = arith.constant 0 : index
      %c0_70 = arith.constant 0 : index
      %132 = vector.load %arg11[%131, %c0_69, %c0_70] : memref<10x1x32xf32, #tpu.memory_space<vmem>>, vector<1x1x32xf32>
      %133 = vector.shape_cast %132 : vector<1x1x32xf32> to vector<1x32xf32>
      %134 = vector.broadcast %133 : vector<1x32xf32> to vector<64x32xf32>
      %135 = arith.addf %130, %134 : vector<64x32xf32>
      %cst_71 = arith.constant 0.000000e+00 : f32
      %136 = vector.broadcast %cst_71 : f32 to vector<64x32xf32>
      %137 = arith.maximumf %135, %136 : vector<64x32xf32>
      %138 = arith.truncf %137 : vector<64x32xf32> to vector<64x32xbf16>
      %139 = arith.index_cast %arg19 : i32 to index
      %c0_72 = arith.constant 0 : index
      %c0_73 = arith.constant 0 : index
      %140 = vector.load %arg12[%139, %c0_72, %c0_73] : memref<10x32x64xbf16, #tpu.memory_space<vmem>>, vector<1x32x64xbf16>
      %141 = vector.shape_cast %140 : vector<1x32x64xbf16> to vector<32x64xbf16>
      %cst_74 = arith.constant dense<0.000000e+00> : vector<64x64xf32>
      %142 = tpu.matmul %138, %141, %cst_74 {dimension_numbers = #tpu.dot_dimension_numbers<[1], [0], [0], [1], [0, 0, 1, 1], [], []>} : vector<64x32xbf16>, vector<32x64xbf16>, vector<64x64xf32> -> vector<64x64xf32>
      %143 = arith.index_cast %arg19 : i32 to index
      %c0_75 = arith.constant 0 : index
      %c0_76 = arith.constant 0 : index
      %144 = vector.load %arg13[%143, %c0_75, %c0_76] : memref<10x1x64xf32, #tpu.memory_space<vmem>>, vector<1x1x64xf32>
      %145 = vector.shape_cast %144 : vector<1x1x64xf32> to vector<1x64xf32>
      %146 = vector.broadcast %145 : vector<1x64xf32> to vector<64x64xf32>
      %147 = arith.addf %142, %146 : vector<64x64xf32>
      %148 = arith.addf %147, %85 : vector<64x64xf32>
      scf.yield %148 : vector<64x64xf32>
    }
    %c10_i32_11 = arith.constant 10 : i32
    %cst_12 = arith.constant 0.000000e+00 : f32
    %39 = vector.broadcast %cst_12 : f32 to vector<64x64xf32>
    %40 = arith.maximumf %38, %39 : vector<64x64xf32>
    %41 = arith.truncf %40 : vector<64x64xf32> to vector<64x64xbf16>
    %c0_13 = arith.constant 0 : index
    %c0_14 = arith.constant 0 : index
    %42 = vector.load %arg14[%c0_13, %c0_14] : memref<64x512xbf16, #tpu.memory_space<vmem>>, vector<64x512xbf16>
    %cst_15 = arith.constant dense<0.000000e+00> : vector<64x512xf32>
    %43 = tpu.matmul %41, %42, %cst_15 {dimension_numbers = #tpu.dot_dimension_numbers<[1], [0], [0], [1], [0, 0, 1, 1], [], []>} : vector<64x64xbf16>, vector<64x512xbf16>, vector<64x512xf32> -> vector<64x512xf32>
    %c0_16 = arith.constant 0 : index
    %c0_17 = arith.constant 0 : index
    %44 = vector.load %arg15[%c0_16, %c0_17] : memref<1x512xf32, #tpu.memory_space<vmem>>, vector<1x512xf32>
    %45 = vector.broadcast %44 : vector<1x512xf32> to vector<64x512xf32>
    %46 = arith.addf %43, %45 : vector<64x512xf32>
    %cst_18 = arith.constant 0.000000e+00 : f32
    %47 = vector.broadcast %cst_18 : f32 to vector<64x512xf32>
    %48 = arith.maximumf %46, %47 : vector<64x512xf32>
    %49 = arith.truncf %48 : vector<64x512xf32> to vector<64x512xbf16>
    %c0_19 = arith.constant 0 : index
    %c0_20 = arith.constant 0 : index
    %50 = vector.load %arg16[%c0_19, %c0_20] : memref<512x128xbf16, #tpu.memory_space<vmem>>, vector<512x128xbf16>
    %cst_21 = arith.constant dense<0.000000e+00> : vector<64x128xf32>
    %51 = tpu.matmul %49, %50, %cst_21 {dimension_numbers = #tpu.dot_dimension_numbers<[1], [0], [0], [1], [0, 0, 1, 1], [], []>} : vector<64x512xbf16>, vector<512x128xbf16>, vector<64x128xf32> -> vector<64x128xf32>
    %c0_22 = arith.constant 0 : index
    %c0_23 = arith.constant 0 : index
    %52 = vector.load %arg17[%c0_22, %c0_23] : memref<1x128xf32, #tpu.memory_space<vmem>>, vector<1x128xf32>
    %53 = vector.broadcast %52 : vector<1x128xf32> to vector<64x128xf32>
    %54 = arith.addf %51, %53 : vector<64x128xf32>
    %c0_24 = arith.constant 0 : index
    %c0_25 = arith.constant 0 : index
    %55 = vector.load %arg18[%c0_24, %c0_25] : memref<64x128xf32, #tpu.memory_space<vmem>>, vector<64x128xf32>
    tpu.vector_store %arg18[%c0_24, %c0_25], %54 {strides = array<i32>} : memref<64x128xf32, #tpu.memory_space<vmem>>, vector<64x128xf32>,
    return
  }
  func.func @transform_0(%arg0: i32) -> (i32, i32) {
    %c0_i32 = arith.constant 0 : i32
    %c0_i32_0 = arith.constant 0 : i32
    return %arg0, %c0_i32 : i32, i32
  }
  func.func @transform_1(%arg0: i32) -> (i32, i32) {
    %c0_i32 = arith.constant 0 : i32
    %c0_i32_0 = arith.constant 0 : i32
    %c0_i32_1 = arith.constant 0 : i32
    return %c0_i32, %c0_i32_0 : i32, i32
  }
  func.func @transform_2(%arg0: i32) -> (i32, i32) {
    %c0_i32 = arith.constant 0 : i32
    %c0_i32_0 = arith.constant 0 : i32
    %c0_i32_1 = arith.constant 0 : i32
    return %c0_i32, %c0_i32_0 : i32, i32
  }
  func.func @transform_3(%arg0: i32) -> (i32, i32) {
    %c0_i32 = arith.constant 0 : i32
    %c0_i32_0 = arith.constant 0 : i32
    %c0_i32_1 = arith.constant 0 : i32
    return %c0_i32, %c0_i32_0 : i32, i32
  }
  func.func @transform_4(%arg0: i32) -> (i32, i32) {
    %c0_i32 = arith.constant 0 : i32
    %c0_i32_0 = arith.constant 0 : i32
    %c0_i32_1 = arith.constant 0 : i32
    return %c0_i32, %c0_i32_0 : i32, i32
  }
  func.func @transform_5(%arg0: i32) -> (i32, i32, i32) {
    %c0_i32 = arith.constant 0 : i32
    %c0_i32_0 = arith.constant 0 : i32
    %c0_i32_1 = arith.constant 0 : i32
    %c0_i32_2 = arith.constant 0 : i32
    return %c0_i32, %c0_i32_0, %c0_i32_1 : i32, i32, i32
  }
  func.func @transform_6(%arg0: i32) -> (i32, i32, i32) {
    %c0_i32 = arith.constant 0 : i32
    %c0_i32_0 = arith.constant 0 : i32
    %c0_i32_1 = arith.constant 0 : i32
    %c0_i32_2 = arith.constant 0 : i32
    return %c0_i32, %c0_i32_0, %c0_i32_1 : i32, i32, i32
  }
  func.func @transform_7(%arg0: i32) -> (i32, i32, i32) {
    %c0_i32 = arith.constant 0 : i32
    %c0_i32_0 = arith.constant 0 : i32
    %c0_i32_1 = arith.constant 0 : i32
    %c0_i32_2 = arith.constant 0 : i32
    return %c0_i32, %c0_i32_0, %c0_i32_1 : i32, i32, i32
  }
  func.func @transform_8(%arg0: i32) -> (i32, i32, i32) {
    %c0_i32 = arith.constant 0 : i32
    %c0_i32_0 = arith.constant 0 : i32
    %c0_i32_1 = arith.constant 0 : i32
    %c0_i32_2 = arith.constant 0 : i32
    return %c0_i32, %c0_i32_0, %c0_i32_1 : i32, i32, i32
  }
  func.func @transform_9(%arg0: i32) -> (i32, i32, i32) {
    %c0_i32 = arith.constant 0 : i32
    %c0_i32_0 = arith.constant 0 : i32
    %c0_i32_1 = arith.constant 0 : i32
    %c0_i32_2 = arith.constant 0 : i32
    return %c0_i32, %c0_i32_0, %c0_i32_1 : i32, i32, i32
  }
  func.func @transform_10(%arg0: i32) -> (i32, i32, i32) {
    %c0_i32 = arith.constant 0 : i32
    %c0_i32_0 = arith.constant 0 : i32
    %c0_i32_1 = arith.constant 0 : i32
    %c0_i32_2 = arith.constant 0 : i32
    return %c0_i32, %c0_i32_0, %c0_i32_1 : i32, i32, i32
  }
  func.func @transform_11(%arg0: i32) -> (i32, i32, i32) {
    %c0_i32 = arith.constant 0 : i32
    %c0_i32_0 = arith.constant 0 : i32
    %c0_i32_1 = arith.constant 0 : i32
    %c0_i32_2 = arith.constant 0 : i32
    return %c0_i32, %c0_i32_0, %c0_i32_1 : i32, i32, i32
  }
  func.func @transform_12(%arg0: i32) -> (i32, i32, i32) {
    %c0_i32 = arith.constant 0 : i32
    %c0_i32_0 = arith.constant 0 : i32
    %c0_i32_1 = arith.constant 0 : i32
    %c0_i32_2 = arith.constant 0 : i32
    return %c0_i32, %c0_i32_0, %c0_i32_1 : i32, i32, i32
  }
  func.func @transform_13(%arg0: i32) -> (i32, i32) {
    %c0_i32 = arith.constant 0 : i32
    %c0_i32_0 = arith.constant 0 : i32
    %c0_i32_1 = arith.constant 0 : i32
    return %c0_i32, %c0_i32_0 : i32, i32
  }
  func.func @transform_14(%arg0: i32) -> (i32, i32) {
    %c0_i32 = arith.constant 0 : i32
    %c0_i32_0 = arith.constant 0 : i32
    %c0_i32_1 = arith.constant 0 : i32
    return %c0_i32, %c0_i32_0 : i32, i32
  }
  func.func @transform_15(%arg0: i32) -> (i32, i32) {
    %c0_i32 = arith.constant 0 : i32
    %c0_i32_0 = arith.constant 0 : i32
    %c0_i32_1 = arith.constant 0 : i32
    return %c0_i32, %c0_i32_0 : i32, i32
  }
  func.func @transform_16(%arg0: i32) -> (i32, i32) {
    %c0_i32 = arith.constant 0 : i32
    %c0_i32_0 = arith.constant 0 : i32
    %c0_i32_1 = arith.constant 0 : i32
    return %c0_i32, %c0_i32_0 : i32, i32
  }
  func.func @transform_17(%arg0: i32) -> (i32, i32) {
    %c0_i32 = arith.constant 0 : i32
    %c0_i32_0 = arith.constant 0 : i32
    return %arg0, %c0_i32 : i32, i32
  }
}

</mosaic_0001>

<bundles_post_ra>
// kernel: tpu_custom_call.1
= control target key start
LH: loop header
LB: loop body
LE: loop exit
PB: predicated region body
PF: predicated region fallthrough
CT: control target
= control target key end

     0   :  { %s10046_s0 = inlined_call_operand.vmem [shape: f32[128,64], index: 0, kind: input, shape index: {}]   ;;  %s10047_s1 = inlined_call_operand.vmem [shape: f32[64,1536], index: 1, kind: input, shape index: {}]   ;;  %s10048_s2 = inlined_call_operand.vmem [shape: bf16[1536,64], index: 2, kind: input, shape index: {}]   ;;  %s10049_s3 = inlined_call_operand.vmem [shape: f32[1,64], index: 3, kind: input, shape index: {}]   ;;  %s10050_s4 = inlined_call_operand.vmem [shape: f32[64,800], index: 4, kind: input, shape index: {}]   ;;  %s10051_s5 = inlined_call_operand.vmem [shape: f32[10,1,64], index: 5, kind: input, shape index: {}]   ;;  %s10052_s6 = inlined_call_operand.vmem [shape: f32[10,1,64], index: 6, kind: input, shape index: {}]   ;;  %s10053_s7 = inlined_call_operand.vmem [shape: bf16[10,64,32], index: 7, kind: input, shape index: {}]   ;;  %s10054_s8 = inlined_call_operand.vmem [shape: f32[10,1,32], index: 8, kind: input, shape index: {}]   ;;  %s10055_s9 = inlined_call_operand.vmem [shape: bf16[10,800,32], index: 9, kind: input, shape index: {}]   ;;  %s10056_s10 = inlined_call_operand.vmem [shape: f32[10,1,32], index: 10, kind: input, shape index: {}]   ;;  %s10057_s11 = inlined_call_operand.vmem [shape: bf16[10,32,64], index: 11, kind: input, shape index: {}]   ;;  %s10058_s12 = inlined_call_operand.vmem [shape: f32[10,1,64], index: 12, kind: input, shape index: {}]   ;;  %s10059_s13 = inlined_call_operand.vmem [shape: bf16[64,512], index: 13, kind: input, shape index: {}]   ;;  %s10060_s14 = inlined_call_operand.vmem [shape: f32[1,512], index: 14, kind: input, shape index: {}]   ;;  %s10061_s15 = inlined_call_operand.vmem [shape: bf16[512,128], index: 15, kind: input, shape index: {}]   ;;  %s10062_s16 = inlined_call_operand.vmem [shape: f32[1,128], index: 16, kind: input, shape index: {}]   ;;  %s10063_s17 = inlined_call_operand.hbm [shape: f32[128,128], index: 17, kind: output, shape index: {}]  }
   0x1   :  { %10150 = sst [smem:[#allocation138_spill]] %s10046_s0 }
   0x2   :  { %10151 = sst [smem:[#allocation139_spill]] %s10047_s1 }
   0x3   :  { %10152 = sst [smem:[#allocation140_spill]] %s10048_s2 }
   0x4   :  { %10153 = sst [smem:[#allocation141_spill]] %s10063_s17 }
   0x5   :  { %22 = vsyncpa [#allocation3], 0 }
   0x6   :  { %24 = vsyncpa [#allocation3 + $0x1], 0  ;;  %s6504_s24 = smov 0   ;;  %s6506_s25 = smov 0  }
   0x7   :  { %s6508_s26 = smov 0   ;;  %s6510_s27 = smov 0  }
   0x8 LB: > { %10154 = sst [smem:[#allocation5_spill]] %s6356_s24  ;;  %s6525_s28 = sadd.s32 4294967295, %s6368_s27   ;;  %s6368_s27 = sphi %s6510_s27, %s10497_s27   ;;  %s6364_s26 = sphi %s6508_s26, %s10499_s26   ;;  %s6360_s25 = sphi %s6506_s25, %s10501_s25   ;;  %s6356_s24 = sphi %s6504_s24, %s10500_s24  }
   0x9   : > { %10155 = sst [smem:[#allocation6_spill]] %s6364_s26  ;;  %s5170_s29 = sadd.s32 4294967294, %s6368_s27  }
   0xa   : > { %10156 = sst [smem:[#allocation7_spill]] %s6368_s27  ;;  %s6529_s0 = sadd.s32 1, %s6368_s27  }
   0xb   : > { %10157 = sst [smem:[#allocation8_spill]] %s6529_s0  ;;  %s399_s30 = sadd.s32 1, %s6364_s26 }
   0xc   : > { %s396_s18 = ssub.s32 %s6368_s27, %s6529_s0  ;;  %p409_p0 = scmp.ne.s32.totalorder %s6364_s26, %s6360_s25 }
   0xd   : > { %p397_p1 = scmp.eq.s32.totalorder %s396_s18, 0  ;;  %p410_p2 = scmp.eq.s32.totalorder %s6525_s28, 1 }
   0xe   : > { %p415_p3 = scmp.ne.s32.totalorder %s6360_s25, %s6356_s24  ;;  %p416_p4 = scmp.eq.s32.totalorder %s5170_s29, 1 }
   0xf   : > { %s6540_s19 = scalar_select %p397_p1, %s6364_s26, %s399_s30  }
  0x10   : > { %p6542_p5 = por %p410_p2, %p409_p0  ;;  %p6546_p6 = por %p416_p4, %p415_p3 }
  0x11   : > { %10158 = sst [smem:[#allocation9_spill]] %s6540_s19  ;;  %p5173_p7 = scmp.ge.s32.totalorder %s6368_s27, 1 }
  0x12   : > { %s10159_s1 = scalar_select %p6542_p5, 1, 0 }
  0x13   : > { %s10161_s20 = scalar_select %p6546_p6, 1, 0 }
  0x14   : > { %10160 = sst [smem:[#allocation10_spill]] %s10159_s1  ;;  %p491_p8 = scmp.lt.s32.totalorder %s6368_s27, 3 }
  0x15   : > { %10162 = sst [smem:[#allocation11_spill]] %s10161_s20 }
  0x16   : > { %p492_p9 = pnand %p5173_p7, %p491_p8 }
  0x18   : > { %495 = sbr.rel (%p492_p9) target bundleno = 2300 (0x8fc), region = 88 }
  0x1d   : > { %s5175_s21 = sshll.u32 %s6525_s28, 3  ;;  %v719_v0 = vlaneseq  ;;  %v6556_v1 = vld [vmem:[%s10050_s4] sm:$0xff]  ;;  %v6561_v2 = vld [vmem:[%s10050_s4 + $0x8] sm:$0xff]  ;;  %v6566_v3 = vld [vmem:[%s10050_s4 + $0x10] sm:$0xff]  ;;  %s10070_s26 = sand.u32 1, %s6360_s25   ;;  %vm1039_vm6 = vcmask 523264  }
  0x1e   : > { %10163 = vst [vmem:[#allocation12_spill] sm:$0xff] %v6556_v1  ;;  %10164 = vst [vmem:[#allocation13_spill] sm:$0xff] %v6561_v2  ;;  %p544_p10 = scmp.lt.s32.totalorder %s5175_s21, 15  ;;  %v6572_v4 = vld [vmem:[%s10050_s4 + $0x18] sm:$0xff]  ;;  %v6577_v5 = vld [vmem:[%s10050_s4 + $0x20] sm:$0xff]  ;;  %s6586_s19 = sshll.u32 %s10070_s26, 6 }
  0x1f   : > { %10165 = vst [vmem:[#allocation14_spill] sm:$0xff] %v6566_v3  ;;  %10166 = vst [vmem:[#allocation15_spill] sm:$0xff] %v6572_v4  ;;  %v6582_v6 = vld [vmem:[%s10050_s4 + $0x28] sm:$0xff]  ;;  %v6591_v7 = vld [vmem:[%s10050_s4 + $0x30] sm:$0xff]  ;;  %v6603_v10 = vshrl.u32 %v719_v0, 7  ;;  %s10180_s23 = sld [smem:[#allocation138_spill]] }
  0x20   : > { %10167 = vst [vmem:[#allocation16_spill] sm:$0xff] %v6577_v5  ;;  %10168 = vst [vmem:[#allocation17_spill] sm:$0xff] %v6582_v6  ;;  %v6596_v8 = vld [vmem:[%s10050_s4 + $0x38] sm:$0xff]  ;;  %v6601_v9 = vld [vmem:[%s10050_s4 + $0x40] sm:$0xff]  ;;  %s10503_s21 = smov (!%p544_p10, %s5175_s21), 15  ;;  %s10222_s2 = sld [smem:[#allocation140_spill]] }
  0x21   : > { %10169 = vst [vmem:[#allocation18_spill] sm:$0xff] %v6591_v7  ;;  %10170 = vst [vmem:[#allocation19_spill] sm:$0xff] %v6596_v8  ;;  %v6608_v11 = vld [vmem:[%s10050_s4 + $0x48] sm:$0xff]  ;;  %v6613_v12 = vld [vmem:[%s10050_s4 + $0x50] sm:$0xff]  ;;  %s5176_s26 = sshll.u32 %s10503_s21, 3  ;;  %vm738_vm0 = vcmp.lt.s32.totalorder %v6603_v10, 2 }
  0x22   : > { %10171 = vst [vmem:[#allocation20_spill] sm:$0xff] %v6601_v9  ;;  %10172 = vst [vmem:[#allocation21_spill] sm:$0xff] %v6603_v10  ;;  %v6618_v13 = vld [vmem:[%s10050_s4 + $0x58] sm:$0xff]  ;;  %v6623_v14 = vld [vmem:[%s10050_s4 + $0x60] sm:$0xff]  ;;  %vm721_vm1 = vcmp.lt.s32.totalorder %v6603_v10, 3  ;;  %vm789_vm2 = vcmp.lt.s32.totalorder %v6603_v10, 6 }
  0x23   : > { %10173 = vst [vmem:[#allocation22_spill] sm:$0xff] %v6608_v11  ;;  %10174 = vst [vmem:[#allocation23_spill] sm:$0xff] %v6613_v12  ;;  %v6628_v15 = vld [vmem:[%s10050_s4 + $0x68] sm:$0xff]  ;;  %v6633_v16 = vld [vmem:[%s10050_s4 + $0x70] sm:$0xff]  ;;  %vm772_vm3 = vcmp.lt.s32.totalorder %v6603_v10, 7  ;;  %vm755_vm4 = vcmp.lt.s32.totalorder %v6603_v10, 1 }
  0x24   : > { %10175 = vst [vmem:[#allocation24_spill] sm:$0xff] %v6618_v13  ;;  %10176 = vst [vmem:[#allocation25_spill] sm:$0xff] %v6623_v14  ;;  %v6638_v17 = vld [vmem:[%s10050_s4 + $0x78] sm:$0xff]  ;;  %v6648_v18 = vld [vmem:[%s10050_s4 + $0x80] sm:$0xff]  ;;  %vm806_vm5 = vcmp.lt.s32.totalorder %v6603_v10, 5  ;;  %s10233_s18 = sld [smem:[#allocation139_spill]] }
  0x25   : > { %10177 = vst [vmem:[#allocation26_spill] sm:$0xff] %v6628_v15  ;;  %10178 = vst [vmem:[#allocation27_spill] sm:$0xff] %v6633_v16  ;;  %s6643_s17 = scalar_lea.vmem %s10180_s23, %s5176_s26  ;;  %v6653_v19 = vld [vmem:[%s10050_s4 + $0x88] sm:$0xff]  ;;  %v6658_v20 = vld [vmem:[%s10050_s4 + $0x90] sm:$0xff]  ;;  %s6406_s26 = smov 64  }
  0x26   : > { %10179 = vst [vmem:[#allocation28_spill] sm:$0xff] %v6638_v17  ;;  %10181 = vst [vmem:[#allocation29_spill] sm:$0xff] %v6648_v18  ;;  %v6661_v21 = vld [vmem:[%s6643_s17 + $0x28] sm:$0xff]  ;;  %v6664_v22 = vld [vmem:[%s6643_s17 + $0x20] sm:$0xff] }
  0x27   : > { %10182 = vst [vmem:[#allocation30_spill] sm:$0xff] %v6653_v19  ;;  %10183 = vst [vmem:[#allocation31_spill] sm:$0xff] %v6658_v20  ;;  %v6668_v23 = vld [vmem:[%s6643_s17 + $0x30] sm:$0xff]  ;;  %855 = vrot.lane.b32.xlu0 %v6661_v21, %s6406_s26  ;;  %v10077_v24 = vrot.slane %v6664_v22, 6  ;;  %v735_v25 = vrot.slane %v6661_v21, 6  ;;  %v10076_v27 = vrot.slane %v6661_v21, 5 }
  0x28   : > { %v10079_v26 = vrot.slane %v6668_v23, 6  ;;  %v717_v28 = vrot.slane %v6668_v23, 5  ;;  %v6678_v29 = vld [vmem:[%s6643_s17 + $0x38] sm:$0xff]  ;;  %v6695_v32 = vld [vmem:[%s10050_s4 + $0xa0] sm:$0xff]  ;;  %v6702_v33 = vld [vmem:[%s10050_s4 + $0xa8] sm:$0xff]  ;;  %v10075_v42 = vrot.slane %v6661_v21, 2 }
  0x29   : > { %v6684_v30 = vsel %vm738_vm0, %v10077_v24, %v735_v25  ;;  %v6690_v31 = vld [vmem:[%s10050_s4 + $0x98] sm:$0xff]  ;;  %10185 = vst [vmem:[#allocation33_spill] sm:$0xff] %v6695_v32  ;;  %10186 = vst [vmem:[#allocation34_spill] sm:$0xff] %v6702_v33  ;;  %v6707_v34 = vld [vmem:[%s10050_s4 + $0xb0] sm:$0xff]  ;;  %v10078_v37 = vrot.slane %v6678_v29, 5  ;;  %v787_v43 = vrot.slane %v6668_v23, 2 }
  0x2a   : > { %10184 = vst [vmem:[#allocation32_spill] sm:$0xff] %v6690_v31  ;;  %823 = vrot.lane.b32.xlu1 %v6684_v30, %s6406_s26  ;;  %10187 = vst [vmem:[#allocation35_spill] sm:$0xff] %v6707_v34  ;;  %v6712_v35 = vld [vmem:[%s10050_s4 + $0xb8] sm:$0xff]  ;;  %v6720_v36 = vsel %vm738_vm0, %v735_v25, %v10079_v26  ;;  %v6726_v38 = vld [vmem:[%s10050_s4 + $0xc0] sm:$0xff]  ;;  %v6742_v41 = vsel %vm721_vm1, %v10076_v27, %v717_v28  ;;  %v788_v54 = vrot.slane %v6678_v29, 2  ;;  %v805_v33 = vrot.slane %v6678_v29, 3 }
  0x2b   : > { %10188 = vst [vmem:[#allocation36_spill] sm:$0xff] %v6712_v35  ;;  %857 = vrot.lane.b32.xlu0 %v6668_v23, %s6406_s26  ;;  %10189 = vst [vmem:[#allocation37_spill] sm:$0xff] %v6726_v38  ;;  %v6731_v39 = vld [vmem:[%s10050_s4 + $0xc8] sm:$0xff]  ;;  %v6736_v40 = vld [vmem:[%s10050_s4 + $0xd0] sm:$0xff]  ;;  %v6800_v53 = vsel %vm721_vm1, %v717_v28, %v10078_v37  ;;  %v6822_v58 = vsel %vm789_vm2, %v10075_v42, %v787_v43  ;;  %v751_v4 = vrot.slane %v6664_v22, 7 }
  0x2c   : > { %10190 = vst [vmem:[#allocation38_spill] sm:$0xff] %v6731_v39  ;;  %10191 = vst [vmem:[#allocation39_spill] sm:$0xff] %v6736_v40  ;;  %v6749_v44 = vld [vmem:[%s10050_s4 + $0xd8] sm:$0xff]  ;;  %v6754_v45 = vld [vmem:[%s10050_s4 + $0xe0] sm:$0xff]  ;;  %v6875_v27 = vsel %vm789_vm2, %v787_v43, %v788_v54  ;;  %v737_v43 = vrot.slane %v6678_v29, 6 }
  0x2d   : > { %10192 = vst [vmem:[#allocation40_spill] sm:$0xff] %v6749_v44  ;;  %10193 = vst [vmem:[#allocation41_spill] sm:$0xff] %v6754_v45  ;;  %v6759_v46 = vld [vmem:[%s10050_s4 + $0xe8] sm:$0xff]  ;;  %v6765_v47 = vld [vmem:[%s10050_s4 + $0xf0] sm:$0xff] }
  0x2e   : > { %10194 = vst [vmem:[#allocation42_spill] sm:$0xff] %v6759_v46  ;;  %10195 = vst [vmem:[#allocation43_spill] sm:$0xff] %v6765_v47  ;;  %v6770_v48 = vld [vmem:[%s10050_s4 + $0xf8] sm:$0xff]  ;;  %v6775_v49 = vld [vmem:[%s10050_s4 + $0x100] sm:$0xff]  ;;  %825 = vrot.lane.b32.xlu1 %v6720_v36, %s6406_s26 }
  0x2f   : > { %10196 = vst [vmem:[#allocation44_spill] sm:$0xff] %v6770_v48  ;;  %10197 = vst [vmem:[#allocation45_spill] sm:$0xff] %v6775_v49  ;;  %v6782_v50 = vld [vmem:[%s10050_s4 + $0x108] sm:$0xff]  ;;  %v6787_v51 = vld [vmem:[%s10050_s4 + $0x110] sm:$0xff]  ;;  %919 = vrot.lane.b32.xlu0 %v6742_v41, %s6406_s26 }
  0x30   : > { %10198 = vst [vmem:[#allocation46_spill] sm:$0xff] %v6782_v50  ;;  %10199 = vst [vmem:[#allocation47_spill] sm:$0xff] %v6787_v51  ;;  %v6792_v52 = vld [vmem:[%s10050_s4 + $0x118] sm:$0xff]  ;;  %v6806_v55 = vld [vmem:[%s10050_s4 + $0x120] sm:$0xff] }
  0x31   : > { %10200 = vst [vmem:[#allocation48_spill] sm:$0xff] %v6792_v52  ;;  %10201 = vst [vmem:[#allocation49_spill] sm:$0xff] %v6806_v55  ;;  %v6811_v56 = vld [vmem:[%s10050_s4 + $0x128] sm:$0xff]  ;;  %v6816_v57 = vld [vmem:[%s10050_s4 + $0x130] sm:$0xff]  ;;  %v10081_v52 = vrot.slane %v6661_v21, 7  ;;  %v753_v55 = vrot.slane %v6668_v23, 7 }
  0x32   : > { %10202 = vst [vmem:[#allocation50_spill] sm:$0xff] %v6811_v56  ;;  %10203 = vst [vmem:[#allocation51_spill] sm:$0xff] %v6816_v57  ;;  %v6827_v59 = vld [vmem:[%s10050_s4 + $0x138] sm:$0xff]  ;;  %v6832_v60 = vld [vmem:[%s10050_s4 + $0x140] sm:$0xff]  ;;  %921 = vrot.lane.b32.xlu1 %v6800_v53, %s6406_s26 }
  0x33   : > { %10204 = vst [vmem:[#allocation52_spill] sm:$0xff] %v6822_v58  ;;  %10205 = vst [vmem:[#allocation53_spill] sm:$0xff] %v6827_v59  ;;  %v6837_v61 = vld [vmem:[%s10050_s4 + $0x148] sm:$0xff]  ;;  %v6842_v62 = vld [vmem:[%s10050_s4 + $0x150] sm:$0xff]  ;;  %887 = vrot.lane.b32.xlu0 %v6822_v58, %s6406_s26  ;;  %v7199_v16 = vsel %vm755_vm4, %v10081_v52, %v753_v55 }
  0x34   : > { %10206 = vst [vmem:[#allocation54_spill] sm:$0xff] %v6832_v60  ;;  %10207 = vst [vmem:[#allocation55_spill] sm:$0xff] %v6837_v61  ;;  %v6847_v63 = vld [vmem:[%s10050_s4 + $0x158] sm:$0xff]  ;;  %v6852_v0 = vld [vmem:[%s10050_s4 + $0x160] sm:$0xff] }
  0x35   : > { %10208 = vst [vmem:[#allocation56_spill] sm:$0xff] %v6842_v62  ;;  %10209 = vst [vmem:[#allocation57_spill] sm:$0xff] %v6847_v63  ;;  %v6859_v25 = vld [vmem:[%s10050_s4 + $0x168] sm:$0xff]  ;;  %v6864_v28 = vld [vmem:[%s10050_s4 + $0x170] sm:$0xff]  ;;  %v785_v63 = vrot.slane %v6664_v22, 2 }
  0x36   : > { %10210 = vst [vmem:[#allocation58_spill] sm:$0xff] %v6852_v0  ;;  %10211 = vst [vmem:[#allocation59_spill] sm:$0xff] %v6859_v25  ;;  %v6869_v42 = vld [vmem:[%s10050_s4 + $0x178] sm:$0xff]  ;;  %v6880_v24 = vld [vmem:[%s10050_s4 + $0x180] sm:$0xff]  ;;  %889 = vrot.lane.b32.xlu1 %v6875_v27, %s6406_s26 }
  0x37   : > { %10212 = vst [vmem:[#allocation60_spill] sm:$0xff] %v6864_v28  ;;  %10213 = vst [vmem:[#allocation61_spill] sm:$0xff] %v6869_v42  ;;  %v6885_v37 = vld [vmem:[%s10050_s4 + $0x188] sm:$0xff]  ;;  %v6890_v26 = vld [vmem:[%s10050_s4 + $0x190] sm:$0xff]  ;;  %859 = vrot.lane.b32.xlu0 %v6678_v29, %s6406_s26 }
  0x38   : > { %10214 = vst [vmem:[#allocation62_spill] sm:$0xff] %v6880_v24  ;;  %10215 = vst [vmem:[#allocation63_spill] sm:$0xff] %v6885_v37  ;;  %v6893_v51 = vld [vmem:[%s6643_s17] sm:$0xff]  ;;  %v6899_v28 = vld [vmem:[%s10050_s4 + $0x198] sm:$0xff] }
  0x39   : > { %10216 = vst [vmem:[#allocation64_spill] sm:$0xff] %v6890_v26  ;;  %10217 = vst [vmem:[#allocation65_spill] sm:$0xff] %v6899_v28  ;;  %v6904_v24 = vld [vmem:[%s10050_s4 + $0x1a0] sm:$0xff]  ;;  %v6909_v61 = vld [vmem:[%s10050_s4 + $0x1a8] sm:$0xff]  ;;  %v781_v40 = vrot.slane %v6893_v51, 2  ;;  %v798_v46 = vrot.slane %v6893_v51, 3 }
  0x3a   : > { %10218 = vst [vmem:[#allocation66_spill] sm:$0xff] %v6904_v24  ;;  %10219 = vst [vmem:[#allocation67_spill] sm:$0xff] %v6909_v61  ;;  %v6914_v42 = vld [vmem:[%s10050_s4 + $0x1b0] sm:$0xff]  ;;  %v6919_v59 = vld [vmem:[%s10050_s4 + $0x1b8] sm:$0xff]  ;;  %v730_v61 = vrot.slane %v6893_v51, 6  ;;  %861 = vrot.lane.b32.xlu1 %v6893_v51, %s6406_s26 }
  0x3b   : > { %10220 = vst [vmem:[#allocation68_spill] sm:$0xff] %v6914_v42  ;;  %10221 = vst [vmem:[#allocation69_spill] sm:$0xff] %v6919_v59  ;;  %v6924_v49 = vld [vmem:[%s6643_s17 + $0x8] sm:$0xff]  ;;  %v6040_v28 = vld [vmem:[%s10222_s2 + $0x78] sm:$0xff]   ;;  %v10223_v42 = vrot.slane %v6668_v23, 6  ;;  %v711_v59 = vrot.slane %v6893_v51, 5 }
  0x3c   : > { %v6041_v60 = vld [vmem:[%s10222_s2 + $0x38] sm:$0xff]   ;;  %v6042_v50 = vld [vmem:[%s10222_s2 + $0x70] sm:$0xff]   ;;  %5418 = vmatprep.subr.bf16.mxu0 %v6040_v28  ;;  %v6954_v24 = vsel %vm738_vm0, %v737_v43, %v730_v61  ;;  %v712_v25 = vrot.slane %v6924_v49, 5  ;;  %v6044_v28 = vld [vmem:[%s10222_s2 + $0x68] sm:$0xff]   ;;  %v782_v31 = vrot.slane %v6924_v49, 2  ;;  %v731_v3 = vrot.slane %v6924_v49, 6 }
  0x3d   : > { %v6936_v0 = vsel %vm738_vm0, %v10223_v42, %v737_v43  ;;  %5419 = vmatpush3.bf16.msra.mxu0 %v6041_v60  ;;  %v6043_v42 = vld [vmem:[%s10222_s2 + $0x30] sm:$0xff]   ;;  %v10224_v60 = vrot.slane %v6678_v29, 5  ;;  %v6045_v43 = vld [vmem:[%s10222_s2 + $0xf8] sm:$0xff]   ;;  %v6048_v14 = vld [vmem:[%s10222_s2 + $0x60] sm:$0xff]   ;;  %v765_v34 = vrot.slane %v6924_v49, 1 }
  0x3e   : > { %827 = vrot.lane.b32.xlu0 %v6936_v0, %s6406_s26  ;;  %5420 = vmatprep.subr.bf16.mxu0 %v6042_v50  ;;  %v6046_v50 = vld [vmem:[%s10222_s2 + $0x28] sm:$0xff]   ;;  %v6982_v57 = vsel %vm721_vm1, %v711_v59, %v712_v25  ;;  %v6049_v19 = vld [vmem:[%s10222_s2 + $0xf0] sm:$0xff]   ;;  %v6054_v11 = vld [vmem:[%s10222_s2 + $0x18] sm:$0xff]  }
  0x3f   : > { %v6964_v48 = vsel %vm721_vm1, %v10224_v60, %v711_v59  ;;  %829 = vrot.lane.b32.xlu1 %v6954_v24, %s6406_s26  ;;  %v6047_v60 = vld [vmem:[%s10222_s2 + $0xb8] sm:$0xff]   ;;  %5458 = vmatprep.subr.bf16.mxu1 %v6045_v43  ;;  %v6050_v59 = vld [vmem:[%s10222_s2 + $0x20] sm:$0xff]   ;;  %v7010_v43 = vsel %vm789_vm2, %v781_v40, %v782_v31 }
  0x40   : > { %5459 = vmatpush3.bf16.msra.mxu1 %v6047_v60  ;;  %v6052_v60 = vld [vmem:[%s10222_s2 + $0x58] sm:$0xff]   ;;  %v6057_v38 = vld [vmem:[%s10222_s2 + $0xe0] sm:$0xff]  }
  0x41   : > { %5421 = vmatpush3.bf16.msra.mxu0 %v6043_v42  ;;  %v6990_v42 = vsel %vm789_vm2, %v788_v54, %v781_v40  ;;  %v6051_v54 = vld [vmem:[%s10222_s2 + $0xb0] sm:$0xff]   ;;  %5460 = vmatprep.subr.bf16.mxu1 %v6049_v19  ;;  %v7031_v40 = vld [vmem:[%s6643_s17 + $0x18] sm:$0xff]  ;;  %v6071_v45 = vld [vmem:[%s10222_s2 + $0x80] sm:$0xff]  }
  0x42   : > { %923 = vrot.lane.b32.xlu0 %v6964_v48, %s6406_s26  ;;  %5422 = vmatprep.subr.bf16.mxu0 %v6044_v28  ;;  %v7001_v28 = vld [vmem:[%s6643_s17 + $0x10] sm:$0xff]  ;;  %v6063_v37 = vld [vmem:[%s10222_s2 + $0x98] sm:$0xff]   ;;  %v733_v26 = vrot.slane %v7031_v40, 6  ;;  %v551_v47 = vld [vmem:[%s10233_s18] sm:$0xff] }
  0x43   : > { %925 = vrot.lane.b32.xlu1 %v6982_v57, %s6406_s26  ;;  %v732_v19 = vrot.slane %v7001_v28, 6  ;;  %v713_v6 = vrot.slane %v7001_v28, 5  ;;  %v783_v62 = vrot.slane %v7001_v28, 2  ;;  %v766_v8 = vrot.slane %v7001_v28, 1  ;;  %v642_v15 = vld [vmem:[%s10233_s18 + $0x2d8] sm:$0xff] }
  0x44   : > { %5461 = vmatpush3.bf16.msra.mxu1 %v6051_v54  ;;  %v7035_v54 = vsel %vm738_vm0, %v730_v61, %v731_v3  ;;  %v6058_v61 = vld [vmem:[%s10222_s2 + $0x10] sm:$0xff]  }
  0x45   : > { %5423 = vmatpush3.bf16.msra.mxu0 %v6046_v50  ;;  %v6053_v50 = vld [vmem:[%s10222_s2 + $0xe8] sm:$0xff]  }
  0x46   : > { %891 = vrot.lane.b32.xlu0 %v6990_v42, %s6406_s26  ;;  %5424 = vmatprep.subr.bf16.mxu0 %v6048_v14  ;;  %v6055_v14 = vld [vmem:[%s10222_s2 + $0xa8] sm:$0xff]  }
  0x47   : > { %893 = vrot.lane.b32.xlu1 %v7010_v43, %s6406_s26  ;;  %5462 = vmatprep.subr.bf16.mxu1 %v6053_v50  ;;  %v714_v50 = vrot.slane %v7031_v40, 5 }
  0x48   : > { %5463 = vmatpush3.bf16.msra.mxu1 %v6055_v14  ;;  %v6059_v14 = vld [vmem:[%s10222_s2 + $0xa0] sm:$0xff]  }
  0x49   : > { %5425 = vmatpush3.bf16.msra.mxu0 %v6050_v59  ;;  %v6056_v59 = vld [vmem:[%s10222_s2 + $0x50] sm:$0xff]   ;;  %5464 = vmatprep.subr.bf16.mxu1 %v6057_v38  ;;  %v784_v38 = vrot.slane %v7031_v40, 2 }
  0x4a   : > { %863 = vrot.lane.b32.xlu0 %v6924_v49, %s6406_s26  ;;  %5426 = vmatprep.subr.bf16.mxu0 %v6052_v60  ;;  %v7053_v60 = vsel %vm738_vm0, %v731_v3, %v732_v19  ;;  %v6060_v3 = vld [vmem:[%s10222_s2 + $0x48] sm:$0xff]  }
  0x4b   : > { %865 = vrot.lane.b32.xlu1 %v7001_v28, %s6406_s26 }
  0x4c   : > { %5465 = vmatpush3.bf16.msra.mxu1 %v6059_v14  ;;  %v6062_v14 = vld [vmem:[%s10222_s2 + $0x8] sm:$0xff]  }
  0x4d   : > { %5427 = vmatpush3.bf16.msra.mxu0 %v6054_v11  ;;  %v7061_v11 = vsel %vm721_vm1, %v712_v25, %v713_v6  ;;  %v7076_v25 = vsel %vm721_vm1, %v713_v6, %v714_v50  ;;  %v6064_v6 = vld [vmem:[%s10222_s2 + $0x40] sm:$0xff]  }
  0x4e   : > { %831 = vrot.lane.b32.xlu0 %v7035_v54, %s6406_s26  ;;  %5428 = vmatprep.subr.bf16.mxu0 %v6056_v59  ;;  %v6061_v59 = vld [vmem:[%s10222_s2 + $0xd8] sm:$0xff]  }
  0x4f   : > { %833 = vrot.lane.b32.xlu1 %v7053_v60, %s6406_s26  ;;  %5466 = vmatprep.subr.bf16.mxu1 %v6061_v59  ;;  %v6066_v59 = vld [vmem:[%s10222_s2] sm:$0xff]  }
  0x50   : > { %5467 = vmatpush3.bf16.msra.mxu1 %v6063_v37  ;;  %v6068_v37 = vld [vmem:[%s10222_s2 + $0xc8] sm:$0xff]  }
  0x51   : > { %5429 = vmatpush3.bf16.msra.mxu0 %v6058_v61  ;;  %v7084_v61 = vsel %vm789_vm2, %v782_v31, %v783_v62  ;;  %v7101_v31 = vsel %vm789_vm2, %v783_v62, %v784_v38  ;;  %v7119_v62 = vsel %vm738_vm0, %v732_v19, %v733_v26  ;;  %v10225_v19 = vrot.slane %v6664_v22, 6 }
  0x52   : > { %927 = vrot.lane.b32.xlu0 %v7061_v11, %s6406_s26  ;;  %5430 = vmatprep.subr.bf16.mxu0 %v6060_v3  ;;  %v6065_v3 = vld [vmem:[%s10222_s2 + $0xd0] sm:$0xff]  }
  0x53   : > { %929 = vrot.lane.b32.xlu1 %v7076_v25, %s6406_s26  ;;  %5468 = vmatprep.subr.bf16.mxu1 %v6065_v3  ;;  %v6069_v3 = vld [vmem:[%s10222_s2 + $0x88] sm:$0xff]  }
  0x55   : > { %5431 = vmatpush3.bf16.msra.mxu0 %v6062_v14  ;;  %v6067_v14 = vld [vmem:[%s10222_s2 + $0x90] sm:$0xff]  }
  0x56   : > { %895 = vrot.lane.b32.xlu0 %v7084_v61, %s6406_s26  ;;  %5432 = vmatprep.subr.bf16.mxu0 %v6064_v6  ;;  %v715_v6 = vrot.slane %v6664_v22, 5 }
  0x57   : > { %897 = vrot.lane.b32.xlu1 %v7101_v31, %s6406_s26  ;;  %5469 = vmatpush3.bf16.msra.mxu1 %v6067_v14  ;;  %v7136_v14 = vsel %vm738_vm0, %v733_v26, %v10225_v19  ;;  %v10226_v26 = vrot.slane %v6661_v21, 5  ;;  %v771_v19 = vrot.slane %v6678_v29, 1 }
  0x58   : > { %5470 = vmatprep.subr.bf16.mxu1 %v6068_v37  ;;  %v7140_v37 = vsel %vm721_vm1, %v714_v50, %v715_v6  ;;  %v7158_v50 = vsel %vm789_vm2, %v784_v38, %v785_v63  ;;  %v764_v38 = vrot.slane %v6893_v51, 1 }
  0x59   : > { %5433 = vmatpush3.bf16.msra.mxu0 %v6066_v59  ;;  %v6070_v59 = vld [vmem:[%s10222_s2 + $0xc0] sm:$0xff]  }
  0x5a   : > { %867 = vrot.lane.b32.xlu0 %v7031_v40, %s6406_s26  ;;  %v7234_v9 = vsel %vm772_vm3, %v764_v38, %v765_v34 }
  0x5b   : > { %869 = vrot.lane.b32.xlu1 %v6664_v22, %s6406_s26  ;;  %5471 = vmatpush3.bf16.msra.mxu1 %v6069_v3  ;;  %v7154_v3 = vsel %vm721_vm1, %v715_v6, %v10226_v26  ;;  %v10227_v6 = vrot.slane %v6661_v21, 2 }
  0x5c   : > { %5472 = vmatprep.subr.bf16.mxu1 %v6070_v59  ;;  %v10080_v59 = vrot.slane %v6668_v23, 1 }
  0x5e   : > { %835 = vrot.lane.b32.xlu0 %v7119_v62, %s6406_s26  ;;  %v7178_v26 = vsel %vm772_vm3, %v10080_v59, %v771_v19  ;;  %v754_v59 = vrot.slane %v6678_v29, 7  ;;  %v10229_v29 = vrot.slane %v6668_v23, 3 }
  0x5f   : > { %837 = vrot.lane.b32.xlu1 %v7136_v14, %s6406_s26  ;;  %5473 = vmatpush3.bf16.msra.mxu1 %v6071_v45  ;;  %v7171_v45 = vsel %vm789_vm2, %v785_v63, %v10227_v6  ;;  %v6072_v63 = vld [vmem:[%s10222_s2 + $0x178] sm:$0xff]   ;;  %v7192_v6 = vsel %vm772_vm3, %v771_v19, %v764_v38  ;;  %v799_v38 = vrot.slane %v6924_v49, 3 }
  0x60   : > { %10228 = vst [vmem:[#allocation70_spill] sm:$0xff] %v7171_v45  ;;  %5498 = vmatprep.subr.bf16.mxu0 %v6072_v63  ;;  %v6075_v19 = vld [vmem:[%s10222_s2 + $0x1f8] sm:$0xff]   ;;  %v7213_v52 = vsel %vm755_vm4, %v753_v55, %v754_v59  ;;  %v7220_v63 = vsel %vm806_vm5, %v10229_v29, %v805_v33  ;;  %v7229_v55 = vsel %vm806_vm5, %v805_v33, %v798_v46  ;;  %v747_v29 = vrot.slane %v6893_v51, 7 }
  0x61   : > { %5538 = vmatprep.subr.bf16.mxu1 %v6075_v19  ;;  %v7243_v19 = vsel %vm772_vm3, %v765_v34, %v766_v8  ;;  %v748_v33 = vrot.slane %v6924_v49, 7  ;;  %v800_v34 = vrot.slane %v7001_v28, 3  ;;  %v7262_v17 = vsel %vm806_vm5, %v798_v46, %v799_v38 }
  0x62   : > { %931 = vrot.lane.b32.xlu0 %v7140_v37, %s6406_s26  ;;  %v7248_v2 = vsel %vm755_vm4, %v754_v59, %v747_v29  ;;  %v767_v59 = vrot.slane %v7031_v40, 1  ;;  %v749_v46 = vrot.slane %v7001_v28, 7 }
  0x63   : > { %933 = vrot.lane.b32.xlu1 %v7154_v3, %s6406_s26  ;;  %v7257_v51 = vsel %vm755_vm4, %v747_v29, %v748_v33  ;;  %v7271_v49 = vsel %vm806_vm5, %v799_v38, %v800_v34  ;;  %v768_v29 = vrot.slane %v6664_v22, 1  ;;  %v750_v38 = vrot.slane %v7031_v40, 7 }
  0x64   : > { %v7276_v1 = vsel %vm772_vm3, %v766_v8, %v767_v59  ;;  %v7290_v13 = vsel %vm755_vm4, %v748_v33, %v749_v46  ;;  %v801_v8 = vrot.slane %v7031_v40, 3  ;;  %v769_v33 = vrot.slane %v6661_v21, 1 }
  0x65   : > { %v7285_v5 = vsel %vm772_vm3, %v767_v59, %v768_v29  ;;  %v7299_v28 = vsel %vm755_vm4, %v749_v46, %v750_v38  ;;  %v802_v59 = vrot.slane %v6664_v22, 3  ;;  %v10231_v22 = vrot.slane %v6661_v21, 7 }
  0x66   : > { %899 = vrot.lane.b32.xlu0 %v7158_v50, %s6406_s26  ;;  %v7304_v12 = vsel %vm806_vm5, %v800_v34, %v801_v8  ;;  %v7317_v46 = vsel %vm772_vm3, %v768_v29, %v769_v33  ;;  %v10230_v34 = vrot.slane %v6668_v23, 1  ;;  %v803_v29 = vrot.slane %v6661_v21, 3 }
  0x67   : > { %901 = vrot.lane.b32.xlu1 %v7171_v45, %s6406_s26  ;;  %v7313_v40 = vsel %vm806_vm5, %v801_v8, %v802_v59  ;;  %v7330_v8 = vsel %vm755_vm4, %v750_v38, %v751_v4  ;;  %v758_v35 = vsel %vm755_vm4, %v751_v4, %v10231_v22  ;;  %v10232_v38 = vrot.slane %v6668_v23, 3  ;;  %v631_v4 = vld [vmem:[%s10233_s18 + $0x280] sm:$0xff] }
  0x68   : > { %v774_v18 = vsel %vm772_vm3, %v769_v33, %v10230_v34  ;;  %v7342_v56 = vsel %vm806_vm5, %v802_v59, %v803_v29  ;;  %v552_v34 = vld [vmem:[%s10233_s18 + $0x8] sm:$0xff]  ;;  %v643_v23 = vld [vmem:[%s10233_s18 + $0x2e0] sm:$0xff] }
  0x69   : > { %v808_v33 = vsel %vm806_vm5, %v803_v29, %v10232_v38  ;;  %v564_v29 = vld [vmem:[%s10233_s18 + $0x68] sm:$0xff] }
  0x6a   : > { %983 = vrot.lane.b32.xlu0 %v7178_v26, %s6406_s26 }
  0x6b   : > { %985 = vrot.lane.b32.xlu1 %v7192_v6, %s6406_s26 }
  0x6e   : > { %951 = vrot.lane.b32.xlu0 %v7199_v16, %s6406_s26 }
  0x6f   : > { %953 = vrot.lane.b32.xlu1 %v7213_v52, %s6406_s26 }
  0x72   : > { %1015 = vrot.lane.b32.xlu0 %v7220_v63, %s6406_s26 }
  0x73   : > { %1017 = vrot.lane.b32.xlu1 %v7229_v55, %s6406_s26 }
  0x76   : > { %987 = vrot.lane.b32.xlu0 %v7234_v9, %s6406_s26 }
  0x77   : > { %989 = vrot.lane.b32.xlu1 %v7243_v19, %s6406_s26 }
  0x7a   : > { %955 = vrot.lane.b32.xlu0 %v7248_v2, %s6406_s26 }
  0x7b   : > { %957 = vrot.lane.b32.xlu1 %v7257_v51, %s6406_s26 }
  0x7e   : > { %1019 = vrot.lane.b32.xlu0 %v7262_v17, %s6406_s26 }
  0x7f   : > { %1021 = vrot.lane.b32.xlu1 %v7271_v49, %s6406_s26 }
  0x82   : > { %991 = vrot.lane.b32.xlu0 %v7276_v1, %s6406_s26 }
  0x83   : > { %993 = vrot.lane.b32.xlu1 %v7285_v5, %s6406_s26 }
  0x86   : > { %959 = vrot.lane.b32.xlu0 %v7290_v13, %s6406_s26 }
  0x87   : > { %961 = vrot.lane.b32.xlu1 %v7299_v28, %s6406_s26 }
  0x8a   : > { %1023 = vrot.lane.b32.xlu0 %v7304_v12, %s6406_s26 }
  0x8b   : > { %1025 = vrot.lane.b32.xlu1 %v7313_v40, %s6406_s26 }
  0x8e   : > { %995 = vrot.lane.b32.xlu0 %v7317_v46, %s6406_s26 }
  0x8f   : > { %997 = vrot.lane.b32.xlu1 %v774_v18, %s6406_s26 }
  0x92   : > { %963 = vrot.lane.b32.xlu0 %v7330_v8, %s6406_s26 }
  0x93   : > { %965 = vrot.lane.b32.xlu1 %v758_v35, %s6406_s26 }
  0x96   : > { %1027 = vrot.lane.b32.xlu0 %v7342_v56, %s6406_s26 }
  0x97   : > { %1029 = vrot.lane.b32.xlu1 %v808_v33, %s6406_s26 }
  0x99   : > { %v856_v21 = vpop.permute.xlu0 %855 }
  0x9a   : > { %v1048_v59 = vsel %vm1039_vm6, %v758_v35, %v856_v21  ;;  %v630_v35 = vld [vmem:[%s10233_s18 + $0x278] sm:$0xff] }
  0x9b   : > { %v7365_v38 = vmul.f32 %v1048_v59, %v631_v4  ;;  %v1097_v20 = vmul.f32 %v1048_v59, %v552_v34  ;;  %v563_v4 = vld [vmem:[%s10233_s18 + $0x60] sm:$0xff]  ;;  %v633_v59 = vld [vmem:[%s10233_s18 + $0x290] sm:$0xff] }
  0x9c   : > { %v824_v22 = vpop.permute.xlu1 %823 }
  0x9d   : > { %10234 = vst [vmem:[#allocation71_spill] sm:$0xff] %v7365_v38  ;;  %v858_v21 = vpop.permute.xlu0 %857  ;;  %v1040_v39 = vsel %vm1039_vm6, %v7154_v3, %v824_v22 }
  0x9e   : > { %v1049_v44 = vsel %vm1039_vm6, %v7199_v16, %v858_v21  ;;  %v1096_v3 = vmul.f32 %v1040_v39, %v551_v47  ;;  %v7395_v58 = vmul.f32 %v1040_v39, %v630_v35  ;;  %v6073_v39 = vld [vmem:[%s10222_s2 + $0x138] sm:$0xff]   ;;  %v565_v21 = vld [vmem:[%s10233_s18 + $0x70] sm:$0xff] }
  0x9f   : > { %v7380_v32 = vmul.f32 %v1049_v44, %v643_v23  ;;  %v1109_v7 = vmul.f32 %v1049_v44, %v564_v29  ;;  %v554_v23 = vld [vmem:[%s10233_s18 + $0x18] sm:$0xff] }
  0xa0   : > { %v826_v10 = vpop.permute.xlu1 %825 }
  0xa1   : > { %v1041_v16 = vsel %vm1039_vm6, %v6742_v41, %v826_v10  ;;  %v1193_v34 = vpack.c.bf16 %v1109_v7, %v1097_v20  ;;  %v920_v22 = vpop.permute.xlu0 %919  ;;  %v645_v10 = vld [vmem:[%s10233_s18 + $0x2f0] sm:$0xff]  ;;  %v566_v7 = vld [vmem:[%s10233_s18 + $0x78] sm:$0xff] }
  0xa2   : > { %v1108_v44 = vmul.f32 %v1041_v16, %v563_v4  ;;  %v7397_v29 = vmul.f32 %v1041_v16, %v642_v15  ;;  %v1064_v45 = vsel %vm1039_vm6, %v808_v33, %v920_v22  ;;  %v553_v20 = vld [vmem:[%s10233_s18 + $0x10] sm:$0xff]  ;;  %v632_v15 = vld [vmem:[%s10233_s18 + $0x288] sm:$0xff] }
  0xa3   : > { %2047 = vmatprep.mubr.bf16.mxu0 %v1193_v34  ;;  %v7415_v41 = vmul.f32 %v1064_v45, %v633_v59  ;;  %v1099_v35 = vmul.f32 %v1064_v45, %v554_v23  ;;  %v6074_v4 = vld [vmem:[%s10222_s2 + $0x170] sm:$0xff]  }
  0xa4   : > { %v922_v47 = vpop.permute.xlu1 %921  ;;  %v1192_v33 = vpack.c.bf16 %v1108_v44, %v1096_v3  ;;  %v644_v3 = vld [vmem:[%s10233_s18 + $0x2e8] sm:$0xff]  ;;  %v559_v44 = vld [vmem:[%s10233_s18 + $0x40] sm:$0xff] }
  0xa5   : > { %10235 = vst [vmem:[#allocation72_spill] sm:$0xff] %v7415_v41  ;;  %v1065_v34 = vsel %vm1039_vm6, %v7220_v63, %v922_v47  ;;  %v888_v22 = vpop.permute.xlu0 %887  ;;  %v576_v63 = vld [vmem:[%s10233_s18 + $0xc8] sm:$0xff] }
  0xa6   : > { %v7427_v59 = vmul.f32 %v1065_v34, %v645_v10  ;;  %2048 = vmatmul.mubr.bf16.vlgmr.msra.gmra.mxu0 %v1192_v33  ;;  %v1056_v45 = vsel %vm1039_vm6, %v774_v18, %v888_v22  ;;  %v1111_v23 = vmul.f32 %v1065_v34, %v566_v7  ;;  %v6076_v10 = vld [vmem:[%s10222_s2 + $0x130] sm:$0xff]   ;;  %v6078_v7 = vld [vmem:[%s10222_s2 + $0x168] sm:$0xff]  }
  0xa7   : > { %5499 = vmatpush3.bf16.msra.mxu0 %v6073_v39  ;;  %v1098_v47 = vmul.f32 %v1056_v45, %v553_v20  ;;  %v7442_v18 = vmul.f32 %v1056_v45, %v632_v15  ;;  %v571_v20 = vld [vmem:[%s10233_s18 + $0xa0] sm:$0xff]  ;;  %v588_v15 = vld [vmem:[%s10233_s18 + $0x128] sm:$0xff] }
  0xa8   : > { %10236 = vst [vmem:[#allocation73_spill] sm:$0xff] %v7427_v59  ;;  %v890_v33 = vpop.permute.xlu1 %889  ;;  %v1195_v22 = vpack.c.bf16 %v1111_v23, %v1099_v35  ;;  %5500 = vmatprep.subr.bf16.mxu0 %v6074_v4  ;;  %v6080_v23 = vld [vmem:[%s10222_s2 + $0x128] sm:$0xff]  }
  0xa9   : > { %v1057_v39 = vsel %vm1039_vm6, %v7178_v26, %v890_v33  ;;  %v860_v16 = vpop.permute.xlu0 %859  ;;  %v6077_v26 = vld [vmem:[%s10222_s2 + $0x1b8] sm:$0xff]  }
  0xaa   : > { %v1110_v35 = vmul.f32 %v1057_v39, %v565_v21  ;;  %v7457_v4 = vmul.f32 %v1057_v39, %v644_v3  ;;  %2112 = vmatprep.mubr.bf16.mxu1 %v1195_v22  ;;  %v1050_v45 = vsel %vm1039_vm6, %v7213_v52, %v860_v16  ;;  %v575_v3 = vld [vmem:[%s10233_s18 + $0xc0] sm:$0xff]  ;;  %v6079_v52 = vld [vmem:[%s10222_s2 + $0x1f0] sm:$0xff]  }
  0xab   : > { %5501 = vmatpush3.bf16.msra.mxu0 %v6076_v10  ;;  %v7467_v33 = vmul.f32 %v1050_v45, %v559_v44  ;;  %v1121_v34 = vmul.f32 %v1050_v45, %v576_v63  ;;  %v6082_v16 = vld [vmem:[%s10222_s2 + $0x160] sm:$0xff]   ;;  %v6081_v22 = vld [vmem:[%s10222_s2 + $0x1b0] sm:$0xff]   ;;  %v578_v45 = vld [vmem:[%s10233_s18 + $0xd8] sm:$0xff] }
  0xac   : > { %v862_v41 = vpop.permute.xlu1 %861  ;;  %v1194_v21 = vpack.c.bf16 %v1110_v35, %v1098_v47  ;;  %5502 = vmatprep.subr.bf16.mxu0 %v6078_v7  ;;  %v587_v47 = vld [vmem:[%s10233_s18 + $0x120] sm:$0xff]  ;;  %v573_v44 = vld [vmem:[%s10233_s18 + $0xb0] sm:$0xff] }
  0xad   : > { %v1051_v63 = vsel %vm1039_vm6, %v7248_v2, %v862_v41  ;;  %v6083_v2 = vld [vmem:[%s10222_s2 + $0x1e8] sm:$0xff]   ;;  %v561_v41 = vld [vmem:[%s10233_s18 + $0x50] sm:$0xff] }
  0xae   : > { %v7488_v7 = vmul.f32 %v1051_v63, %v571_v20  ;;  %v1133_v39 = vmul.f32 %v1051_v63, %v588_v15  ;;  %2113 = vmatmul.mubr.bf16.vlgmr.msra.gmra.mxu1 %v1194_v21  ;;  %v6084_v20 = vld [vmem:[%s10222_s2 + $0x120] sm:$0xff]  }
  0xaf   : > { %5539 = vmatpush3.bf16.msra.mxu1 %v6077_v26  ;;  %5503 = vmatpush3.bf16.msra.mxu0 %v6080_v23 }
  0xb0   : > { %v828_v10 = vpop.permute.xlu0 %827  ;;  %v1205_v63 = vpack.c.bf16 %v1133_v39, %v1121_v34  ;;  %5540 = vmatprep.subr.bf16.mxu1 %v6079_v52  ;;  %5504 = vmatprep.subr.bf16.mxu0 %v6082_v16  ;;  %v6085_v34 = vld [vmem:[%s10222_s2 + $0x1a8] sm:$0xff]   ;;  %v6087_v39 = vld [vmem:[%s10222_s2 + $0x1e0] sm:$0xff]  }
  0xb1   : > { %v7492_v35 = vsel %vm1039_vm6, %v6800_v53, %v828_v10  ;;  %v830_v21 = vpop.permute.xlu1 %829  ;;  %v6086_v10 = vld [vmem:[%s10222_s2 + $0x158] sm:$0xff]   ;;  %v560_v16 = vld [vmem:[%s10233_s18 + $0x48] sm:$0xff] }
  0xb2   : > { %v1120_v15 = vmul.f32 %v7492_v35, %v575_v3  ;;  %v7514_v26 = vsel %vm1039_vm6, %v6964_v48, %v830_v21  ;;  %v590_v3 = vld [vmem:[%s10233_s18 + $0x138] sm:$0xff]  ;;  %2055 = vmatprep.mubr.bf16.mxu0 %v1205_v63 }
  0xb3   : > { %v1132_v52 = vmul.f32 %v7514_v26, %v587_v47  ;;  %5541 = vmatpush3.bf16.msra.mxu1 %v6081_v22  ;;  %5505 = vmatpush3.bf16.msra.mxu0 %v6084_v20  ;;  %v6088_v21 = vld [vmem:[%s10222_s2 + $0x118] sm:$0xff]   ;;  %v577_v22 = vld [vmem:[%s10233_s18 + $0xd0] sm:$0xff] }
  0xb4   : > { %v924_v23 = vpop.permute.xlu0 %923  ;;  %5542 = vmatprep.subr.bf16.mxu1 %v6083_v2  ;;  %5506 = vmatprep.subr.bf16.mxu0 %v6086_v10 }
  0xb5   : > { %v1066_v48 = vsel %vm1039_vm6, %v7229_v55, %v924_v23  ;;  %v926_v63 = vpop.permute.xlu1 %925  ;;  %v1204_v59 = vpack.c.bf16 %v1132_v52, %v1120_v15  ;;  %v6090_v55 = vld [vmem:[%s10222_s2 + $0x150] sm:$0xff]  }
  0xb6   : > { %v7537_v53 = vmul.f32 %v1066_v48, %v561_v41  ;;  %v1123_v47 = vmul.f32 %v1066_v48, %v578_v45  ;;  %v1067_v23 = vsel %vm1039_vm6, %v7262_v17, %v926_v63  ;;  %v572_v45 = vld [vmem:[%s10233_s18 + $0xa8] sm:$0xff]  ;;  %v589_v17 = vld [vmem:[%s10233_s18 + $0x130] sm:$0xff]  ;;  %v583_v48 = vld [vmem:[%s10233_s18 + $0x100] sm:$0xff] }
  0xb7   : > { %v7547_v38 = vmul.f32 %v1067_v23, %v573_v44  ;;  %v1135_v41 = vmul.f32 %v1067_v23, %v590_v3  ;;  %2056 = vmatmul.mubr.bf16.gmra.mxu0 %v1204_v59  ;;  %5543 = vmatpush3.bf16.msra.mxu1 %v6085_v34  ;;  %v6089_v44 = vld [vmem:[%s10222_s2 + $0x1a0] sm:$0xff]   ;;  %v6091_v34 = vld [vmem:[%s10222_s2 + $0x1d8] sm:$0xff]  }
  0xb8   : > { %v892_v20 = vpop.permute.xlu0 %891  ;;  %5507 = vmatpush3.bf16.msra.mxu0 %v6088_v21  ;;  %5544 = vmatprep.subr.bf16.mxu1 %v6087_v39 }
  0xb9   : > { %v1058_v2 = vsel %vm1039_vm6, %v7192_v6, %v892_v20  ;;  %v6092_v6 = vld [vmem:[%s10222_s2 + $0x110] sm:$0xff]   ;;  %v1202_v59 = vpack.c.bf16 %v7547_v38, %v7537_v53  ;;  %v894_v3 = vpop.permute.xlu1 %893  ;;  %v1207_v52 = vpack.c.bf16 %v1135_v41, %v1123_v47  ;;  %5508 = vmatprep.subr.bf16.mxu0 %v6090_v55  ;;  %v600_v47 = vld [vmem:[%s10233_s18 + $0x188] sm:$0xff]  ;;  %v6093_v41 = vld [vmem:[%s10222_s2 + $0x198] sm:$0xff]   ;;  %v10242_v38 = vpack.c.bf16 %v7457_v4, %v7442_v18 }
  0xba   : > { %v7554_v15 = vmul.f32 %v1058_v2, %v560_v16  ;;  %v1122_v10 = vmul.f32 %v1058_v2, %v577_v22  ;;  %v6094_v16 = vld [vmem:[%s10222_s2 + $0x148] sm:$0xff]   ;;  %v1059_v21 = vsel %vm1039_vm6, %v7234_v9, %v894_v3  ;;  %v595_v22 = vld [vmem:[%s10233_s18 + $0x160] sm:$0xff]  ;;  %v6095_v3 = vld [vmem:[%s10222_s2 + $0x1d0] sm:$0xff]  }
  0xbb   : > { %v7581_v23 = vmul.f32 %v1059_v21, %v572_v45  ;;  %v1134_v39 = vmul.f32 %v1059_v21, %v589_v17  ;;  %2120 = vmatprep.mubr.bf16.mxu1 %v1207_v52  ;;  %v612_v9 = vld [vmem:[%s10233_s18 + $0x1e8] sm:$0xff]  ;;  %5545 = vmatpush3.bf16.msra.mxu1 %v6089_v44  ;;  %v6098_v44 = vld [vmem:[%s10222_s2 + $0x140] sm:$0xff]  }
  0xbc   : > { %v864_v63 = vpop.permute.xlu0 %863  ;;  %5509 = vmatpush3.bf16.msra.mxu0 %v6092_v6  ;;  %5546 = vmatprep.subr.bf16.mxu1 %v6091_v34 }
  0xbd   : > { %v1052_v55 = vsel %vm1039_vm6, %v7257_v51, %v864_v63  ;;  %v6096_v51 = vld [vmem:[%s10222_s2 + $0x108] sm:$0xff]   ;;  %v866_v45 = vpop.permute.xlu1 %865  ;;  %v1206_v17 = vpack.c.bf16 %v1134_v39, %v1122_v10  ;;  %5510 = vmatprep.subr.bf16.mxu0 %v6094_v16  ;;  %v1201_v6 = vpack.c.bf16 %v7581_v23, %v7554_v15  ;;  %v599_v10 = vld [vmem:[%s10233_s18 + $0x180] sm:$0xff] }
  0xbe   : > { %v7588_v20 = vmul.f32 %v1052_v55, %v583_v48  ;;  %v1145_v2 = vmul.f32 %v1052_v55, %v600_v47  ;;  %v1053_v52 = vsel %vm1039_vm6, %v7290_v13, %v866_v45  ;;  %v611_v47 = vld [vmem:[%s10233_s18 + $0x1e0] sm:$0xff]  ;;  %v6097_v13 = vld [vmem:[%s10222_s2 + $0x190] sm:$0xff]   ;;  %v602_v45 = vld [vmem:[%s10233_s18 + $0x198] sm:$0xff] }
  0xbf   : > { %v7612_v34 = vmul.f32 %v1053_v52, %v595_v22  ;;  %v1157_v16 = vmul.f32 %v1053_v52, %v612_v9  ;;  %2121 = vmatmul.mubr.bf16.gmra.mxu1 %v1206_v17  ;;  %v6100_v63 = vld [vmem:[%s10222_s2 + $0x100] sm:$0xff]   ;;  %v6104_v9 = vld [vmem:[%s10222_s2 + $0x278] sm:$0xff]   ;;  %v608_v15 = vld [vmem:[%s10233_s18 + $0x1c8] sm:$0xff] }
  0xc0   : > { %v832_v48 = vpop.permute.xlu0 %831  ;;  %5547 = vmatpush3.bf16.msra.mxu1 %v6093_v41  ;;  %5511 = vmatpush3.bf16.msra.mxu0 %v6096_v51  ;;  %v614_v52 = vld [vmem:[%s10233_s18 + $0x1f8] sm:$0xff]  ;;  %v620_v23 = vld [vmem:[%s10233_s18 + $0x228] sm:$0xff] }
  0xc1   : > { %v7616_v21 = vsel %vm1039_vm6, %v6982_v57, %v832_v48  ;;  %v834_v55 = vpop.permute.xlu1 %833  ;;  %v1217_v22 = vpack.c.bf16 %v1157_v16, %v1145_v2  ;;  %5548 = vmatprep.subr.bf16.mxu1 %v6095_v3  ;;  %5512 = vmatprep.subr.bf16.mxu0 %v6098_v44  ;;  %v6099_v57 = vld [vmem:[%s10222_s2 + $0x1c8] sm:$0xff]   ;;  %v1212_v41 = vpack.c.bf16 %v7612_v34, %v7588_v20  ;;  %v585_v2 = vld [vmem:[%s10233_s18 + $0x110] sm:$0xff] }
  0xc2   : > { %v1144_v39 = vmul.f32 %v7616_v21, %v599_v10  ;;  %v7638_v51 = vsel %vm1039_vm6, %v7061_v11, %v834_v55  ;;  %v597_v11 = vld [vmem:[%s10233_s18 + $0x170] sm:$0xff]  ;;  %v6101_v10 = vld [vmem:[%s10222_s2 + $0x188] sm:$0xff]  }
  0xc3   : > { %v1156_v3 = vmul.f32 %v7638_v51, %v611_v47  ;;  %2063 = vmatprep.mubr.bf16.mxu0 %v1217_v22  ;;  %v10246_v34 = vld [vmem:[#allocation73_spill] sm:$0xff] }
  0xc4   : > { %v928_v17 = vpop.permute.xlu0 %927  ;;  %5549 = vmatpush3.bf16.msra.mxu1 %v6097_v13  ;;  %5513 = vmatpush3.bf16.msra.mxu0 %v6100_v63  ;;  %v584_v13 = vld [vmem:[%s10233_s18 + $0x108] sm:$0xff]  ;;  %v601_v63 = vld [vmem:[%s10233_s18 + $0x190] sm:$0xff] }
  0xc5   : > { %v1068_v44 = vsel %vm1039_vm6, %v7271_v49, %v928_v17  ;;  %v930_v47 = vpop.permute.xlu1 %929  ;;  %v1216_v55 = vpack.c.bf16 %v1156_v3, %v1144_v39  ;;  %5550 = vmatprep.subr.bf16.mxu1 %v6099_v57  ;;  %v6102_v49 = vld [vmem:[%s10222_s2 + $0x1c0] sm:$0xff]   ;;  %5578 = vmatprep.subr.bf16.mxu0 %v6104_v9  ;;  %v613_v9 = vld [vmem:[%s10233_s18 + $0x1f0] sm:$0xff] }
  0xc6   : > { %v7658_v48 = vmul.f32 %v1068_v44, %v585_v2  ;;  %v1147_v16 = vmul.f32 %v1068_v44, %v602_v45  ;;  %v1069_v22 = vsel %vm1039_vm6, %v7304_v12, %v930_v47  ;;  %v596_v12 = vld [vmem:[%s10233_s18 + $0x168] sm:$0xff]  ;;  %v6103_v17 = vld [vmem:[%s10222_s2 + $0x180] sm:$0xff]  }
  0xc7   : > { %v7671_v45 = vmul.f32 %v1069_v22, %v597_v11  ;;  %v1159_v39 = vmul.f32 %v1069_v22, %v614_v52  ;;  %2064 = vmatmul.mubr.bf16.gmra.mxu0 %v1216_v55  ;;  %v607_v55 = vld [vmem:[%s10233_s18 + $0x1c0] sm:$0xff]  ;;  %v624_v22 = vld [vmem:[%s10233_s18 + $0x248] sm:$0xff] }
  0xc8   : > { %v896_v2 = vpop.permute.xlu0 %895  ;;  %5551 = vmatpush3.bf16.msra.mxu1 %v6101_v10 }
  0xc9   : > { %v1060_v57 = vsel %vm1039_vm6, %v7243_v19, %v896_v2  ;;  %v898_v11 = vpop.permute.xlu1 %897  ;;  %v1219_v52 = vpack.c.bf16 %v1159_v39, %v1147_v16  ;;  %5552 = vmatprep.subr.bf16.mxu1 %v6102_v49  ;;  %v6106_v19 = vld [vmem:[%s10222_s2 + $0x2f8] sm:$0xff]   ;;  %v1214_v47 = vpack.c.bf16 %v7671_v45, %v7658_v48  ;;  %v636_v2 = vld [vmem:[%s10233_s18 + $0x2a8] sm:$0xff] }
  0xca   : > { %v7684_v3 = vmul.f32 %v1060_v57, %v584_v13  ;;  %v1146_v44 = vmul.f32 %v1060_v57, %v601_v63  ;;  %v1061_v10 = vsel %vm1039_vm6, %v7276_v1, %v898_v11  ;;  %v619_v1 = vld [vmem:[%s10233_s18 + $0x220] sm:$0xff] }
  0xcb   : > { %v7699_v49 = vmul.f32 %v1061_v10, %v596_v12  ;;  %v1158_v13 = vmul.f32 %v1061_v10, %v613_v9  ;;  %2128 = vmatprep.mubr.bf16.mxu1 %v1219_v52  ;;  %v623_v52 = vld [vmem:[%s10233_s18 + $0x240] sm:$0xff] }
  0xcc   : > { %v868_v16 = vpop.permute.xlu0 %867  ;;  %5553 = vmatpush3.bf16.msra.mxu1 %v6103_v17 }
  0xcd   : > { %v1054_v63 = vsel %vm1039_vm6, %v7299_v28, %v868_v16  ;;  %v870_v11 = vpop.permute.xlu1 %869  ;;  %v1218_v12 = vpack.c.bf16 %v1158_v13, %v1146_v44  ;;  %5618 = vmatprep.subr.bf16.mxu1 %v6106_v19  ;;  %v1213_v9 = vpack.c.bf16 %v7699_v49, %v7684_v3  ;;  %v635_v44 = vld [vmem:[%s10233_s18 + $0x2a0] sm:$0xff] }
  0xce   : > { %v7709_v39 = vmul.f32 %v1054_v63, %v607_v55  ;;  %v1169_v57 = vmul.f32 %v1054_v63, %v624_v22  ;;  %v1055_v28 = vsel %vm1039_vm6, %v7330_v8, %v870_v11 }
  0xcf   : > { %v7718_v16 = vmul.f32 %v1055_v28, %v619_v1  ;;  %v1181_v17 = vmul.f32 %v1055_v28, %v636_v2  ;;  %2129 = vmatmul.mubr.bf16.gmra.mxu1 %v1218_v12  ;;  %v626_v1 = vld [vmem:[%s10233_s18 + $0x258] sm:$0xff] }
  0xd0   : > { %v836_v10 = vpop.permute.xlu0 %835  ;;  %v638_v12 = vld [vmem:[%s10233_s18 + $0x2b8] sm:$0xff] }
  0xd1   : > { %v7722_v55 = vsel %vm1039_vm6, %v7076_v25, %v836_v10  ;;  %v838_v8 = vpop.permute.xlu1 %837  ;;  %v1229_v22 = vpack.c.bf16 %v1181_v17, %v1169_v57  ;;  %v609_v25 = vld [vmem:[%s10233_s18 + $0x1d0] sm:$0xff] }
  0xd2   : > { %v1168_v19 = vmul.f32 %v7722_v55, %v623_v52  ;;  %v7732_v63 = vsel %vm1039_vm6, %v7140_v37, %v838_v8  ;;  %v621_v37 = vld [vmem:[%s10233_s18 + $0x230] sm:$0xff] }
  0xd3   : > { %v1180_v11 = vmul.f32 %v7732_v63, %v635_v44  ;;  %2071 = vmatprep.mubr.bf16.mxu0 %v1229_v22  ;;  %v558_v22 = vld [vmem:[%s10233_s18 + $0x38] sm:$0xff] }
  0xd4   : > { %v932_v2 = vpop.permute.xlu0 %931  ;;  %v1103_v13 = vmul.f32 %v7492_v35, %v558_v22  ;;  %v568_v35 = vld [vmem:[%s10233_s18 + $0x88] sm:$0xff] }
  0xd5   : > { %v1070_v57 = vsel %vm1039_vm6, %v7313_v40, %v932_v2  ;;  %v934_v10 = vpop.permute.xlu1 %933  ;;  %v1228_v17 = vpack.c.bf16 %v1180_v11, %v1168_v19  ;;  %v625_v40 = vld [vmem:[%s10233_s18 + $0x250] sm:$0xff] }
  0xd6   : > { %v7749_v28 = vmul.f32 %v1070_v57, %v609_v25  ;;  %v1171_v52 = vmul.f32 %v1070_v57, %v626_v1  ;;  %v1071_v44 = vsel %vm1039_vm6, %v7342_v56, %v934_v10  ;;  %v570_v25 = vld [vmem:[%s10233_s18 + $0x98] sm:$0xff]  ;;  %v637_v1 = vld [vmem:[%s10233_s18 + $0x2b0] sm:$0xff] }
  0xd7   : > { %v7762_v2 = vmul.f32 %v1071_v44, %v621_v37  ;;  %v1183_v19 = vmul.f32 %v1071_v44, %v638_v12  ;;  %2072 = vmatmul.mubr.bf16.gmra.mxu0 %v1228_v17  ;;  %v1115_v12 = vmul.f32 %v7514_v26, %v570_v25  ;;  %v556_v17 = vld [vmem:[%s10233_s18 + $0x28] sm:$0xff]  ;;  %v555_v37 = vld [vmem:[%s10233_s18 + $0x20] sm:$0xff] }
  0xd8   : > { %v900_v8 = vpop.permute.xlu0 %899 }
  0xd9   : > { %v7766_v56 = vsel %vm1039_vm6, %v7285_v5, %v900_v8  ;;  %v902_v57 = vpop.permute.xlu1 %901  ;;  %v1231_v10 = vpack.c.bf16 %v1183_v19, %v1171_v52  ;;  %v6136_v52 = vld [vmem:[%s6643_s17 + $0x30] sm:$0xff]  ;;  %v10243_v53 = vpack.c.bf16 %v7762_v2, %v7749_v28  ;;  %v8103_v28 = vld [vmem:[%s10049_s3] ss:$0 sm:$0xff] }
  0xda   : > { %v1170_v11 = vmul.f32 %v7766_v56, %v625_v40  ;;  %v7778_v5 = vsel %vm1039_vm6, %v7317_v46, %v902_v57  ;;  %v6137_v46 = vld [vmem:[%s6643_s17 + $0x38] sm:$0xff]  ;;  %v1199_v57 = vpack.c.bf16 %v1115_v12, %v1103_v13 }
  0xdb   : > { %v1182_v40 = vmul.f32 %v7778_v5, %v637_v1  ;;  %2136 = vmatprep.mubr.bf16.mxu1 %v1231_v10  ;;  %v634_v1 = vld [vmem:[%s10233_s18 + $0x298] sm:$0xff] }
  0xdc   : > { %v984_v44 = vpop.permute.xlu0 %983  ;;  %v646_v13 = vld [vmem:[%s10233_s18 + $0x2f8] sm:$0xff] }
  0xdd   : > { %v1080_v8 = vsel %vm1039_vm6, %v6136_v52, %v984_v44  ;;  %v986_v22 = vpop.permute.xlu1 %985  ;;  %v1230_v25 = vpack.c.bf16 %v1182_v40, %v1170_v11  ;;  %v567_v11 = vld [vmem:[%s10233_s18 + $0x80] sm:$0xff] }
  0xde   : > { %v1101_v26 = vmul.f32 %v1080_v8, %v556_v17  ;;  %v1081_v19 = vsel %vm1039_vm6, %v6137_v46, %v986_v22 }
  0xdf   : > { %v1113_v44 = vmul.f32 %v1081_v19, %v568_v35  ;;  %2137 = vmatmul.mubr.bf16.gmra.mxu1 %v1230_v25  ;;  %v582_v25 = vld [vmem:[%s10233_s18 + $0xf8] sm:$0xff] }
  0xe0   : > { %v952_v10 = vpop.permute.xlu0 %951  ;;  %2242 = vmatprep.mubr.bf16.mxu1 %v1199_v57  ;;  %v6105_v57 = vld [vmem:[%s10222_s2 + $0x238] sm:$0xff]  }
  0xe1   : > { %v1072_v17 = vsel %vm1039_vm6, %v6720_v36, %v952_v10  ;;  %v954_v52 = vpop.permute.xlu1 %953  ;;  %v1197_v8 = vpack.c.bf16 %v1113_v44, %v1101_v26  ;;  %v557_v36 = vld [vmem:[%s10233_s18 + $0x30] sm:$0xff] }
  0xe2   : > { %v1100_v12 = vmul.f32 %v1072_v17, %v555_v37  ;;  %v7805_v40 = vmul.f32 %v1072_v17, %v634_v1  ;;  %v1073_v35 = vsel %vm1039_vm6, %v6936_v0, %v954_v52  ;;  %v594_v37 = vld [vmem:[%s10233_s18 + $0x158] sm:$0xff]  ;;  %v569_v26 = vld [vmem:[%s10233_s18 + $0x90] sm:$0xff] }
  0xe3   : > { %v1112_v46 = vmul.f32 %v1073_v35, %v567_v11  ;;  %v7818_v19 = vmul.f32 %v1073_v35, %v646_v13  ;;  %2177 = vmatprep.mubr.bf16.mxu0 %v1197_v8  ;;  %v6107_v17 = vld [vmem:[%s10222_s2 + $0x270] sm:$0xff]   ;;  %v1139_v13 = vmul.f32 %v7638_v51, %v594_v37 }
  0xe4   : > { %v1016_v22 = vpop.permute.xlu0 %1015 }
  0xe5   : > { %v1088_v0 = vsel %vm1039_vm6, %v6875_v27, %v1016_v22  ;;  %v1196_v1 = vpack.c.bf16 %v1112_v46, %v1100_v12  ;;  %v1018_v44 = vpop.permute.xlu1 %1017  ;;  %v1239_v11 = vpack.c.bf16 %v7818_v19, %v7805_v40  ;;  %v1127_v27 = vmul.f32 %v7616_v21, %v582_v25  ;;  %v580_v12 = vld [vmem:[%s10233_s18 + $0xe8] sm:$0xff]  ;;  %v6109_v46 = vld [vmem:[%s10222_s2 + $0x230] sm:$0xff]  }
  0xe6   : > { %v1102_v10 = vmul.f32 %v1088_v0, %v557_v36  ;;  %v1089_v52 = vsel %vm1039_vm6, %v6990_v42, %v1018_v44  ;;  %v6138_v36 = vld [vmem:[%s6643_s17] sm:$0xff]  ;;  %v592_v21 = vld [vmem:[%s10233_s18 + $0x148] sm:$0xff]  ;;  %v6108_v42 = vld [vmem:[%s10222_s2 + $0x2b8] sm:$0xff]  }
  0xe7   : > { %v1114_v35 = vmul.f32 %v1089_v52, %v569_v26  ;;  %2178 = vmatmul.mubr.bf16.vlgmr.msra.gmra.mxu0 %v1196_v1  ;;  %v6110_v0 = vld [vmem:[%s10222_s2 + $0x2f0] sm:$0xff]   ;;  %v6139_v26 = vld [vmem:[%s6643_s17 + $0x8] sm:$0xff]  ;;  %v579_v44 = vld [vmem:[%s10233_s18 + $0xe0] sm:$0xff] }
  0xe8   : > { %v988_v8 = vpop.permute.xlu0 %987  ;;  %5579 = vmatpush3.bf16.msra.mxu0 %v6105_v57  ;;  %v1211_v57 = vpack.c.bf16 %v1139_v13, %v1127_v27  ;;  %v591_v27 = vld [vmem:[%s10233_s18 + $0x140] sm:$0xff]  ;;  %v6112_v13 = vld [vmem:[%s10222_s2 + $0x2b0] sm:$0xff]  }
  0xe9   : > { %v1082_v22 = vsel %vm1039_vm6, %v6138_v36, %v988_v8  ;;  %v1198_v51 = vpack.c.bf16 %v1114_v35, %v1102_v10  ;;  %v990_v37 = vpop.permute.xlu1 %989  ;;  %5580 = vmatprep.subr.bf16.mxu0 %v6107_v17  ;;  %v6111_v17 = vld [vmem:[%s10222_s2 + $0x268] sm:$0xff]  }
  0xea   : > { %v1125_v25 = vmul.f32 %v1082_v22, %v580_v12  ;;  %v1083_v1 = vsel %vm1039_vm6, %v6139_v26, %v990_v37  ;;  %v6114_v22 = vld [vmem:[%s10222_s2 + $0x2e8] sm:$0xff]   ;;  %v606_v37 = vld [vmem:[%s10233_s18 + $0x1b8] sm:$0xff]  ;;  %v593_v26 = vld [vmem:[%s10233_s18 + $0x150] sm:$0xff] }
  0xeb   : > { %v1137_v52 = vmul.f32 %v1083_v1, %v592_v21  ;;  %2243 = vmatmul.mubr.bf16.vlgmr.msra.gmra.mxu1 %v1198_v51  ;;  %v6116_v1 = vld [vmem:[%s10222_s2 + $0x2a8] sm:$0xff]  }
  0xec   : > { %v956_v10 = vpop.permute.xlu0 %955  ;;  %2250 = vmatprep.mubr.bf16.mxu1 %v1211_v57  ;;  %5619 = vmatpush3.bf16.msra.mxu1 %v6108_v42  ;;  %v581_v42 = vld [vmem:[%s10233_s18 + $0xf0] sm:$0xff] }
  0xed   : > { %v7864_v12 = vsel %vm1039_vm6, %v6954_v24, %v956_v10  ;;  %v958_v35 = vpop.permute.xlu1 %957  ;;  %v1209_v36 = vpack.c.bf16 %v1137_v52, %v1125_v25  ;;  %5581 = vmatpush3.bf16.msra.mxu0 %v6109_v46  ;;  %5620 = vmatprep.subr.bf16.mxu1 %v6110_v0  ;;  %v6113_v24 = vld [vmem:[%s10222_s2 + $0x228] sm:$0xff]   ;;  %v6115_v25 = vld [vmem:[%s10222_s2 + $0x260] sm:$0xff]   ;;  %v618_v46 = vld [vmem:[%s10233_s18 + $0x218] sm:$0xff]  ;;  %v1151_v52 = vmul.f32 %v7722_v55, %v606_v37 }
  0xee   : > { %v1124_v8 = vmul.f32 %v7864_v12, %v579_v44  ;;  %v7881_v21 = vsel %vm1039_vm6, %v7035_v54, %v958_v35  ;;  %5582 = vmatprep.subr.bf16.mxu0 %v6111_v17  ;;  %v6117_v17 = vld [vmem:[%s10222_s2 + $0x220] sm:$0xff]   ;;  %v6121_v37 = vld [vmem:[%s10222_s2 + $0x218] sm:$0xff]  }
  0xef   : > { %v1136_v54 = vmul.f32 %v7881_v21, %v591_v27  ;;  %2185 = vmatprep.mubr.bf16.mxu0 %v1209_v36  ;;  %v1163_v27 = vmul.f32 %v7732_v63, %v618_v46  ;;  %v6119_v36 = vld [vmem:[%s10222_s2 + $0x258] sm:$0xff]   ;;  %v6120_v63 = vld [vmem:[%s10222_s2 + $0x2a0] sm:$0xff]  }
  0xf0   : > { %v1020_v51 = vpop.permute.xlu0 %1019  ;;  %5621 = vmatpush3.bf16.msra.mxu1 %v6112_v13  ;;  %v6122_v46 = vld [vmem:[%s10222_s2 + $0x2d8] sm:$0xff]  }
  0xf1   : > { %v1090_v0 = vsel %vm1039_vm6, %v7010_v43, %v1020_v51  ;;  %v1022_v44 = vpop.permute.xlu1 %1021  ;;  %v1208_v10 = vpack.c.bf16 %v1136_v54, %v1124_v8  ;;  %5583 = vmatpush3.bf16.msra.mxu0 %v6113_v24  ;;  %5622 = vmatprep.subr.bf16.mxu1 %v6114_v22  ;;  %v6118_v43 = vld [vmem:[%s10222_s2 + $0x2e0] sm:$0xff]   ;;  %v604_v8 = vld [vmem:[%s10233_s18 + $0x1a8] sm:$0xff]  ;;  %v6140_v22 = vld [vmem:[%s6643_s17 + $0x10] sm:$0xff] }
  0xf2   : > { %v1126_v57 = vmul.f32 %v1090_v0, %v581_v42  ;;  %v1091_v13 = vsel %vm1039_vm6, %v7084_v61, %v1022_v44  ;;  %5584 = vmatprep.subr.bf16.mxu0 %v6115_v25  ;;  %v616_v61 = vld [vmem:[%s10233_s18 + $0x208] sm:$0xff]  ;;  %v6141_v54 = vld [vmem:[%s6643_s17 + $0x18] sm:$0xff] }
  0xf3   : > { %v1138_v24 = vmul.f32 %v1091_v13, %v593_v26  ;;  %2186 = vmatmul.mubr.bf16.gmra.mxu0 %v1208_v10  ;;  %v1223_v26 = vpack.c.bf16 %v1163_v27, %v1151_v52  ;;  %v6124_v52 = vld [vmem:[%s10222_s2 + $0x298] sm:$0xff]  }
  0xf4   : > { %v992_v35 = vpop.permute.xlu0 %991  ;;  %5623 = vmatpush3.bf16.msra.mxu1 %v6116_v1  ;;  %v603_v1 = vld [vmem:[%s10233_s18 + $0x1a0] sm:$0xff] }
  0xf5   : > { %v1084_v55 = vsel %vm1039_vm6, %v6140_v22, %v992_v35  ;;  %v994_v51 = vpop.permute.xlu1 %993  ;;  %v1210_v25 = vpack.c.bf16 %v1138_v24, %v1126_v57  ;;  %5585 = vmatpush3.bf16.msra.mxu0 %v6117_v17  ;;  %5624 = vmatprep.subr.bf16.mxu1 %v6118_v43  ;;  %v6123_v57 = vld [vmem:[%s10222_s2 + $0x250] sm:$0xff]   ;;  %v615_v43 = vld [vmem:[%s10233_s18 + $0x200] sm:$0xff] }
  0xf6   : > { %v1149_v42 = vmul.f32 %v1084_v55, %v604_v8  ;;  %v1085_v0 = vsel %vm1039_vm6, %v6141_v54, %v994_v51  ;;  %5586 = vmatprep.subr.bf16.mxu0 %v6119_v36  ;;  %v6126_v35 = vld [vmem:[%s10222_s2 + $0x2d0] sm:$0xff]   ;;  %v6127_v55 = vld [vmem:[%s10222_s2 + $0x248] sm:$0xff]  }
  0xf7   : > { %v1161_v10 = vmul.f32 %v1085_v0, %v616_v61  ;;  %2251 = vmatmul.mubr.bf16.gmra.mxu1 %v1210_v25  ;;  %v605_v24 = vld [vmem:[%s10233_s18 + $0x1b0] sm:$0xff]  ;;  %v628_v0 = vld [vmem:[%s10233_s18 + $0x268] sm:$0xff] }
  0xf8   : > { %v960_v44 = vpop.permute.xlu0 %959  ;;  %2258 = vmatprep.mubr.bf16.mxu1 %v1223_v26  ;;  %5625 = vmatpush3.bf16.msra.mxu1 %v6120_v63 }
  0xf9   : > { %v7944_v17 = vsel %vm1039_vm6, %v7053_v60, %v960_v44  ;;  %v962_v13 = vpop.permute.xlu1 %961  ;;  %v1221_v8 = vpack.c.bf16 %v1161_v10, %v1149_v42  ;;  %5587 = vmatpush3.bf16.msra.mxu0 %v6121_v37  ;;  %5626 = vmatprep.subr.bf16.mxu1 %v6122_v46  ;;  %v6125_v60 = vld [vmem:[%s10222_s2 + $0x210] sm:$0xff]   ;;  %v6129_v46 = vld [vmem:[%s10222_s2 + $0x208] sm:$0xff]  }
  0xfa   : > { %v1148_v27 = vmul.f32 %v7944_v17, %v603_v1  ;;  %v7961_v36 = vsel %vm1039_vm6, %v7119_v62, %v962_v13  ;;  %5588 = vmatprep.subr.bf16.mxu0 %v6123_v57  ;;  %v617_v62 = vld [vmem:[%s10233_s18 + $0x210] sm:$0xff]  ;;  %v6131_v1 = vld [vmem:[%s10222_s2 + $0x240] sm:$0xff]  }
  0xfb   : > { %v1160_v61 = vmul.f32 %v7961_v36, %v615_v43  ;;  %2193 = vmatprep.mubr.bf16.mxu0 %v1221_v8  ;;  %v6128_v42 = vld [vmem:[%s10222_s2 + $0x290] sm:$0xff]   ;;  %v6142_v57 = vld [vmem:[%s6643_s17 + $0x20] sm:$0xff]  ;;  %v6132_v43 = vld [vmem:[%s10222_s2 + $0x288] sm:$0xff]  }
  0xfc   : > { %v1024_v22 = vpop.permute.xlu0 %1023  ;;  %5627 = vmatpush3.bf16.msra.mxu1 %v6124_v52  ;;  %v6133_v8 = vld [vmem:[%s10222_s2 + $0x200] sm:$0xff]  }
  0xfd   : > { %v1092_v63 = vsel %vm1039_vm6, %v7101_v31, %v1024_v22  ;;  %v1026_v25 = vpop.permute.xlu1 %1025  ;;  %v1220_v37 = vpack.c.bf16 %v1160_v61, %v1148_v27  ;;  %5589 = vmatpush3.bf16.msra.mxu0 %v6125_v60  ;;  %5628 = vmatprep.subr.bf16.mxu1 %v6126_v35  ;;  %v6130_v31 = vld [vmem:[%s10222_s2 + $0x2c8] sm:$0xff]   ;;  %v6134_v60 = vld [vmem:[%s10222_s2 + $0x2c0] sm:$0xff]  }
  0xfe   : > { %v1150_v51 = vmul.f32 %v1092_v63, %v605_v24  ;;  %v1093_v54 = vsel %vm1039_vm6, %v7158_v50, %v1026_v25  ;;  %5590 = vmatprep.subr.bf16.mxu0 %v6127_v55  ;;  %v640_v50 = vld [vmem:[%s10233_s18 + $0x2c8] sm:$0xff]  ;;  %v627_v22 = vld [vmem:[%s10233_s18 + $0x260] sm:$0xff] }
  0xff   : > { %v1162_v44 = vmul.f32 %v1093_v54, %v617_v62  ;;  %2194 = vmatmul.mubr.bf16.gmra.mxu0 %v1220_v37  ;;  %v6143_v35 = vld [vmem:[%s6643_s17 + $0x28] sm:$0xff]  ;;  %v10237_v62 = vpack.c.bf16 %v7397_v29, %v7395_v58  ;;  %v629_v58 = vld [vmem:[%s10233_s18 + $0x270] sm:$0xff]  ;;  %v574_v54 = vld [vmem:[%s10233_s18 + $0xb8] sm:$0xff]  ;;  %s8195_s17 = scalar_lea.vmem [#allocation2], %s6586_s19  ;;  %s8216_s19 = smov 0  }
 0x100   : > { %v996_v26 = vpop.permute.xlu0 %995  ;;  %5629 = vmatpush3.bf16.msra.mxu1 %v6128_v42  ;;  %v639_v42 = vld [vmem:[%s10233_s18 + $0x2c0] sm:$0xff] }
 0x101   : > { %v1086_v10 = vsel %vm1039_vm6, %v6142_v57, %v996_v26  ;;  %v998_v27 = vpop.permute.xlu1 %997  ;;  %v1222_v13 = vpack.c.bf16 %v1162_v44, %v1150_v51  ;;  %5591 = vmatpush3.bf16.msra.mxu0 %v6129_v46  ;;  %5630 = vmatprep.subr.bf16.mxu1 %v6130_v31  ;;  %v6135_v51 = vld [vmem:[%s10222_s2 + $0x280] sm:$0xff]   ;;  %v562_v31 = vld [vmem:[%s10233_s18 + $0x58] sm:$0xff]  ;;  %v10238_v26 = vld [vmem:[#allocation70_spill] sm:$0xff] }
 0x102   : > { %v1173_v52 = vmul.f32 %v1086_v10, %v628_v0  ;;  %v1087_v24 = vsel %vm1039_vm6, %v6143_v35, %v998_v27  ;;  %5592 = vmatprep.subr.bf16.mxu0 %v6131_v1  ;;  %v586_v35 = vld [vmem:[%s10233_s18 + $0x118] sm:$0xff] }
 0x103   : > { %v1185_v61 = vmul.f32 %v1087_v24, %v640_v50  ;;  %2259 = vmatmul.mubr.bf16.gmra.mxu1 %v1222_v13  ;;  %v1107_v50 = vmul.f32 %v7864_v12, %v562_v31  ;;  %v598_v12 = vld [vmem:[%s10233_s18 + $0x178] sm:$0xff] }
 0x104   : > { %v964_v55 = vpop.permute.xlu0 %963  ;;  %2266 = vmatprep.mubr.bf16.mxu1 %v10237_v62  ;;  %5631 = vmatpush3.bf16.msra.mxu1 %v6132_v43  ;;  %v1119_v43 = vmul.f32 %v7881_v21, %v574_v54  ;;  %v1131_v21 = vmul.f32 %v7944_v17, %v586_v35  ;;  %v1143_v24 = vmul.f32 %v7961_v36, %v598_v12 }
 0x105   : > { %v1078_v63 = vsel %vm1039_vm6, %v7136_v14, %v964_v55  ;;  %v966_v37 = vpop.permute.xlu1 %965  ;;  %v1233_v46 = vpack.c.bf16 %v1185_v61, %v1173_v52  ;;  %5593 = vmatpush3.bf16.msra.mxu0 %v6133_v8  ;;  %5632 = vmatprep.subr.bf16.mxu1 %v6134_v60  ;;  %v10239_v52 = vld [vmem:[#allocation52_spill] sm:$0xff]  ;;  %v1153_v17 = vmul.f32 %v7766_v56, %v608_v15  ;;  %v610_v55 = vld [vmem:[%s10233_s18 + $0x1d8] sm:$0xff] }
 0x106   : > { %v1172_v25 = vmul.f32 %v1078_v63, %v627_v22  ;;  %v1079_v14 = vsel %vm1039_vm6, %v6684_v30, %v966_v37  ;;  %v641_v30 = vld [vmem:[%s10233_s18 + $0x2d0] sm:$0xff]  ;;  %v1203_v60 = vpack.c.bf16 %v1119_v43, %v1107_v50  ;;  %v1165_v36 = vmul.f32 %v7778_v5, %v620_v23  ;;  %v622_v61 = vld [vmem:[%s10233_s18 + $0x238] sm:$0xff] }
 0x107   : > { %v1184_v0 = vmul.f32 %v1079_v14, %v639_v42  ;;  %2201 = vmatprep.mubr.bf16.mxu0 %v1233_v46  ;;  %v1215_v22 = vpack.c.bf16 %v1143_v24, %v1131_v21 }
 0x108   : > { %v1028_v29 = vpop.permute.xlu0 %1027  ;;  %5633 = vmatpush3.bf16.msra.mxu1 %v6135_v51  ;;  %v1225_v3 = vpack.c.bf16 %v1165_v36, %v1153_v17 }
 0x109   : > { %v1094_v1 = vsel %vm1039_vm6, %v10238_v26, %v1028_v29  ;;  %v1030_v57 = vpop.permute.xlu1 %1029  ;;  %v1232_v10 = vpack.c.bf16 %v1184_v0, %v1172_v25 }
 0x10a   : > { %v1174_v44 = vmul.f32 %v1094_v1, %v629_v58  ;;  %v1095_v27 = vsel %vm1039_vm6, %v10239_v52, %v1030_v57 }
 0x10b   : > { %v1186_v13 = vmul.f32 %v1095_v27, %v641_v30  ;;  %2202 = vmatmul.mubr.bf16.gmra.mxu0 %v1232_v10 }
 0x10c   : > { %2307 = vmatprep.mubr.bf16.mxu0 %v1201_v6  ;;  %v10240_v6 = vpack.c.bf16 %v7488_v7, %v7467_v33  ;;  %v1155_v33 = vmul.f32 %v1078_v63, %v610_v55  ;;  %v1167_v7 = vmul.f32 %v1079_v14, %v622_v61 }
 0x10d   : > { %v1234_v8 = vpack.c.bf16 %v1186_v13, %v1174_v44 }
 0x10e   : > { %v1227_v49 = vpack.c.bf16 %v1167_v7, %v1155_v33 }
 0x10f   : > { %2267 = vmatmul.mubr.bf16.gmra.mxu1 %v1234_v8 }
 0x110   : > { %2372 = vmatprep.mubr.bf16.mxu1 %v1203_v60 }
 0x113   : > { %2308 = vmatmul.mubr.bf16.vlgmr.msra.gmra.mxu0 %v10240_v6 }
 0x114   : > { %2315 = vmatprep.mubr.bf16.mxu0 %v1213_v9  ;;  %v10241_v9 = vpack.c.bf16 %v7718_v16, %v7709_v39 }
 0x117   : > { %2373 = vmatmul.mubr.bf16.vlgmr.msra.gmra.mxu1 %v1202_v59  ;;  %v10244_v59 = vld [vmem:[#allocation71_spill] sm:$0xff] }
 0x118   : > { %2380 = vmatprep.mubr.bf16.mxu1 %v1215_v22  ;;  %v10245_v20 = vpack.c.bf16 %v7380_v32, %v10244_v59 }
 0x11b   : > { %2316 = vmatmul.mubr.bf16.gmra.mxu0 %v1212_v41  ;;  %v10247_v41 = vld [vmem:[#allocation72_spill] sm:$0xff] }
 0x11c   : > { %2323 = vmatprep.mubr.bf16.mxu0 %v1225_v3  ;;  %v10248_v48 = vpack.c.bf16 %v10246_v34, %v10247_v41 }
 0x11f   : > { %2381 = vmatmul.mubr.bf16.gmra.mxu1 %v1214_v47 }
 0x120   : > { %2388 = vmatprep.mubr.bf16.mxu1 %v1227_v49 }
 0x123   : > { %2324 = vmatmul.mubr.bf16.gmra.mxu0 %v10241_v9 }
 0x124   : > { %2331 = vmatprep.mubr.bf16.mxu0 %v10242_v38 }
 0x127   : > { %2389 = vmatmul.mubr.bf16.gmra.mxu1 %v10243_v53 }
 0x128   : > { %2396 = vmatprep.mubr.bf16.mxu1 %v1239_v11 }
 0x12b   : > { %2332 = vmatmul.mubr.bf16.gmra.mxu0 %v10245_v20 }
 0x12f   : > { %2397 = vmatmul.mubr.bf16.gmra.mxu1 %v10248_v48 }
 0x166   : > { %v5434_v45 = vpop.f32.mrf.mxu0 }
 0x168   : > { %v5435_v47 = vpop.f32.mrf.mxu0 }
 0x169   : > { %v5436_v18 = vadd.f32 %v5435_v47, %v5434_v45 }
 0x16a   : > { %v5437_v4 = vpop.f32.mrf.mxu0 }
 0x16b   : > { %v2050_v32 = vadd.f32 %v5436_v18, %v8103_v28 }
 0x16c   : > { %v5438_v39 = vpop.f32.mrf.mxu0 }
 0x16d   : > { %v5439_v16 = vadd.f32 %v5438_v39, %v5437_v4 }
 0x16e   : > { %v5474_v2 = vpop.f32.mrf.mxu1 }
 0x16f   : > { %v2053_v63 = vadd.f32 %v5439_v16, %v8103_v28 }
 0x170   : > { %v5475_v56 = vpop.f32.mrf.mxu1 }
 0x171   : > { %v5476_v5 = vadd.f32 %v5475_v56, %v5474_v2 }
 0x172   : > { %v5477_v40 = vpop.f32.mrf.mxu1 }
 0x173   : > { %v8106_v19 = vadd.f32 %v5476_v5, %v2050_v32 }
 0x174   : > { %v5478_v11 = vpop.f32.mrf.mxu1 }
 0x175   : > { %v5479_v62 = vadd.f32 %v5478_v11, %v5477_v40 }
 0x177   : > { %v5440_v42 = vpop.f32.mrf.mxu0  ;;  %v8109_v51 = vadd.f32 %v5479_v62, %v2053_v63 }
 0x179   : > { %v5441_v25 = vpop.f32.mrf.mxu0 }
 0x17a   : > { %v5442_v37 = vadd.f32 %v5441_v25, %v5440_v42 }
 0x17b   : > { %v5443_v46 = vpop.f32.mrf.mxu0 }
 0x17c   : > { %v2058_v54 = vadd.f32 %v5442_v37, %v8103_v28 }
 0x17d   : > { %v5444_v14 = vpop.f32.mrf.mxu0 }
 0x17e   : > { %v5445_v58 = vadd.f32 %v5444_v14, %v5443_v46 }
 0x17f   : > { %v5480_v29 = vpop.f32.mrf.mxu1 }
 0x180   : > { %v2061_v44 = vadd.f32 %v5445_v58, %v8103_v28 }
 0x181   : > { %v5481_v31 = vpop.f32.mrf.mxu1 }
 0x182   : > { %v5482_v0 = vadd.f32 %v5481_v31, %v5480_v29 }
 0x183   : > { %v5483_v26 = vpop.f32.mrf.mxu1 }
 0x184   : > { %v8112_v1 = vadd.f32 %v5482_v0, %v2058_v54 }
 0x185   : > { %v5484_v30 = vpop.f32.mrf.mxu1 }
 0x186   : > { %v5485_v57 = vadd.f32 %v5484_v30, %v5483_v26 }
 0x187   : > { %v5446_v10 = vpop.f32.mrf.mxu0 }
 0x188   : > { %v8115_v50 = vadd.f32 %v5485_v57, %v2061_v44 }
 0x189   : > { %v5447_v43 = vpop.f32.mrf.mxu0 }
 0x18a   : > { %v5448_v52 = vadd.f32 %v5447_v43, %v5446_v10 }
 0x18b   : > { %v5449_v27 = vpop.f32.mrf.mxu0 }
 0x18c   : > { %v2066_v12 = vadd.f32 %v5448_v52, %v8103_v28 }
 0x18d   : > { %v5450_v13 = vpop.f32.mrf.mxu0 }
 0x18e   : > { %v5451_v8 = vadd.f32 %v5450_v13, %v5449_v27 }
 0x18f   : > { %v5486_v60 = vpop.f32.mrf.mxu1 }
 0x190   : > { %v2069_v6 = vadd.f32 %v5451_v8, %v8103_v28 }
 0x191   : > { %v5487_v35 = vpop.f32.mrf.mxu1 }
 0x192   : > { %v5488_v21 = vadd.f32 %v5487_v35, %v5486_v60 }
 0x193   : > { %v5489_v24 = vpop.f32.mrf.mxu1 }
 0x194   : > { %v8118_v15 = vadd.f32 %v5488_v21, %v2066_v12 }
 0x195   : > { %v5490_v23 = vpop.f32.mrf.mxu1 }
 0x196   : > { %v5491_v17 = vadd.f32 %v5490_v23, %v5489_v24 }
 0x197   : > { %v8123_v22 = vpop.f32.mrf.mxu0 }
 0x198   : > { %v8121_v36 = vadd.f32 %v5491_v17, %v2069_v6 }
 0x199   : > { %v8125_v55 = vpop.f32.mrf.mxu0 }
 0x19b   : > { %v8129_v33 = vpop.f32.mrf.mxu0 }
 0x19d   : > { %v8133_v3 = vpop.f32.mrf.mxu0 }
 0x19f   : > { %v8127_v61 = vpop.f32.mrf.mxu1 }
 0x1a1   : > { %v8131_v7 = vpop.f32.mrf.mxu1 }
 0x1a3   : > { %v8135_v49 = vpop.f32.mrf.mxu1 }
 0x1a5   : > { %v8137_v38 = vpop.f32.mrf.mxu1 }
 0x1a7   : > { %v5514_v9 = vpop.f32.mrf.mxu0 }
 0x1a9   : > { %v5515_v53 = vpop.f32.mrf.mxu0 }
 0x1aa   : > { %v5516_v0 = vadd.f32 %v5515_v53, %v5514_v9 }
 0x1ab   : > { %v5554_v59 = vpop.f32.mrf.mxu1  ;;  %v5517_v20 = vpop.f32.mrf.mxu0 }
 0x1ac   : > { %v2180_v43 = vadd.f32 %v5516_v0, %v8106_v19 }
 0x1ad   : > { %v5555_v34 = vpop.f32.mrf.mxu1  ;;  %v5518_v41 = vpop.f32.mrf.mxu0 }
 0x1ae   : > { %v5556_v44 = vadd.f32 %v5555_v34, %v5554_v59  ;;  %v5519_v52 = vadd.f32 %v5518_v41, %v5517_v20 }
 0x1af   : > { %v5557_v48 = vpop.f32.mrf.mxu1 }
 0x1b0   : > { %v2245_v60 = vadd.f32 %v5556_v44, %v2180_v43  ;;  %v2183_v23 = vadd.f32 %v5519_v52, %v8109_v51 }
 0x1b1   : > { %v5558_v47 = vpop.f32.mrf.mxu1 }
 0x1b2   : > { %v5559_v35 = vadd.f32 %v5558_v47, %v5557_v48 }
 0x1b3   : > { %v5520_v45 = vpop.f32.mrf.mxu0 }
 0x1b4   : > { %v2248_v34 = vadd.f32 %v5559_v35, %v2183_v23 }
 0x1b5   : > { %v5521_v18 = vpop.f32.mrf.mxu0 }
 0x1b6   : > { %v5522_v12 = vadd.f32 %v5521_v18, %v5520_v45 }
 0x1b7   : > { %v5560_v4 = vpop.f32.mrf.mxu1  ;;  %v5523_v39 = vpop.f32.mrf.mxu0 }
 0x1b8   : > { %v2188_v19 = vadd.f32 %v5522_v12, %v8112_v1 }
 0x1b9   : > { %v5561_v16 = vpop.f32.mrf.mxu1  ;;  %v5524_v2 = vpop.f32.mrf.mxu0 }
 0x1ba   : > { %v5525_v0 = vadd.f32 %v5524_v2, %v5523_v39 }
 0x1bb   : > { %v5563_v56 = vpop.f32.mrf.mxu1 }
 0x1bd   : > { %v5564_v5 = vpop.f32.mrf.mxu1 }
 0x1be   : > { %v5565_v44 = vadd.f32 %v5564_v5, %v5563_v56 }
 0x1bf   : > { %v5526_v32 = vpop.f32.mrf.mxu0 }
 0x1c1   : > { %v5527_v40 = vpop.f32.mrf.mxu0 }
 0x1c2   : > { %v5528_v43 = vadd.f32 %v5527_v40, %v5526_v32 }
 0x1c3   : > { %v5566_v11 = vpop.f32.mrf.mxu1  ;;  %v8139_v63 = vpop.f32.mrf.mxu0 }
 0x1c4   : > { %v2196_v56 = vadd.f32 %v5528_v43, %v8118_v15  ;;  %v5457_v15 = vadd.f32 %v8133_v3, %v8129_v33 }
 0x1c5   : > { %v5567_v62 = vpop.f32.mrf.mxu1  ;;  %v5530_v42 = vpop.f32.mrf.mxu0 }
 0x1c6   : > { %v5568_v2 = vadd.f32 %v5567_v62, %v5566_v11  ;;  %v5531_v40 = vadd.f32 %v5530_v42, %v8139_v63 }
 0x1c7   : > { %v8141_v25 = vpop.f32.mrf.mxu1 }
 0x1c8   : > { %v2261_v11 = vadd.f32 %v5568_v2, %v2196_v56 }
 0x1c9   : > { %v8145_v46 = vpop.f32.mrf.mxu1 }
 0x1ca   : > { %v5571_v62 = vadd.f32 %v8145_v46, %v8141_v25  ;;  %v5497_v25 = vadd.f32 %v8137_v38, %v8135_v49 }
 0x1cb   : > { %v8143_v37 = vpop.f32.mrf.mxu0 }
 0x1cd   : > { %v8147_v14 = vpop.f32.mrf.mxu0 }
 0x1cf   : > { %v8149_v58 = vpop.f32.mrf.mxu0  ;;  %v8151_v29 = vpop.f32.mrf.mxu1 }
 0x1d1   : > { %v8153_v31 = vpop.f32.mrf.mxu0  ;;  %v8155_v54 = vpop.f32.mrf.mxu1 }
 0x1d2   : > { %v5574_v33 = vadd.f32 %v8155_v54, %v8151_v29 }
 0x1d3   : > { %v8157_v26 = vpop.f32.mrf.mxu1  ;;  %v5594_v30 = vpop.f32.mrf.mxu0 }
 0x1d4   : > { %10249 = vst [vmem:[#allocation70_spill] sm:$0xff] %v8157_v26 }
 0x1d5   : > { %v8159_v57 = vpop.f32.mrf.mxu1  ;;  %v5595_v10 = vpop.f32.mrf.mxu0 }
 0x1d6   : > { %10250 = vst [vmem:[#allocation52_spill] sm:$0xff] %v8159_v57  ;;  %v5596_v27 = vadd.f32 %v5595_v10, %v5594_v30  ;;  %v5562_v57 = vadd.f32 %v5561_v16, %v5560_v4  ;;  %v2191_v4 = vadd.f32 %v5525_v0, %v8115_v50 }
 0x1d7   : > { %v5597_v13 = vpop.f32.mrf.mxu0  ;;  %v5634_v8 = vpop.f32.mrf.mxu1 }
 0x1d8   : > { %v2310_v6 = vadd.f32 %v5596_v27, %v2245_v60  ;;  %v2253_v51 = vadd.f32 %v5562_v57, %v2188_v19  ;;  %v2256_v39 = vadd.f32 %v5565_v44, %v2191_v4  ;;  %v5454_v57 = vadd.f32 %v8125_v55, %v8123_v22 }
 0x1d9   : > { %v5598_v21 = vpop.f32.mrf.mxu0  ;;  %v5635_v24 = vpop.f32.mrf.mxu1  ;;  %v5534_v55 = vadd.f32 %v8147_v14, %v8143_v37  ;;  %v2077_v37 = vadd.f32 %v5457_v15, %v8103_v28 }
 0x1da   : > { %v5599_v17 = vadd.f32 %v5598_v21, %v5597_v13  ;;  %v5636_v9 = vadd.f32 %v5635_v24, %v5634_v8  ;;  %v5494_v24 = vadd.f32 %v8131_v7, %v8127_v61  ;;  %v2074_v22 = vadd.f32 %v5454_v57, %v8103_v28 }
 0x1db   : > { %v5600_v53 = vpop.f32.mrf.mxu0  ;;  %v5637_v59 = vpop.f32.mrf.mxu1  ;;  %v10251_v38 = vld [vmem:[#allocation70_spill] sm:$0xff] }
 0x1dc   : > { %v8163_v26 = vadd.f32 %v5636_v9, %v2310_v6   ;;  %v2313_v48 = vadd.f32 %v5599_v17, %v2248_v34  ;;  %v2199_v9 = vadd.f32 %v5531_v40, %v8121_v36  ;;  %v5537_v36 = vadd.f32 %v8153_v31, %v8149_v58 }
 0x1dd   : > { %v5601_v20 = vpop.f32.mrf.mxu0  ;;  %v5638_v41 = vpop.f32.mrf.mxu1 }
 0x1de   : > { %v5602_v45 = vadd.f32 %v5601_v20, %v5600_v53  ;;  %v5639_v47 = vadd.f32 %v5638_v41, %v5637_v59  ;;  %v2139_v59 = vadd.f32 %v5494_v24, %v2074_v22  ;;  %v2264_v46 = vadd.f32 %v5571_v62, %v2199_v9 }
 0x1df   : > { %v5603_v18 = vpop.f32.mrf.mxu0  ;;  %v5640_v30 = vpop.f32.mrf.mxu1 }
 0x1e0   : > { %v8166_v10 = vadd.f32 %v5639_v47, %v2313_v48   ;;  %v2318_v16 = vadd.f32 %v5602_v45, %v2253_v51  ;;  %v2204_v14 = vadd.f32 %v5534_v55, %v2139_v59  ;;  %v10252_v51 = vld [vmem:[#allocation52_spill] sm:$0xff] }
 0x1e1   : > { %v5604_v52 = vpop.f32.mrf.mxu0  ;;  %v5641_v27 = vpop.f32.mrf.mxu1  ;;  %v5577_v29 = vadd.f32 %v10252_v51, %v10251_v38 }
 0x1e2   : > { %v5605_v13 = vadd.f32 %v5604_v52, %v5603_v18  ;;  %v5642_v1 = vadd.f32 %v5641_v27, %v5640_v30  ;;  %v2142_v30 = vadd.f32 %v5497_v25, %v2077_v37  ;;  %v2269_v49 = vadd.f32 %v5574_v33, %v2204_v14 }
 0x1e3   : > { %v5606_v8 = vpop.f32.mrf.mxu0  ;;  %v5643_v60 = vpop.f32.mrf.mxu1 }
 0x1e4   : > { %v8169_v35 = vadd.f32 %v5642_v1, %v2318_v16   ;;  %v2321_v12 = vadd.f32 %v5605_v13, %v2256_v39  ;;  %v2207_v43 = vadd.f32 %v5537_v36, %v2142_v30 }
 0x1e5   : > { %v5607_v5 = vpop.f32.mrf.mxu0  ;;  %v5644_v32 = vpop.f32.mrf.mxu1 }
 0x1e6   : > { %v5608_v50 = vadd.f32 %v5607_v5, %v5606_v8  ;;  %v5645_v21 = vadd.f32 %v5644_v32, %v5643_v60  ;;  %v2272_v58 = vadd.f32 %v5577_v29, %v2207_v43 }
 0x1e7   : > { %v5609_v23 = vpop.f32.mrf.mxu0  ;;  %v5646_v6 = vpop.f32.mrf.mxu1 }
 0x1e8   : > { %v2386_v17 = vadd.f32 %v5645_v21, %v2321_v12   ;;  %v2326_v61 = vadd.f32 %v5608_v50, %v2261_v11 }
 0x1e9   : > { %v5610_v63 = vpop.f32.mrf.mxu0  ;;  %v5647_v42 = vpop.f32.mrf.mxu1 }
 0x1ea   : > { %v5611_v7 = vadd.f32 %v5610_v63, %v5609_v23  ;;  %v5648_v53 = vadd.f32 %v5647_v42, %v5646_v6 }
 0x1eb   : > { %v5612_v34 = vpop.f32.mrf.mxu0  ;;  %v5649_v19 = vpop.f32.mrf.mxu1 }
 0x1ec   : > { %v2391_v3 = vadd.f32 %v5648_v53, %v2326_v61   ;;  %v2329_v0 = vadd.f32 %v5611_v7, %v2264_v46 }
 0x1ed   : > { %v5613_v20 = vpop.f32.mrf.mxu0  ;;  %v5650_v41 = vpop.f32.mrf.mxu1 }
 0x1ee   : > { %v5614_v48 = vadd.f32 %v5613_v20, %v5612_v34  ;;  %v5651_v45 = vadd.f32 %v5650_v41, %v5649_v19 }
 0x1ef   : > { %v5615_v47 = vpop.f32.mrf.mxu0  ;;  %v5652_v18 = vpop.f32.mrf.mxu1 }
 0x1f0   : > { %v2394_v54 = vadd.f32 %v5651_v45, %v2329_v0   ;;  %v2334_v52 = vadd.f32 %v5614_v48, %v2269_v49 }
 0x1f1   : > { %v5616_v44 = vpop.f32.mrf.mxu0  ;;  %v5653_v28 = vpop.f32.mrf.mxu1 }
 0x1f2   : > { %v5617_v27 = vadd.f32 %v5616_v44, %v5615_v47  ;;  %v5654_v4 = vadd.f32 %v5653_v28, %v5652_v18 }
 0x1f3   : > { %v5655_v16 = vpop.f32.mrf.mxu1 }
 0x1f4   : > { %v2399_v31 = vadd.f32 %v5654_v4, %v2334_v52   ;;  %v2337_v1 = vadd.f32 %v5617_v27, %v2272_v58 }
 0x1f5   : > { %v5656_v13 = vpop.f32.mrf.mxu1 }
 0x1f6   : > { %v5657_v8 = vadd.f32 %v5656_v13, %v5655_v16 }
 0x1f8   : > { %v2402_v60 = vadd.f32 %v5657_v8, %v2337_v1  }
 0x1f9 LB: >> { %v2419_v39 = vsel %vm1039_vm6, %v6400_v26, 0.0  ;;  %v2425_v2 = vsel %vm1039_vm6, %v6392_v35, 0.0  ;;  %v2422_v57 = vsel %vm1039_vm6, %v6396_v10, 0.0  ;;  %v2428_v56 = vsel %vm1039_vm6, %v6388_v17, 0.0  ;;  %s5414_s26 = sshll.u32 %s6404_s19, 5  ;;  %s2524_s20 = scalar_lea.vmem %s10051_s5, %s6404_s19  ;;  %s6404_s19 = sphi %s8216_s19, %s2410_s19   ;;  %v6400_v26 = vphi %v8163_v26, %v10489_v26   ;;  %v6396_v10 = vphi %v8166_v10, %v10488_v10   ;;  %v6392_v35 = vphi %v8169_v35, %v10487_v35   ;;  %v6388_v17 = vphi %v2386_v17, %v10486_v17   ;;  %v6384_v3 = vphi %v2391_v3, %v10485_v3   ;;  %v6380_v54 = vphi %v2394_v54, %v10484_v54   ;;  %v6376_v31 = vphi %v2399_v31, %v10483_v31   ;;  %v6372_v60 = vphi %v2402_v60, %v10482_v60  }
 0x1fa   : >> { %2420 = vadd.xlane.f32.xlu0 %v2419_v39  ;;  %2426 = vadd.xlane.f32.xlu1 %v2425_v2  ;;  %v2431_v5 = vsel %vm1039_vm6, %v6384_v3, 0.0  ;;  %v2434_v32 = vsel %vm1039_vm6, %v6380_v54, 0.0  ;;  %v2437_v40 = vsel %vm1039_vm6, %v6376_v31, 0.0  ;;  %v2440_v12 = vsel %vm1039_vm6, %v6372_v60, 0.0  ;;  %s2570_s24 = scalar_lea.vmem %s10053_s7, %s5414_s26  ;;  %s2540_s21 = scalar_lea.vmem %s10052_s6, %s6404_s19 }
 0x1fb   : >> { %v6144_v51 = vld [vmem:[%s2570_s24 + $0x18] sm:$0xff]   ;;  %v6145_v29 = vld [vmem:[%s2570_s24 + $0x10] sm:$0xff]   ;;  %v6147_v44 = vld [vmem:[%s2570_s24] sm:$0xff]   ;;  %s2579_s29 = scalar_lea.vmem %s10054_s8, %s6404_s19  ;;  %s6407_s30 = smov 64   ;;  %vm3136_vm7 = vcmask 261120   ;;  %vm3153_vm8 = vcmask 785408  }
 0x1fc   : >> { %5878 = vmatprep.subr.bf16.mxu0 %v6144_v51  ;;  %s6409_s1 = smov 32   ;;  %s5415_s0 = smul.u32 400, %s6404_s19 }
 0x1fd   : >> { %5879 = vmatpush3.bf16.msra.mxu0 %v6144_v51  ;;  %s4212_s22 = scalar_lea.vmem %s10058_s12, %s6404_s19 }
 0x1fe   : >> { %2423 = vadd.xlane.f32.xlu0 %v2422_v57  ;;  %2429 = vadd.xlane.f32.xlu1 %v2428_v56  ;;  %s8915_s23 = scalar_lea.vmem %s10055_s9, %s5415_s0 }
 0x1ff   : >> { %5880 = vmatprep.subr.bf16.mxu0 %v6145_v29 }
 0x201   : >> { %5881 = vmatpush3.bf16.msra.mxu0 %v6145_v29 }
 0x202   : >> { %2432 = vadd.xlane.f32.xlu0 %v2431_v5  ;;  %2435 = vadd.xlane.f32.xlu1 %v2434_v32 }
 0x206   : >> { %2438 = vadd.xlane.f32.xlu0 %v2437_v40  ;;  %2441 = vadd.xlane.f32.xlu1 %v2440_v12 }
 0x283   : >> { %v2421_v50 = vpop.xlane.xlu0 %2420  ;;  %v2427_v21 = vpop.xlane.xlu1 %2426 }
 0x284   : >> { %v2444_v24 = vmul.f32 0.015625, %v2421_v50  ;;  %v2446_v23 = vmul.f32 0.015625, %v2427_v21 }
 0x286   : >> { %v8237_v6 = vsub.f32 %v6400_v26, %v2444_v24  ;;  %v8239_v11 = vsub.f32 %v6392_v35, %v2446_v23 }
 0x287   : >> { %v2424_v62 = vpop.xlane.xlu0 %2423  ;;  %v2430_v22 = vpop.xlane.xlu1 %2429 }
 0x288   : >> { %v2445_v15 = vmul.f32 0.015625, %v2424_v62  ;;  %v2447_v55 = vmul.f32 0.015625, %v2430_v22  ;;  %v2460_v63 = vmul.f32 %v8237_v6, %v8237_v6  ;;  %v2462_v42 = vmul.f32 %v8239_v11, %v8239_v11  ;;  %v5274_v62 = vld [vmem:[%s2524_s20] ss:$0 sm:$0xff] }
 0x28a   : >> { %v2468_v9 = vsel %vm1039_vm6, %v2460_v63, 0.0  ;;  %v8246_v61 = vsub.f32 %v6396_v10, %v2445_v15  ;;  %v8248_v7 = vsub.f32 %v6388_v17, %v2447_v55  ;;  %v2474_v53 = vsel %vm1039_vm6, %v2462_v42, 0.0  ;;  %v5275_v42 = vld [vmem:[%s2540_s21] ss:$0 sm:$0xff]  ;;  %s5416_s21 = sshll.u32 %s6404_s19, 4 }
 0x28b   : >> { %v2433_v26 = vpop.xlane.xlu0 %2432  ;;  %2469 = vadd.xlane.f32.xlu0 %v2468_v9  ;;  %v2436_v35 = vpop.xlane.xlu1 %2435 }
 0x28c   : >> { %v2448_v59 = vmul.f32 0.015625, %v2433_v26  ;;  %v2449_v34 = vmul.f32 0.015625, %v2436_v35  ;;  %v2461_v19 = vmul.f32 %v8246_v61, %v8246_v61  ;;  %v2463_v25 = vmul.f32 %v8248_v7, %v8248_v7 }
 0x28e   : >> { %v2471_v46 = vsel %vm1039_vm6, %v2461_v19, 0.0  ;;  %v8256_v33 = vsub.f32 %v6384_v3, %v2448_v59  ;;  %v8258_v10 = vsub.f32 %v6380_v54, %v2449_v34  ;;  %v2477_v37 = vsel %vm1039_vm6, %v2463_v25, 0.0  ;;  %v6146_v54 = vld [vmem:[%s2570_s24 + $0x8] sm:$0xff]   ;;  %s6408_s24 = smov 96  }
 0x28f   : >> { %2475 = vadd.xlane.f32.xlu0 %v2474_v53  ;;  %v2439_v17 = vpop.xlane.xlu0 %2438  ;;  %2472 = vadd.xlane.f32.xlu1 %v2471_v46  ;;  %v2442_v14 = vpop.xlane.xlu1 %2441 }
 0x290   : >> { %v2450_v20 = vmul.f32 0.015625, %v2439_v17  ;;  %v2464_v41 = vmul.f32 %v8256_v33, %v8256_v33  ;;  %v2451_v36 = vmul.f32 0.015625, %v2442_v14  ;;  %v2465_v0 = vmul.f32 %v8258_v10, %v8258_v10  ;;  %5882 = vmatprep.subr.bf16.mxu0 %v6146_v54 }
 0x291   : >> { %5883 = vmatpush3.bf16.msra.mxu0 %v6146_v54 }
 0x292   : >> { %v2480_v3 = vsel %vm1039_vm6, %v2464_v41, 0.0  ;;  %v8266_v48 = vsub.f32 %v6376_v31, %v2450_v20  ;;  %v8268_v45 = vsub.f32 %v6372_v60, %v2451_v36  ;;  %v2483_v18 = vsel %vm1039_vm6, %v2465_v0, 0.0  ;;  %5884 = vmatprep.subr.bf16.mxu0 %v6147_v44 }
 0x293   : >> { %2481 = vadd.xlane.f32.xlu0 %v2480_v3  ;;  %2478 = vadd.xlane.f32.xlu1 %v2477_v37 }
 0x294   : >> { %v2466_v47 = vmul.f32 %v8266_v48, %v8266_v48  ;;  %v2467_v30 = vmul.f32 %v8268_v45, %v8268_v45 }
 0x295   : >> { %5885 = vmatpush3.bf16.msra.mxu0 %v6147_v44 }
 0x296   : >> { %v2486_v49 = vsel %vm1039_vm6, %v2466_v47, 0.0  ;;  %v2489_v38 = vsel %vm1039_vm6, %v2467_v30, 0.0 }
 0x297   : >> { %2487 = vadd.xlane.f32.xlu0 %v2486_v49  ;;  %2484 = vadd.xlane.f32.xlu1 %v2483_v18 }
 0x29b   : >> { %2490 = vadd.xlane.f32.xlu1 %v2489_v38 }
 0x314   : >> { %v2470_v28 = vpop.xlane.xlu0 %2469 }
 0x315   : >> { %v2492_v43 = vmul.f32 0.015625, %v2470_v28 }
 0x317   : >> { %v2500_v52 = vadd.f32 1e-05, %v2492_v43 }
 0x318   : >> { %v2476_v27 = vpop.xlane.xlu0 %2475  ;;  %v2473_v4 = vpop.xlane.xlu1 %2472 }
 0x319   : >> { %6200 = vrsqrt.f32 %v2500_v52  ;;  %v2494_v16 = vmul.f32 0.015625, %v2476_v27  ;;  %v2493_v58 = vmul.f32 0.015625, %v2473_v4 }
 0x31b   : >> { %v2502_v31 = vadd.f32 1e-05, %v2494_v16  ;;  %v2501_v13 = vadd.f32 1e-05, %v2493_v58  ;;  %v8345_v58 = vld [vmem:[%s2579_s29] ss:$0 sm:$0xff]  ;;  %s4207_s29 = scalar_lea.vmem %s10057_s11, %s5416_s21 }
 0x31c   : >> { %v2482_v1 = vpop.xlane.xlu0 %2481  ;;  %v2479_v8 = vpop.xlane.xlu1 %2478 }
 0x31d   : >> { %6202 = vrsqrt.f32 %v2502_v31  ;;  %v2496_v60 = vmul.f32 0.015625, %v2482_v1  ;;  %v2495_v39 = vmul.f32 0.015625, %v2479_v8 }
 0x31e   : >> { %6204 = vrsqrt.f32 %v2501_v13 }
 0x31f   : >> { %v2504_v2 = vadd.f32 1e-05, %v2496_v60  ;;  %v2503_v57 = vadd.f32 1e-05, %v2495_v39 }
 0x320   : >> { %v2488_v56 = vpop.xlane.xlu0 %2487  ;;  %v2485_v5 = vpop.xlane.xlu1 %2484 }
 0x321   : >> { %6206 = vrsqrt.f32 %v2504_v2  ;;  %v2498_v32 = vmul.f32 0.015625, %v2488_v56  ;;  %v2497_v40 = vmul.f32 0.015625, %v2485_v5 }
 0x322   : >> { %6208 = vrsqrt.f32 %v2503_v57 }
 0x323   : >> { %v2506_v12 = vadd.f32 1e-05, %v2498_v32  ;;  %v2505_v50 = vadd.f32 1e-05, %v2497_v40 }
 0x324   : >> { %v2491_v21 = vpop.xlane.xlu1 %2490 }
 0x325   : >> { %6210 = vrsqrt.f32 %v2506_v12  ;;  %v2499_v24 = vmul.f32 0.015625, %v2491_v21 }
 0x326   : >> { %v6201_v23 = vpop.eup %6200  ;;  %6212 = vrsqrt.f32 %v2505_v50 }
 0x327   : >> { %v2507_v22 = vadd.f32 1e-05, %v2499_v24  ;;  %v2516_v15 = vmul.f32 %v6201_v23, %v8237_v6 }
 0x329   : >> { %6214 = vrsqrt.f32 %v2507_v22  ;;  %v2532_v55 = vmul.f32 %v5274_v62, %v2516_v15 }
 0x32a   : >> { %v6203_v63 = vpop.eup %6202 }
 0x32b   : >> { %v6205_v9 = vpop.eup %6204  ;;  %v2518_v26 = vmul.f32 %v6203_v63, %v8239_v11  ;;  %v8292_v53 = vadd.f32 %v5275_v42, %v2532_v55 }
 0x32c   : >> { %v2517_v35 = vmul.f32 %v6205_v9, %v8246_v61 }
 0x32d   : >> { %10253 = vst [vmem:[#allocation74_spill] sm:$0xff] %v8292_v53  ;;  %v2534_v19 = vmul.f32 %v5274_v62, %v2518_v26  ;;  %v10096_v37 = vmax.f32 %v8292_v53, 0.0 }
 0x32e   : >> { %v6207_v59 = vpop.eup %6206  ;;  %v2533_v34 = vmul.f32 %v5274_v62, %v2517_v35 }
 0x32f   : >> { %v6209_v25 = vpop.eup %6208  ;;  %v2520_v6 = vmul.f32 %v6207_v59, %v8256_v33  ;;  %v8300_v41 = vadd.f32 %v5275_v42, %v2534_v19 }
 0x330   : >> { %v8295_v46 = vadd.f32 %v5275_v42, %v2533_v34  ;;  %v2519_v17 = vmul.f32 %v6209_v25, %v8248_v7  ;;  %v10265_v25 = vld [vmem:[#allocation18_spill] sm:$0xff] }
 0x331   : >> { %10255 = vst [vmem:[#allocation76_spill] sm:$0xff] %v8300_v41  ;;  %v2536_v61 = vmul.f32 %v5274_v62, %v2520_v6  ;;  %v10097_v30 = vmax.f32 %v8300_v41, 0.0 }
 0x332   : >> { %10254 = vst [vmem:[#allocation75_spill] sm:$0xff] %v8295_v46  ;;  %v6211_v14 = vpop.eup %6210  ;;  %v10094_v20 = vmax.f32 %v8295_v46, 0.0  ;;  %v2535_v11 = vmul.f32 %v5274_v62, %v2519_v17  ;;  %v10267_v17 = vld [vmem:[#allocation26_spill] sm:$0xff] }
 0x333   : >> { %v6213_v36 = vpop.eup %6212  ;;  %v2522_v0 = vmul.f32 %v6211_v14, %v8266_v48  ;;  %v8313_v51 = vadd.f32 %v5275_v42, %v2536_v61 }
 0x334   : >> { %v2564_v33 = vpack.c.bf16 %v10094_v20, %v10096_v37  ;;  %v8307_v3 = vadd.f32 %v5275_v42, %v2535_v11  ;;  %v2521_v7 = vmul.f32 %v6213_v36, %v8258_v10  ;;  %v10269_v11 = vld [vmem:[#allocation33_spill] sm:$0xff]  ;;  %v10271_v36 = vld [vmem:[#allocation40_spill] sm:$0xff] }
 0x335   : >> { %v2538_v47 = vmul.f32 %v5274_v62, %v2522_v0  ;;  %10257 = vst [vmem:[#allocation78_spill] sm:$0xff] %v8313_v51  ;;  %v10092_v28 = vmax.f32 %v8313_v51, 0.0 }
 0x336   : >> { %10256 = vst [vmem:[#allocation77_spill] sm:$0xff] %v8307_v3  ;;  %v6215_v18 = vpop.eup %6214  ;;  %5886 = vmatprep.mubr.msk.bf16.mxu0 %vm1039_vm6, %v2564_v33  ;;  %v10095_v49 = vmax.f32 %v8307_v3, 0.0  ;;  %v2537_v38 = vmul.f32 %v5274_v62, %v2521_v7 }
 0x337   : >> { %v2523_v48 = vmul.f32 %v6215_v18, %v8268_v45  ;;  %v8322_v44 = vadd.f32 %v5275_v42, %v2538_v47 }
 0x338   : >> { %v2565_v29 = vpack.c.bf16 %v10095_v49, %v10097_v30  ;;  %v8320_v10 = vadd.f32 %v5275_v42, %v2537_v38 }
 0x339   : >> { %v2539_v54 = vmul.f32 %v5274_v62, %v2523_v48  ;;  %10259 = vst [vmem:[#allocation80_spill] sm:$0xff] %v8322_v44  ;;  %v10093_v27 = vmax.f32 %v8322_v44, 0.0 }
 0x33a   : >> { %10258 = vst [vmem:[#allocation79_spill] sm:$0xff] %v8320_v10  ;;  %5887 = vmatmul.mubr.msk.bf16.vlgmr.msra.gmra.mxu0 %vm1039_vm6, %v2565_v29  ;;  %v10090_v43 = vmax.f32 %v8320_v10, 0.0 }
 0x33b   : >> { %v8327_v52 = vadd.f32 %v5275_v42, %v2539_v54 }
 0x33c   : >> { %v2566_v45 = vpack.c.bf16 %v10090_v43, %v10092_v28 }
 0x33d   : >> { %10260 = vst [vmem:[#allocation81_spill] sm:$0xff] %v8327_v52  ;;  %v10091_v4 = vmax.f32 %v8327_v52, 0.0 }
 0x33e   : >> { %5890 = vmatprep.mubr.msk.bf16.mxu0 %vm1039_vm6, %v2566_v45 }
 0x33f   : >> { %v2567_v16 = vpack.c.bf16 %v10091_v4, %v10093_v27 }
 0x342   : >> { %5891 = vmatmul.mubr.msk.bf16.gmra.mxu0 %vm1039_vm6, %v2567_v16 }
 0x3fa   : >> { %v5888_v31 = vpop.f32.mrf.mxu0 }
 0x3fb   : >> { %v2666_v13 = vadd.f32 %v5888_v31, %v8345_v58 }
 0x3fc   : >> { %v2657_v1 = vpop.f32.mrf.mxu0 }
 0x3fd   : >> { %v8348_v8 = vmax.f32 %v2666_v13, 0.0  ;;  %v2658_v60 = vadd.f32 %v8345_v58, %v2657_v1 }
 0x3fe   : >> { %v5889_v39 = vpop.f32.mrf.mxu0 }
 0x3ff   : >> { %3016 = vrot.lane.b32.xlu0 %v8348_v8, %s6407_s30  ;;  %2874 = vrot.lane.b32.xlu1 %v8348_v8, %s6408_s24  ;;  %v8355_v57 = vmax.f32 %v2658_v60, 0.0  ;;  %v2669_v56 = vadd.f32 %v5889_v39, %v8345_v58  ;;  %v2714_v22 = vrot.slane %v8348_v8, 6  ;;  %v2762_v15 = vrot.slane %v8348_v8, 2 }
 0x400   : >> { %v2660_v2 = vpop.f32.mrf.mxu0  ;;  %v2730_v26 = vrot.slane %v8348_v8, 7  ;;  %v2778_v35 = vrot.slane %v8348_v8, 3  ;;  %v8448_v61 = vmul.f32 %v8348_v8, %v10269_v11  ;;  %v2698_v33 = vrot.slane %v8348_v8, 5 }
 0x401   : >> { %v2661_v5 = vadd.f32 %v8345_v58, %v2660_v2  ;;  %v8365_v40 = vmax.f32 %v2669_v56, 0.0  ;;  %v10101_v50 = vrot.slane %v8355_v57, 1  ;;  %v8436_v6 = vmul.f32 %v8355_v57, %v10265_v25 }
 0x402   : >> { %10270 = vst [vmem:[#allocation87_spill] sm:$0xff] %v8448_v61  ;;  %v5892_v38 = vpop.f32.mrf.mxu0  ;;  %v2746_v29 = vrot.slane %v8348_v8, 1  ;;  %v10103_v60 = vrot.slane %v8355_v57, 6  ;;  %v2760_v25 = vrot.slane %v8355_v57, 2  ;;  %v10300_v61 = vrot.slane %v8355_v57, 3 }
 0x403   : >> { %3240 = vrot.lane.b32.xlu1 %v8348_v8, %s6409_s1  ;;  %3012 = vrot.lane.b32.xlu0 %v8355_v57, %s6407_s30  ;;  %v8363_v32 = vmax.f32 %v2661_v5, 0.0  ;;  %v2715_v23 = vrot.slane %v8365_v40, 6  ;;  %v2763_v62 = vrot.slane %v8365_v40, 2  ;;  %v2731_v42 = vrot.slane %v8365_v40, 7  ;;  %10266 = vst [vmem:[#allocation85_spill] sm:$0xff] %v8436_v6 }
 0x404   : >> { %v2779_v9 = vrot.slane %v8365_v40, 3  ;;  %v2699_v19 = vrot.slane %v8365_v40, 5  ;;  %v8452_v0 = vmul.f32 %v8365_v40, %v10271_v36  ;;  %v10108_v48 = vrot.slane %v8365_v40, 1  ;;  %v2673_v8 = vpop.f32.mrf.mxu0 }
 0x405   : >> { %v2745_v12 = vrot.slane %v8363_v32, 1  ;;  %v8403_v55 = vsel %vm738_vm0, %v2714_v22, %v2715_v23  ;;  %v8409_v63 = vsel %vm789_vm2, %v2762_v15, %v2763_v62  ;;  %v8425_v59 = vsel %vm755_vm4, %v2730_v26, %v2731_v42 }
 0x406   : >> { %10262 = vst [vmem:[#allocation82_spill] sm:$0xff] %v8409_v63  ;;  %10263 = vst [vmem:[#allocation83_spill] sm:$0xff] %v8425_v59  ;;  %v8431_v34 = vsel %vm806_vm5, %v2778_v35, %v2779_v9  ;;  %v8444_v14 = vmul.f32 %v8363_v32, %v10267_v17  ;;  %v8463_v18 = vsel %vm721_vm1, %v2698_v33, %v2699_v19  ;;  %v2761_v31 = vrot.slane %v8363_v32, 2 }
 0x407   : >> { %2876 = vrot.lane.b32.xlu0 %v8365_v40, %s6408_s24  ;;  %2870 = vrot.lane.b32.xlu1 %v8355_v57, %s6408_s24  ;;  %v8383_v24 = vsel %vm772_vm3, %v10101_v50, %v2745_v12  ;;  %10264 = vst [vmem:[#allocation84_spill] sm:$0xff] %v8431_v34  ;;  %10272 = vst [vmem:[#allocation88_spill] sm:$0xff] %v8452_v0  ;;  %v2682_v54 = vadd.f32 %v5892_v38, %v8345_v58  ;;  %v2713_v1 = vrot.slane %v8363_v32, 6 }
 0x408   : >> { %10268 = vst [vmem:[#allocation86_spill] sm:$0xff] %v8444_v14  ;;  %10273 = vst [vmem:[#allocation89_spill] sm:$0xff] %v8463_v18  ;;  %v8484_v45 = vsel %vm772_vm3, %v2746_v29, %v10108_v48  ;;  %v8499_v13 = vsel %vm789_vm2, %v2761_v31, %v2762_v15  ;;  %v2777_v2 = vrot.slane %v8363_v32, 3  ;;  %v2729_v5 = vrot.slane %v8363_v32, 7 }
 0x409   : >> { %10274 = vst [vmem:[#allocation90_spill] sm:$0xff] %v8484_v45  ;;  %v8490_v16 = vmax.f32 %v2682_v54, 0.0  ;;  %v8511_v39 = vsel %vm738_vm0, %v10103_v60, %v2713_v1  ;;  %v10102_v15 = vrot.slane %v8355_v57, 7  ;;  %v2697_v11 = vrot.slane %v8363_v32, 5 }
 0x40a   : >> { %v8520_v56 = vsel %vm806_vm5, %v2777_v2, %v2778_v35  ;;  %v8539_v35 = vsel %vm789_vm2, %v2760_v25, %v2761_v31  ;;  %v10107_v36 = vrot.slane %v8355_v57, 3  ;;  %v10104_v31 = vrot.slane %v8355_v57, 5 }
 0x40b   : >> { %3242 = vrot.lane.b32.xlu0 %v8365_v40, %s6409_s1  ;;  %3236 = vrot.lane.b32.xlu1 %v8355_v57, %s6409_s1  ;;  %10275 = vst [vmem:[#allocation91_spill] sm:$0xff] %v8490_v16  ;;  %v8533_v17 = vsel %vm755_vm4, %v10102_v15, %v2729_v5  ;;  %10276 = vst [vmem:[#allocation92_spill] sm:$0xff] %v8539_v35  ;;  %v8549_v38 = vsel %vm721_vm1, %v2697_v11, %v2698_v33  ;;  %v10117_v10 = vrot.slane %v8490_v16, 6 }
 0x40c   : >> { %10277 = vst [vmem:[#allocation93_spill] sm:$0xff] %v8549_v38  ;;  %v8555_v54 = vsel %vm806_vm5, %v10107_v36, %v2777_v2  ;;  %v8566_v33 = vsel %vm721_vm1, %v10104_v31, %v2697_v11  ;;  %v8576_v2 = vsel %vm738_vm0, %v2713_v1, %v2714_v22  ;;  %v8586_v11 = vsel %vm755_vm4, %v2729_v5, %v2730_v26  ;;  %v5893_v26 = vpop.f32.mrf.mxu0 }
 0x40d   : >> { %10278 = vst [vmem:[#allocation94_spill] sm:$0xff] %v8566_v33  ;;  %v8612_v22 = vsel %vm772_vm3, %v2745_v12, %v2746_v29  ;;  %v2685_v1 = vadd.f32 %v5893_v26, %v8345_v58  ;;  %v10299_v41 = vrot.slane %v8365_v40, 1  ;;  %v10125_v14 = vrot.slane %v8490_v16, 7 }
 0x40e   : >> { %10279 = vst [vmem:[#allocation95_spill] sm:$0xff] %v8612_v22 }
 0x40f   : >> { %2872 = vrot.lane.b32.xlu0 %v8363_v32, %s6408_s24  ;;  %3018 = vrot.lane.b32.xlu1 %v8365_v40, %s6407_s30  ;;  %v8628_v12 = vmax.f32 %v2685_v1, 0.0  ;;  %v10126_v40 = vrot.slane %v8490_v16, 2 }
 0x411   : >> { %10280 = vst [vmem:[#allocation96_spill] sm:$0xff] %v8628_v12  ;;  %v2767_v36 = vrot.slane %v8628_v12, 2  ;;  %v2719_v48 = vrot.slane %v8628_v12, 6  ;;  %v2783_v46 = vrot.slane %v8628_v12, 3  ;;  %v2735_v6 = vrot.slane %v8628_v12, 7 }
 0x413   : >> { %3238 = vrot.lane.b32.xlu0 %v8363_v32, %s6409_s1  ;;  %3014 = vrot.lane.b32.xlu1 %v8363_v32, %s6407_s30  ;;  %v2674_v32 = vadd.f32 %v8345_v58, %v2673_v8  ;;  %v8797_v0 = vsel %vm806_vm5, %v2783_v46, %v10300_v61  ;;  %v8814_v61 = vsel %vm789_vm2, %v10126_v40, %v2767_v36  ;;  %v10305_v40 = vrot.slane %v8355_v57, 5 }
 0x414   : >> { %10301 = vst [vmem:[#allocation115_spill] sm:$0xff] %v8797_v0 }
 0x415   : >> { %v8630_v29 = vmax.f32 %v2674_v32, 0.0 }
 0x417   : >> { %2812 = vrot.lane.b32.xlu0 %v8403_v55, %s6409_s1  ;;  %2906 = vrot.lane.b32.xlu1 %v8409_v63, %s6409_s1  ;;  %10281 = vst [vmem:[#allocation97_spill] sm:$0xff] %v8630_v29  ;;  %v10100_v8 = vrot.slane %v8630_v29, 2  ;;  %v10098_v4 = vrot.slane %v8630_v29, 3  ;;  %v10099_v20 = vrot.slane %v8630_v29, 5  ;;  %v10106_v7 = vrot.slane %v8630_v29, 6 }
 0x418   : >> { %v10122_v44 = vrot.slane %v8630_v29, 1 }
 0x419   : >> { %v8655_v43 = vsel %vm789_vm2, %v2763_v62, %v10100_v8  ;;  %v8672_v62 = vsel %vm806_vm5, %v2779_v9, %v10098_v4  ;;  %v8689_v9 = vsel %vm721_vm1, %v2699_v19, %v10099_v20  ;;  %v10105_v4 = vrot.slane %v8630_v29, 7  ;;  %v2676_v8 = vpop.f32.mrf.mxu0 }
 0x41a   : >> { %v8715_v50 = vsel %vm738_vm0, %v2715_v23, %v10106_v7  ;;  %v2677_v60 = vadd.f32 %v8345_v58, %v2676_v8 }
 0x41b   : >> { %2844 = vrot.lane.b32.xlu0 %v8425_v59, %s6407_s30  ;;  %2938 = vrot.lane.b32.xlu1 %v8431_v34, %s6407_s30  ;;  %10287 = vst [vmem:[#allocation103_spill] sm:$0xff] %v8715_v50  ;;  %v8723_v15 = vsel %vm755_vm4, %v2731_v42, %v10105_v4 }
 0x41c   : >> { %10288 = vst [vmem:[#allocation104_spill] sm:$0xff] %v8723_v15  ;;  %v8738_v42 = vmax.f32 %v2677_v60, 0.0  ;;  %v8757_v60 = vsel %vm789_vm2, %v2767_v36, %v2760_v25  ;;  %v8773_v25 = vsel %vm738_vm0, %v10117_v10, %v2719_v48  ;;  %v8791_v10 = vsel %vm772_vm3, %v10299_v41, %v10122_v44 }
 0x41e   : >> { %10291 = vst [vmem:[#allocation107_spill] sm:$0xff] %v8738_v42 }
 0x41f   : >> { %3072 = vrot.lane.b32.xlu0 %v8431_v34, %s6409_s1  ;;  %2970 = vrot.lane.b32.xlu1 %v8463_v18, %s6408_s24  ;;  %v10310_v34 = vrot.slane %v8355_v57, 6 }
 0x423   : >> { %3096 = vrot.lane.b32.xlu0 %v8463_v18, %s6407_s30  ;;  %3312 = vrot.lane.b32.xlu1 %v8463_v18, %s6409_s1  ;;  %v6150_v18 = vld [vmem:[%s8915_s23 + $0x70] sm:$0xff]  }
 0x427   : >> { %3120 = vrot.lane.b32.xlu0 %v8403_v55, %s6408_s24  ;;  %2994 = vrot.lane.b32.xlu1 %v8425_v59, %s6409_s1 }
 0x42b   : >> { %3048 = vrot.lane.b32.xlu0 %v8484_v45, %s6408_s24  ;;  %3336 = vrot.lane.b32.xlu1 %v8403_v55, %s6407_s30 }
 0x42f   : >> { %3264 = vrot.lane.b32.xlu1 %v8484_v45, %s6407_s30  ;;  %3008 = vrot.lane.b32.xlu0 %v8490_v16, %s6407_s30 }
 0x433   : >> { %3360 = vrot.lane.b32.xlu1 %v8425_v59, %s6408_s24  ;;  %2904 = vrot.lane.b32.xlu0 %v8499_v13, %s6409_s1  ;;  %v8820_v59 = vsel %vm755_vm4, %v10125_v14, %v2735_v6 }
 0x437   : >> { %3288 = vrot.lane.b32.xlu1 %v8409_v63, %s6408_s24  ;;  %2808 = vrot.lane.b32.xlu0 %v8511_v39, %s6409_s1 }
 0x43b   : >> { %2936 = vrot.lane.b32.xlu0 %v8520_v56, %s6407_s30  ;;  %2866 = vrot.lane.b32.xlu1 %v8490_v16, %s6408_s24 }
 0x43f   : >> { %2840 = vrot.lane.b32.xlu0 %v8533_v17, %s6407_s30  ;;  %2902 = vrot.lane.b32.xlu1 %v8539_v35, %s6409_s1 }
 0x443   : >> { %2968 = vrot.lane.b32.xlu0 %v8549_v38, %s6408_s24  ;;  %2934 = vrot.lane.b32.xlu1 %v8555_v54, %s6407_s30 }
 0x447   : >> { %3068 = vrot.lane.b32.xlu0 %v8555_v54, %s6409_s1  ;;  %2966 = vrot.lane.b32.xlu1 %v8566_v33, %s6408_s24 }
 0x44b   : >> { %3092 = vrot.lane.b32.xlu0 %v8566_v33, %s6407_s30  ;;  %2810 = vrot.lane.b32.xlu1 %v8576_v2, %s6409_s1 }
 0x44f   : >> { %3116 = vrot.lane.b32.xlu0 %v8511_v39, %s6408_s24  ;;  %2842 = vrot.lane.b32.xlu1 %v8586_v11, %s6407_s30 }
 0x453   : >> { %3044 = vrot.lane.b32.xlu0 %v8383_v24, %s6408_s24  ;;  %3070 = vrot.lane.b32.xlu1 %v8520_v56, %s6409_s1 }
 0x457   : >> { %3310 = vrot.lane.b32.xlu0 %v8549_v38, %s6409_s1  ;;  %3308 = vrot.lane.b32.xlu1 %v8566_v33, %s6409_s1  ;;  %v6155_v33 = vld [vmem:[%s8915_s23 + $0x20] sm:$0xff]  }
 0x45b   : >> { %2992 = vrot.lane.b32.xlu0 %v8586_v11, %s6409_s1  ;;  %2990 = vrot.lane.b32.xlu1 %v8533_v17, %s6409_s1 }
 0x45f   : >> { %3334 = vrot.lane.b32.xlu0 %v8576_v2, %s6407_s30  ;;  %3094 = vrot.lane.b32.xlu1 %v8549_v38, %s6407_s30  ;;  %v2733_v38 = vrot.slane %v8738_v42, 7 }
 0x463   : >> { %3262 = vrot.lane.b32.xlu0 %v8612_v22, %s6407_s30  ;;  %3332 = vrot.lane.b32.xlu1 %v8511_v39, %s6407_s30 }
 0x467   : >> { %3358 = vrot.lane.b32.xlu0 %v8586_v11, %s6408_s24  ;;  %3118 = vrot.lane.b32.xlu1 %v8576_v2, %s6408_s24 }
 0x46b   : >> { %3286 = vrot.lane.b32.xlu0 %v8499_v13, %s6408_s24  ;;  %3260 = vrot.lane.b32.xlu1 %v8383_v24, %s6407_s30 }
 0x46f   : >> { %3356 = vrot.lane.b32.xlu1 %v8533_v17, %s6408_s24  ;;  %2868 = vrot.lane.b32.xlu0 %v8628_v12, %s6408_s24 }
 0x471   : >> { %v8636_v5 = vpop.permute.xlu0 %3016  ;;  %v8638_v26 = vpop.permute.xlu1 %2874 }
 0x472   : >> { %10282 = vst [vmem:[#allocation98_spill] sm:$0xff] %v8638_v26  ;;  %v6153_v26 = vld [vmem:[%s8915_s23 + $0x28] sm:$0xff]  }
 0x473   : >> { %3046 = vrot.lane.b32.xlu1 %v8612_v22, %s6408_s24  ;;  %3234 = vrot.lane.b32.xlu0 %v8628_v12, %s6409_s1  ;;  %v6163_v22 = vld [vmem:[%s8915_s23 + $0xb8] sm:$0xff]  }
 0x475   : >> { %v8645_v1 = vpop.permute.xlu0 %3012  ;;  %v8647_v32 = vpop.permute.xlu1 %3240 }
 0x477   : >> { %3284 = vrot.lane.b32.xlu1 %v8539_v35, %s6408_s24  ;;  %2908 = vrot.lane.b32.xlu0 %v8655_v43, %s6409_s1 }
 0x479   : >> { %v8662_v28 = vpop.permute.xlu0 %2876  ;;  %v8664_v27 = vpop.permute.xlu1 %2870 }
 0x47a   : >> { %10283 = vst [vmem:[#allocation99_spill] sm:$0xff] %v8662_v28  ;;  %10284 = vst [vmem:[#allocation100_spill] sm:$0xff] %v8664_v27  ;;  %v6149_v28 = vld [vmem:[%s8915_s23 + $0x38] sm:$0xff]  }
 0x47b   : >> { %2878 = vrot.lane.b32.xlu1 %v8630_v29, %s6408_s24  ;;  %2940 = vrot.lane.b32.xlu0 %v8672_v62, %s6407_s30 }
 0x47d   : >> { %v8679_v49 = vpop.permute.xlu0 %3242  ;;  %v8681_v37 = vpop.permute.xlu1 %3236 }
 0x47e   : >> { %10285 = vst [vmem:[#allocation101_spill] sm:$0xff] %v8679_v49  ;;  %v2703_v49 = vrot.slane %v8628_v12, 5 }
 0x47f   : >> { %3244 = vrot.lane.b32.xlu1 %v8630_v29, %s6409_s1  ;;  %2972 = vrot.lane.b32.xlu0 %v8689_v9, %s6408_s24 }
 0x481   : >> { %v8695_v30 = vpop.permute.xlu0 %2872  ;;  %v8697_v47 = vpop.permute.xlu1 %3018 }
 0x482   : >> { %10286 = vst [vmem:[#allocation102_spill] sm:$0xff] %v8695_v30  ;;  %v6152_v30 = vld [vmem:[%s8915_s23 + $0x68] sm:$0xff]  }
 0x483   : >> { %3010 = vrot.lane.b32.xlu1 %v8628_v12, %s6407_s30  ;;  %3314 = vrot.lane.b32.xlu0 %v8689_v9, %s6409_s1 }
 0x485   : >> { %v8705_v19 = vpop.permute.xlu0 %3238  ;;  %v8707_v20 = vpop.permute.xlu1 %3014 }
 0x487   : >> { %2814 = vrot.lane.b32.xlu1 %v8715_v50, %s6409_s1  ;;  %2996 = vrot.lane.b32.xlu0 %v8723_v15, %s6409_s1 }
 0x489   : >> { %v8730_v31 = vpop.permute.xlu0 %2812  ;;  %v8732_v23 = vpop.permute.xlu1 %2906 }
 0x48a   : >> { %10289 = vst [vmem:[#allocation105_spill] sm:$0xff] %v8730_v31  ;;  %10290 = vst [vmem:[#allocation106_spill] sm:$0xff] %v8732_v23  ;;  %v6151_v31 = vld [vmem:[%s8915_s23 + $0x30] sm:$0xff]   ;;  %v10328_v23 = vrot.slane %v8490_v16, 7 }
 0x48b   : >> { %2846 = vrot.lane.b32.xlu1 %v8723_v15, %s6407_s30  ;;  %3338 = vrot.lane.b32.xlu0 %v8715_v50, %s6407_s30 }
 0x48d   : >> { %v8740_v4 = vpop.permute.xlu0 %2844  ;;  %v8742_v7 = vpop.permute.xlu1 %2938 }
 0x48e   : >> { %10292 = vst [vmem:[#allocation108_spill] sm:$0xff] %v8740_v4  ;;  %10293 = vst [vmem:[#allocation109_spill] sm:$0xff] %v8742_v7 }
 0x48f   : >> { %3074 = vrot.lane.b32.xlu1 %v8672_v62, %s6409_s1  ;;  %2864 = vrot.lane.b32.xlu0 %v8738_v42, %s6408_s24 }
 0x491   : >> { %v8749_v58 = vpop.permute.xlu0 %3072  ;;  %v8751_v8 = vpop.permute.xlu1 %2970 }
 0x492   : >> { %10294 = vst [vmem:[#allocation110_spill] sm:$0xff] %v8749_v58  ;;  %10295 = vst [vmem:[#allocation111_spill] sm:$0xff] %v8751_v8 }
 0x493   : >> { %3098 = vrot.lane.b32.xlu1 %v8689_v9, %s6407_s30  ;;  %2900 = vrot.lane.b32.xlu0 %v8757_v60, %s6409_s1 }
 0x495   : >> { %v8765_v52 = vpop.permute.xlu0 %3096  ;;  %v8767_v51 = vpop.permute.xlu1 %3312 }
 0x496   : >> { %10296 = vst [vmem:[#allocation112_spill] sm:$0xff] %v8765_v52  ;;  %10297 = vst [vmem:[#allocation113_spill] sm:$0xff] %v8767_v51  ;;  %v8842_v52 = vsel %vm721_vm1, %v2703_v49, %v10305_v40 }
 0x497   : >> { %3122 = vrot.lane.b32.xlu1 %v8715_v50, %s6408_s24  ;;  %2804 = vrot.lane.b32.xlu0 %v8773_v25, %s6409_s1  ;;  %v10128_v50 = vrot.slane %v8490_v16, 3  ;;  %10306 = vst [vmem:[#allocation119_spill] sm:$0xff] %v8842_v52 }
 0x499   : >> { %v8781_v3 = vpop.permute.xlu0 %3120  ;;  %v8783_v53 = vpop.permute.xlu1 %2994  ;;  %v8836_v14 = vsel %vm806_vm5, %v10128_v50, %v2783_v46 }
 0x49a   : >> { %10298 = vst [vmem:[#allocation114_spill] sm:$0xff] %v8781_v3  ;;  %10304 = vst [vmem:[#allocation118_spill] sm:$0xff] %v8836_v14 }
 0x49b   : >> { %3050 = vrot.lane.b32.xlu1 %v8791_v10, %s6408_s24  ;;  %2932 = vrot.lane.b32.xlu0 %v8797_v0, %s6407_s30 }
 0x49d   : >> { %v8806_v41 = vpop.permute.xlu0 %3048  ;;  %v8808_v44 = vpop.permute.xlu1 %3336 }
 0x49e   : >> { %10302 = vst [vmem:[#allocation116_spill] sm:$0xff] %v8808_v44  ;;  %v10130_v44 = vrot.slane %v8490_v16, 5 }
 0x49f   : >> { %2898 = vrot.lane.b32.xlu1 %v8814_v61, %s6409_s1  ;;  %2836 = vrot.lane.b32.xlu0 %v8820_v59, %s6407_s30 }
 0x4a0   : >> { %v8857_v46 = vsel %vm721_vm1, %v10130_v44, %v2703_v49 }
 0x4a1   : >> { %v8828_v3 = vpop.permute.xlu0 %3008  ;;  %v8830_v36 = vpop.permute.xlu1 %3264 }
 0x4a2   : >> { %10303 = vst [vmem:[#allocation117_spill] sm:$0xff] %v8828_v3  ;;  %v2751_v3 = vrot.slane %v8628_v12, 1 }
 0x4a3   : >> { %2930 = vrot.lane.b32.xlu1 %v8836_v14, %s6407_s30  ;;  %2964 = vrot.lane.b32.xlu0 %v8842_v52, %s6408_s24 }
 0x4a5   : >> { %v8849_v63 = vpop.permute.xlu0 %2904  ;;  %v8851_v58 = vpop.permute.xlu1 %3360 }
 0x4a6   : >> { %10307 = vst [vmem:[#allocation120_spill] sm:$0xff] %v8849_v63  ;;  %10308 = vst [vmem:[#allocation121_spill] sm:$0xff] %v8851_v58  ;;  %v8871_v58 = vsel %vm738_vm0, %v2719_v48, %v10310_v34  ;;  %v10134_v34 = vrot.slane %v8490_v16, 1  ;;  %v6164_v63 = vld [vmem:[%s8915_s23 + $0x40] sm:$0xff]  }
 0x4a7   : >> { %2962 = vrot.lane.b32.xlu1 %v8857_v46, %s6408_s24  ;;  %3064 = vrot.lane.b32.xlu0 %v8836_v14, %s6409_s1  ;;  %v10313_v14 = vrot.slane %v8355_v57, 7 }
 0x4a9   : >> { %v8863_v40 = vpop.permute.xlu0 %2808  ;;  %v8865_v50 = vpop.permute.xlu1 %3288  ;;  %v8885_v51 = vsel %vm755_vm4, %v2735_v6, %v10313_v14  ;;  %v8901_v6 = vsel %vm772_vm3, %v10134_v34, %v2751_v3  ;;  %v6148_v34 = vld [vmem:[%s8915_s23 + $0x78] sm:$0xff]  }
 0x4aa   : >> { %10309 = vst [vmem:[#allocation122_spill] sm:$0xff] %v8863_v40  ;;  %5666 = vmatprep.subr.bf16.mxu1 %v6148_v34  ;;  %v10322_v40 = vrot.slane %v8355_v57, 1  ;;  %v10323_v57 = vrot.slane %v8630_v29, 6 }
 0x4ab   : >> { %2806 = vrot.lane.b32.xlu1 %v8871_v58, %s6409_s1  ;;  %3088 = vrot.lane.b32.xlu0 %v8857_v46, %s6407_s30 }
 0x4ac   : >> { %5667 = vmatpush3.bf16.msra.mxu1 %v6149_v28 }
 0x4ad   : >> { %v8877_v49 = vpop.permute.xlu0 %2936  ;;  %v8879_v44 = vpop.permute.xlu1 %2866  ;;  %5668 = vmatprep.subr.bf16.mxu1 %v6150_v18  ;;  %v2717_v18 = vrot.slane %v8738_v42, 6 }
 0x4ae   : >> { %10311 = vst [vmem:[#allocation123_spill] sm:$0xff] %v8877_v49  ;;  %10312 = vst [vmem:[#allocation124_spill] sm:$0xff] %v8879_v44  ;;  %v6161_v49 = vld [vmem:[%s8915_s23 + $0x8] sm:$0xff]  }
 0x4af   : >> { %2838 = vrot.lane.b32.xlu1 %v8885_v51, %s6407_s30  ;;  %3112 = vrot.lane.b32.xlu0 %v8773_v25, %s6408_s24 }
 0x4b0   : >> { %5669 = vmatpush3.bf16.msra.mxu1 %v6151_v31  ;;  %v8954_v31 = vsel %vm772_vm3, %v2751_v3, %v10322_v40  ;;  %v8969_v3 = vsel %vm738_vm0, %v10323_v57, %v2717_v18  ;;  %v6158_v40 = vld [vmem:[%s8915_s23 + $0x50] sm:$0xff]  }
 0x4b1   : >> { %v8893_v48 = vpop.permute.xlu0 %2840  ;;  %v8895_v35 = vpop.permute.xlu1 %2902  ;;  %5670 = vmatprep.subr.bf16.mxu1 %v6152_v30  ;;  %v6156_v30 = vld [vmem:[%s8915_s23 + $0x58] sm:$0xff]   ;;  %10324 = vst [vmem:[#allocation133_spill] sm:$0xff] %v8969_v3 }
 0x4b2   : >> { %10314 = vst [vmem:[#allocation125_spill] sm:$0xff] %v8893_v48 }
 0x4b3   : >> { %3066 = vrot.lane.b32.xlu1 %v8797_v0, %s6409_s1  ;;  %3040 = vrot.lane.b32.xlu0 %v8901_v6, %s6408_s24 }
 0x4b4   : >> { %5671 = vmatpush3.bf16.msra.mxu1 %v6153_v26  ;;  %v6157_v26 = vld [vmem:[%s8915_s23 + $0x18] sm:$0xff]  }
 0x4b5   : >> { %v8908_v14 = vpop.permute.xlu0 %2968  ;;  %v8910_v12 = vpop.permute.xlu1 %2934 }
 0x4b6   : >> { %10315 = vst [vmem:[#allocation126_spill] sm:$0xff] %v8908_v14 }
 0x4b7   : >> { %2986 = vrot.lane.b32.xlu1 %v8820_v59, %s6409_s1  ;;  %3306 = vrot.lane.b32.xlu0 %v8842_v52, %s6409_s1 }
 0x4b9   : >> { %v8923_v0 = vpop.permute.xlu0 %3068  ;;  %v8925_v4 = vpop.permute.xlu1 %2966 }
 0x4ba   : >> { %10316 = vst [vmem:[#allocation127_spill] sm:$0xff] %v8923_v0  ;;  %10317 = vst [vmem:[#allocation128_spill] sm:$0xff] %v8925_v4  ;;  %v10331_v4 = vrot.slane %v8738_v42, 3 }
 0x4bb   : >> { %3090 = vrot.lane.b32.xlu1 %v8842_v52, %s6407_s30  ;;  %2988 = vrot.lane.b32.xlu0 %v8885_v51, %s6409_s1  ;;  %v10330_v52 = vrot.slane %v8490_v16, 3 }
 0x4bd   : >> { %v8935_v34 = vpop.permute.xlu0 %3092  ;;  %v8937_v0 = vpop.permute.xlu1 %2810  ;;  %v9031_v44 = vsel %vm806_vm5, %v10331_v4, %v10330_v52 }
 0x4be   : >> { %10318 = vst [vmem:[#allocation129_spill] sm:$0xff] %v8935_v34  ;;  %10319 = vst [vmem:[#allocation130_spill] sm:$0xff] %v8937_v0  ;;  %v6154_v34 = vld [vmem:[%s8915_s23 + $0x60] sm:$0xff]   ;;  %v6159_v0 = vld [vmem:[%s8915_s23 + $0x10] sm:$0xff]  }
 0x4bf   : >> { %3114 = vrot.lane.b32.xlu1 %v8871_v58, %s6408_s24  ;;  %3330 = vrot.lane.b32.xlu0 %v8871_v58, %s6407_s30  ;;  %10332 = vst [vmem:[#allocation135_spill] sm:$0xff] %v9031_v44 }
 0x4c0   : >> { %5672 = vmatprep.subr.bf16.mxu1 %v6154_v34  ;;  %v6162_v34 = vld [vmem:[%s8915_s23 + $0xf8] sm:$0xff]  }
 0x4c1   : >> { %v8943_v28 = vpop.permute.xlu0 %3116  ;;  %v8945_v48 = vpop.permute.xlu1 %2842  ;;  %5673 = vmatpush3.bf16.msra.mxu1 %v6155_v33  ;;  %v10325_v33 = vrot.slane %v8490_v16, 6  ;;  %5706 = vmatprep.subr.bf16.mxu0 %v6162_v34 }
 0x4c2   : >> { %10320 = vst [vmem:[#allocation131_spill] sm:$0xff] %v8943_v28  ;;  %10321 = vst [vmem:[#allocation132_spill] sm:$0xff] %v8945_v48  ;;  %5674 = vmatprep.subr.bf16.mxu1 %v6156_v30  ;;  %v6160_v30 = vld [vmem:[%s8915_s23 + $0x48] sm:$0xff]   ;;  %5707 = vmatpush3.bf16.msra.mxu0 %v6163_v22  ;;  %v6167_v22 = vld [vmem:[%s8915_s23 + $0xb0] sm:$0xff]  }
 0x4c3   : >> { %3258 = vrot.lane.b32.xlu0 %v8954_v31, %s6407_s30  ;;  %3042 = vrot.lane.b32.xlu1 %v8954_v31, %s6408_s24  ;;  %v8986_v7 = vsel %vm738_vm0, %v2717_v18, %v10325_v33  ;;  %v10326_v18 = vrot.slane %v8490_v16, 2  ;;  %v10327_v33 = vrot.slane %v8738_v42, 2 }
 0x4c5   : >> { %v8961_v28 = vpop.permute.xlu0 %3044  ;;  %v8963_v48 = vpop.permute.xlu1 %3070  ;;  %5675 = vmatpush3.bf16.msra.mxu1 %v6157_v26  ;;  %v9004_v26 = vsel %vm789_vm2, %v10327_v33, %v10326_v18  ;;  %v6166_v18 = vld [vmem:[%s8915_s23 + $0xf0] sm:$0xff]  }
 0x4c6   : >> { %5676 = vmatprep.subr.bf16.mxu1 %v6158_v40  ;;  %v9010_v40 = vsel %vm755_vm4, %v2733_v38, %v10328_v23  ;;  %v6165_v23 = vld [vmem:[%s8915_s23] sm:$0xff]   ;;  %5708 = vmatprep.subr.bf16.mxu0 %v6166_v18 }
 0x4c7   : >> { %3354 = vrot.lane.b32.xlu0 %v8885_v51, %s6408_s24  ;;  %2800 = vrot.lane.b32.xlu1 %v8969_v3, %s6409_s1  ;;  %10329 = vst [vmem:[#allocation134_spill] sm:$0xff] %v9010_v40 }
 0x4c8   : >> { %5709 = vmatpush3.bf16.msra.mxu0 %v6167_v22 }
 0x4c9   : >> { %v3311_v57 = vpop.permute.xlu0 %3310  ;;  %v8980_v8 = vpop.permute.xlu1 %3308  ;;  %5677 = vmatpush3.bf16.msra.mxu1 %v6159_v0 }
 0x4ca   : >> { %5678 = vmatprep.subr.bf16.mxu1 %v6160_v30  ;;  %v3404_v0 = vsel %vm3136_vm7, %v8520_v56, %v3311_v57  ;;  %v6168_v56 = vld [vmem:[%s8915_s23 + $0x178] sm:$0xff]   ;;  %v6169_v57 = vld [vmem:[%s8915_s23 + $0xe8] sm:$0xff]  }
 0x4cb   : >> { %3282 = vrot.lane.b32.xlu0 %v8757_v60, %s6408_s24  ;;  %2802 = vrot.lane.b32.xlu1 %v8986_v7, %s6409_s1 }
 0x4cc   : >> { %5710 = vmatprep.subr.bf16.mxu0 %v6169_v57  ;;  %v3381_v57 = vsel %vm3136_vm7, %v8586_v11, %v8647_v32  ;;  %v3380_v32 = vsel %vm3136_vm7, %v8533_v17, %v8705_v19  ;;  %v3403_v17 = vsel %vm3136_vm7, %v8555_v54, %v8980_v8  ;;  %v6181_v19 = vld [vmem:[%s8915_s23 + $0xd0] sm:$0xff]   ;;  %v6185_v8 = vld [vmem:[%s8915_s23 + $0xc8] sm:$0xff]  }
 0x4cd   : >> { %v8994_v14 = vpop.permute.xlu0 %2992  ;;  %v8996_v45 = vpop.permute.xlu1 %2990  ;;  %5679 = vmatpush3.bf16.msra.mxu1 %v6161_v49  ;;  %v6171_v49 = vld [vmem:[%s8915_s23 + $0xa8] sm:$0xff]   ;;  %v6183_v54 = vld [vmem:[%s8915_s23 + $0x90] sm:$0xff]  }
 0x4ce   : >> { %5680 = vmatprep.subr.bf16.mxu1 %v6164_v63  ;;  %v6173_v63 = vld [vmem:[%s8915_s23 + $0xe0] sm:$0xff]   ;;  %5711 = vmatpush3.bf16.msra.mxu0 %v6171_v49  ;;  %v6177_v49 = vld [vmem:[%s8915_s23 + $0xd8] sm:$0xff]  }
 0x4cf   : >> { %2896 = vrot.lane.b32.xlu0 %v9004_v26, %s6409_s1  ;;  %2834 = vrot.lane.b32.xlu1 %v9010_v40, %s6407_s30 }
 0x4d0   : >> { %5712 = vmatprep.subr.bf16.mxu0 %v6173_v63 }
 0x4d1   : >> { %v3335_v34 = vpop.permute.xlu0 %3334  ;;  %v3095_v33 = vpop.permute.xlu1 %3094  ;;  %5681 = vmatpush3.bf16.msra.mxu1 %v6165_v23 }
 0x4d2   : >> { %v3412_v27 = vsel %vm1039_vm6, %v3404_v0, %v3335_v34  ;;  %v10333_v0 = vrot.slane %v8630_v29, 7  ;;  %v3213_v34 = vsel %vm3136_vm7, %v8499_v13, %v8963_v48  ;;  %5746 = vmatprep.subr.bf16.mxu1 %v6168_v56  ;;  %v10335_v13 = vrot.slane %v8490_v16, 5 }
 0x4d3   : >> { %2928 = vrot.lane.b32.xlu0 %v9031_v44, %s6407_s30  ;;  %3022 = vrot.lane.b32.xlu1 %v8738_v42, %s6407_s30  ;;  %v10336_v48 = vrot.slane %v8738_v42, 5  ;;  %v3389_v56 = vsel %vm1039_vm6, %v3381_v57, %v8830_v36  ;;  %v10338_v57 = vld [vmem:[#allocation31_spill] sm:$0xff] }
 0x4d4   : >> { %v9044_v52 = vsel %vm755_vm4, %v10333_v0, %v2733_v38  ;;  %v3221_v38 = vsel %vm1039_vm6, %v3213_v34, %v3095_v33  ;;  %v3397_v11 = vsel %vm3153_vm8, %v3389_v56, %v8865_v50  ;;  %v6179_v50 = vld [vmem:[%s8915_s23 + $0x98] sm:$0xff]  }
 0x4d5   : >> { %v3263_v30 = vpop.permute.xlu0 %3262  ;;  %v3333_v18 = vpop.permute.xlu1 %3332  ;;  %10334 = vst [vmem:[#allocation136_spill] sm:$0xff] %v9044_v52  ;;  %v9072_v33 = vsel %vm721_vm1, %v10336_v48, %v10335_v13 }
 0x4d6   : >> { %v3388_v63 = vsel %vm1039_vm6, %v3380_v32, %v3263_v30  ;;  %v3411_v30 = vsel %vm1039_vm6, %v3403_v17, %v3333_v18 }
 0x4d7   : >> { %2832 = vrot.lane.b32.xlu0 %v9044_v52, %s6407_s30  ;;  %3320 = vrot.lane.b32.xlu1 %v8857_v46, %s6409_s1 }
 0x4d9   : >> { %v3359_v23 = vpop.permute.xlu0 %3358  ;;  %v3119_v22 = vpop.permute.xlu1 %3118 }
 0x4da   : >> { %v9061_v0 = vsel %vm3153_vm8, %v3412_v27, %v3359_v23  ;;  %v9064_v4 = vsel %vm3153_vm8, %v3221_v38, %v3119_v22  ;;  %v6175_v27 = vld [vmem:[%s8915_s23 + $0xa0] sm:$0xff]   ;;  %v10337_v23 = vld [vmem:[#allocation38_spill] sm:$0xff] }
 0x4db   : >> { %2960 = vrot.lane.b32.xlu0 %v9072_v33, %s6408_s24  ;;  %3248 = vrot.lane.b32.xlu1 %v8490_v16, %s6409_s1  ;;  %v9090_v22 = vmul.f32 %v3397_v11, %v10337_v23 }
 0x4dc   : >> { %5713 = vmatpush3.bf16.msra.mxu0 %v6175_v27 }
 0x4dd   : >> { %v3287_v36 = vpop.permute.xlu0 %3286  ;;  %v3261_v34 = vpop.permute.xlu1 %3260  ;;  %5714 = vmatprep.subr.bf16.mxu0 %v6177_v49  ;;  %v10339_v49 = vrot.slane %v8738_v42, 2 }
 0x4de   : >> { %v3396_v38 = vsel %vm3153_vm8, %v3388_v63, %v3287_v36  ;;  %v10340_v63 = vrot.slane %v8630_v29, 2 }
 0x4df   : >> { %v9093_v13 = vmul.f32 %v3396_v38, %v10338_v57  ;;  %3020 = vrot.lane.b32.xlu0 %v8630_v29, %s6407_s30  ;;  %3344 = vrot.lane.b32.xlu1 %v8773_v25, %s6407_s30  ;;  %v3379_v38 = vsel %vm3136_vm7, %v8885_v51, %v8681_v37  ;;  %v6187_v37 = vld [vmem:[%s8915_s23 + $0x88] sm:$0xff]   ;;  %v6189_v51 = vld [vmem:[%s8915_s23 + $0xc0] sm:$0xff]  }
 0x4e0   : >> { %5715 = vmatpush3.bf16.msra.mxu0 %v6179_v50  ;;  %v9128_v36 = vsel %vm789_vm2, %v10340_v63, %v10339_v49  ;;  %v3387_v23 = vsel %vm1039_vm6, %v3379_v38, %v3261_v34  ;;  %v6191_v49 = vld [vmem:[%s8915_s23 + $0x80] sm:$0xff]   ;;  %v10343_v38 = vrot.slane %v8738_v42, 5 }
 0x4e1   : >> { %v9105_v48 = vpop.permute.xlu0 %2868  ;;  %v3357_v56 = vpop.permute.xlu1 %3356  ;;  %5716 = vmatprep.subr.bf16.mxu0 %v6181_v19  ;;  %v10341_v19 = vrot.slane %v8738_v42, 3 }
 0x4e2   : >> { %v9110_v11 = vsel %vm3153_vm8, %v3411_v30, %v3357_v56  ;;  %v10342_v30 = vrot.slane %v8630_v29, 3 }
 0x4e3   : >> { %3266 = vrot.lane.b32.xlu0 %v8791_v10, %s6407_s30  ;;  %3272 = vrot.lane.b32.xlu1 %v8901_v6, %s6407_s30 }
 0x4e4   : >> { %5717 = vmatpush3.bf16.msra.mxu0 %v6183_v54  ;;  %v9147_v56 = vsel %vm806_vm5, %v10342_v30, %v10341_v19 }
 0x4e5   : >> { %v9118_v18 = vpop.permute.xlu0 %3234  ;;  %v9120_v32 = vpop.permute.xlu1 %3046  ;;  %5718 = vmatprep.subr.bf16.mxu0 %v6185_v8 }
 0x4e7   : >> { %3362 = vrot.lane.b32.xlu0 %v8723_v15, %s6408_s24  ;;  %2910 = vrot.lane.b32.xlu1 %v9128_v36, %s6409_s1 }
 0x4e8   : >> { %5719 = vmatpush3.bf16.msra.mxu0 %v6187_v37 }
 0x4e9   : >> { %v2909_v57 = vpop.permute.xlu0 %2908  ;;  %v3285_v50 = vpop.permute.xlu1 %3284  ;;  %5720 = vmatprep.subr.bf16.mxu0 %v6189_v51  ;;  %v9187_v51 = vld [vmem:[%s8915_s23 + $0x188] sm:$0xff]  }
 0x4ea   : >> { %v9139_v17 = vsel %vm3153_vm8, %v3387_v23, %v3285_v50  ;;  %v3168_v54 = vsel %vm3136_vm7, %v8791_v10, %v2909_v57  ;;  %v10344_v23 = vrot.slane %v8630_v29, 5 }
 0x4eb   : >> { %3290 = vrot.lane.b32.xlu0 %v8655_v43, %s6408_s24  ;;  %2942 = vrot.lane.b32.xlu1 %v9147_v56, %s6407_s30 }
 0x4ec   : >> { %v9165_v50 = vsel %vm721_vm1, %v10344_v23, %v10343_v38  ;;  %5721 = vmatpush3.bf16.msra.mxu0 %v6191_v49 }
 0x4ed   : >> { %v2941_v34 = vpop.permute.xlu0 %2940  ;;  %v2879_v8 = vpop.permute.xlu1 %2878  ;;  %5894 = vmatprep.subr.bf16.mxu0 %v9187_v51 }
 0x4ee   : >> { %v3176_v63 = vsel %vm1039_vm6, %v3168_v54, %v2941_v34 }
 0x4ef   : >> { %3246 = vrot.lane.b32.xlu0 %v8738_v42, %s6409_s1  ;;  %2974 = vrot.lane.b32.xlu1 %v9165_v50, %s6408_s24 }
 0x4f1   : >> { %v2973_v10 = vpop.permute.xlu0 %2972  ;;  %v9171_v57 = vpop.permute.xlu1 %3244 }
 0x4f2   : >> { %10345 = vst [vmem:[#allocation137_spill] sm:$0xff] %v9171_v57  ;;  %v9174_v19 = vsel %vm3153_vm8, %v3176_v63, %v2973_v10 }
 0x4f3   : >> { %2984 = vrot.lane.b32.xlu0 %v9010_v40, %s6409_s1  ;;  %3078 = vrot.lane.b32.xlu1 %v9031_v44, %s6409_s1  ;;  %v2749_v44 = vrot.slane %v8738_v42, 1 }
 0x4f5   : >> { %v3315_v30 = vpop.permute.xlu0 %3314  ;;  %v9180_v37 = vpop.permute.xlu1 %3010 }
 0x4f6   : >> { %v3406_v49 = vsel %vm3136_vm7, %v8672_v62, %v3315_v30  ;;  %v10346_v30 = vrot.slane %v8630_v29, 1 }
 0x4f7   : >> { %3076 = vrot.lane.b32.xlu0 %v9147_v56, %s6409_s1  ;;  %3316 = vrot.lane.b32.xlu1 %v9165_v50, %s6409_s1 }
 0x4f9   : >> { %v9189_v34 = vpop.permute.xlu0 %2996  ;;  %v2815_v54 = vpop.permute.xlu1 %2814 }
 0x4fa   : >> { %v3144_v38 = vsel %vm3136_vm7, %v8689_v9, %v2815_v54  ;;  %v9218_v54 = vsel %vm772_vm3, %v10346_v30, %v2749_v44 }
 0x4fb   : >> { %3100 = vrot.lane.b32.xlu0 %v9165_v50, %s6407_s30  ;;  %2998 = vrot.lane.b32.xlu1 %v9044_v52, %s6409_s1 }
 0x4fd   : >> { %v3339_v63 = vpop.permute.xlu0 %3338  ;;  %v2847_v23 = vpop.permute.xlu1 %2846 }
 0x4fe   : >> { %v9201_v10 = vsel %vm1039_vm6, %v3406_v49, %v3339_v63  ;;  %v3152_v27 = vsel %vm1039_vm6, %v3144_v38, %v2847_v23  ;;  %v3190_v63 = vsel %vm3136_vm7, %v8576_v2, %v8994_v14 }
 0x4ff   : >> { %v9206_v15 = vsel %vm3153_vm8, %v3152_v27, %v2879_v8  ;;  %3124 = vrot.lane.b32.xlu0 %v8969_v3, %s6408_s24  ;;  %3102 = vrot.lane.b32.xlu1 %v9072_v33, %s6407_s30  ;;  %v3198_v23 = vsel %vm1039_vm6, %v3190_v63, %v8636_v5 }
 0x500   : >> { %v3206_v2 = vsel %vm3153_vm8, %v3198_v23, %v8806_v41  ;;  %v10348_v41 = vld [vmem:[#allocation43_spill] sm:$0xff] }
 0x501   : >> { %v9212_v62 = vpop.permute.xlu0 %2864  ;;  %v3075_v9 = vpop.permute.xlu1 %3074 }
 0x502   : >> { %v3215_v8 = vsel %vm3136_vm7, %v8655_v43, %v3075_v9  ;;  %v3191_v43 = vsel %vm3136_vm7, %v8403_v55, %v8783_v53 }
 0x503   : >> { %3052 = vrot.lane.b32.xlu0 %v9218_v54, %s6408_s24  ;;  %3340 = vrot.lane.b32.xlu1 %v8969_v3, %s6407_s30  ;;  %v3199_v5 = vsel %vm1039_vm6, %v3191_v43, %v8697_v47  ;;  %v10349_v47 = vld [vmem:[#allocation50_spill] sm:$0xff] }
 0x505   : >> { %v2901_v27 = vpop.permute.xlu0 %2900  ;;  %v3099_v49 = vpop.permute.xlu1 %3098 }
 0x506   : >> { %v3223_v38 = vsel %vm1039_vm6, %v3215_v8, %v3099_v49  ;;  %v3164_v14 = vsel %vm3136_vm7, %v8954_v31, %v2901_v27  ;;  %v10347_v49 = vrot.slane %v8490_v16, 1 }
 0x507   : >> { %3318 = vrot.lane.b32.xlu0 %v9072_v33, %s6409_s1  ;;  %3126 = vrot.lane.b32.xlu1 %v8986_v7, %s6408_s24  ;;  %s3613_s1 = scalar_lea.vmem %s10056_s10, %s6404_s19  ;;  %s2410_s19 = sadd.s32 1, %s6404_s19  }
 0x508   : >> { %v9260_v63 = vsel %vm772_vm3, %v2749_v44, %v10347_v49  ;;  %p2407_p11 = scmp.ge.s32.totalorder %s2410_s19, 10  }
 0x509   : >> { %v2805_v30 = vpop.permute.xlu0 %2804  ;;  %v3123_v29 = vpop.permute.xlu1 %3122  ;;  %s5068_s19 = sshll.u32 (%p2407_p11), %s8195_s17, 4  ;;  %s10492_s0 = sld [smem:[#allocation141_spill]] (%p2407_p11)  ;;  %s10001_s19 = int_to_ptr.vmem [resolvable:$true] %s5068_s19 }
 0x50a   : >> { %v9240_v9 = vsel %vm3153_vm8, %v3223_v38, %v3123_v29  ;;  %v9263_v38 = vmul.f32 %v3206_v2, %v10348_v41  ;;  %v3139_v31 = vsel %vm3136_vm7, %v8857_v46, %v2805_v30  ;;  %s6411_s21 = smov (%p2407_p11), [#allocation2]  }
 0x50b   : >> { %3342 = vrot.lane.b32.xlu0 %v8986_v7, %s6407_s30  ;;  %3268 = vrot.lane.b32.xlu1 %v9218_v54, %s6407_s30  ;;  %s6276_s27 = sshll.u32 (%p2407_p11), %s6411_s21, 4  ;;  %s6277_s27 = int_to_ptr.vmem [resolvable:$false] %s6276_s27 }
 0x50c   : > { %s6278_s26 = scalar_lea.vmem (%p2407_p11), %s6277_s27, 2048  ;;  %p6279_p1 = scmp.lt.s32.totalorder (%p2407_p11), %s10001_s19, %s6277_s27 }
 0x50d   : >> { %v2933_v8 = vpop.permute.xlu0 %2932  ;;  %v3051_v53 = vpop.permute.xlu1 %3050 }
 0x50e   : >> { %v9253_v55 = vsel %vm1039_vm6, %v3164_v14, %v2933_v8  ;;  %v3207_v29 = vsel %vm3153_vm8, %v3199_v5, %v3051_v53 }
 0x50f   : >> { %v9266_v23 = vmul.f32 %v3207_v29, %v10349_v47  ;;  %3270 = vrot.lane.b32.xlu0 %v9260_v63, %s6407_s30  ;;  %3364 = vrot.lane.b32.xlu1 %v9044_v52, %s6408_s24  ;;  %s5417_s30 = sshll.u32 (%p2407_p11), %s6525_s28, 10  ;;  %s6272_s28 = scalar_lea.vmem (%p2407_p11), %s10001_s19, 1024 }
 0x510   : > { %s9999_s20 = scalar_lea.hbm (%p2407_p11), %s10492_s0, %s5417_s30  ;;  %p6273_p12 = scmp.ne.s32.totalorder (%p2407_p11), %s10001_s19, %s6272_s28 }
 0x511   : >> { %v2837_v27 = vpop.permute.xlu0 %2836  ;;  %v9274_v43 = vpop.permute.xlu1 %2898  ;;  %p6280_p2 = scmp.lt.s32.totalorder (%p2407_p11), %s6278_s26, %s6272_s28 }
 0x512   : >> { %v3147_v21 = vsel %vm1039_vm6, %v3139_v31, %v2837_v27  ;;  %v3189_v27 = vsel %vm3136_vm7, %v8511_v39, %v8996_v45  ;;  %p6274_p13 = pnand (%p2407_p11), %p6273_p12, %p6542_p5 }
 0x513   : >> { %v9281_v2 = vsel %vm3153_vm8, %v3147_v21, %v9105_v48  ;;  %3366 = vrot.lane.b32.xlu0 %v9010_v40, %s6408_s24  ;;  %3054 = vrot.lane.b32.xlu1 %v9260_v63, %s6408_s24  ;;  %v3197_v21 = vsel %vm1039_vm6, %v3189_v27, %v8707_v20  ;;  %p6281_p3 = por (%p2407_p11), %p6280_p2, %p6279_p1 }
 0x514   : >> { %v3205_v42 = vsel %vm3153_vm8, %v3197_v21, %v9120_v32  ;;  %v10350_v32 = vld [vmem:[#allocation36_spill] sm:$0xff]  ;;  %v3378_v21 = vsel %vm3136_vm7, %v8820_v59, %v9118_v18  ;;  %p6275_p0 = pneg (%p2407_p11), %p6274_p13 }
 0x515   : >> { %v9287_v5 = vpop.permute.xlu0 %2964  ;;  %v2931_v46 = vpop.permute.xlu1 %2930  ;;  %v9327_v27 = vmul.f32 %v3205_v42, %v10350_v32 }
 0x516   : > { %p6282_p4 = pnand (%p2407_p11), %p6281_p3, %p6275_p0 }
 0x517   : >> { %3294 = vrot.lane.b32.xlu0 %v9004_v26, %s6408_s24  ;;  %3292 = vrot.lane.b32.xlu1 %v9128_v36, %s6408_s24 }
 0x519   : >> { %v3065_v30 = vpop.permute.xlu0 %3064  ;;  %v2963_v14 = vpop.permute.xlu1 %2962 }
 0x51a   : >> { %v3210_v40 = vsel %vm3136_vm7, %v8814_v61, %v3065_v30 }
 0x51b   : >> { %3368 = vrot.lane.b32.xlu1 %v8820_v59, %s6408_s24 }
 0x51d   : >> { %v3089_v48 = vpop.permute.xlu0 %3088  ;;  %v9295_v8 = vpop.permute.xlu1 %2806 }
 0x51e   : >> { %v3218_v57 = vsel %vm1039_vm6, %v3210_v40, %v3089_v48  ;;  %v10353_v48 = vld [vmem:[#allocation23_spill] sm:$0xff] }
 0x51f   : >> { %3296 = vrot.lane.b32.xlu1 %v8814_v61, %s6408_s24  ;;  %v10351_v61 = vld [vmem:[#allocation29_spill] sm:$0xff] }
 0x521   : >> { %v3113_v53 = vpop.permute.xlu0 %3112  ;;  %v9299_v29 = vpop.permute.xlu1 %2838 }
 0x522   : >> { %v3226_v45 = vsel %vm3153_vm8, %v3218_v57, %v3113_v53 }
 0x525   : >> { %v9301_v49 = vpop.permute.xlu0 %3040  ;;  %v3067_v41 = vpop.permute.xlu1 %3066 }
 0x526   : >> { %v3211_v39 = vsel %vm3136_vm7, %v8757_v60, %v3067_v41 }
 0x529   : >> { %v9303_v47 = vpop.permute.xlu0 %3306  ;;  %v9305_v31 = vpop.permute.xlu1 %2986 }
 0x52d   : >> { %v2989_v44 = vpop.permute.xlu0 %2988  ;;  %v3091_v16 = vpop.permute.xlu1 %3090 }
 0x52e   : >> { %v3188_v52 = vsel %vm3136_vm7, %v8871_v58, %v2989_v44  ;;  %v3219_v58 = vsel %vm1039_vm6, %v3211_v39, %v3091_v16 }
 0x52f   : >> { %v3196_v3 = vsel %vm1039_vm6, %v3188_v52, %v8645_v1  ;;  %v10352_v52 = vld [vmem:[#allocation15_spill] sm:$0xff] }
 0x530   : >> { %v3204_v20 = vsel %vm3153_vm8, %v3196_v3, %v8961_v28  ;;  %v3429_v57 = vmul.f32 %v3226_v45, %v10352_v52 }
 0x531   : >> { %v9330_v30 = vmul.f32 %v3204_v20, %v10351_v61  ;;  %v9333_v40 = vpop.permute.xlu0 %3330  ;;  %v3115_v44 = vpop.permute.xlu1 %3114  ;;  %v10354_v61 = vld [vmem:[#allocation24_spill] sm:$0xff] }
 0x532   : >> { %v3227_v1 = vsel %vm3153_vm8, %v3219_v58, %v3115_v44  ;;  %v9351_v58 = vmul.f32 %v9139_v17, %v10354_v61  ;;  %v10355_v44 = vld [vmem:[#allocation16_spill] sm:$0xff] }
 0x533   : >> { %v3436_v28 = vmul.f32 %v3227_v1, %v10353_v48  ;;  %v3491_v60 = vpack.c.bf16 %v9327_v27, %v9330_v30 }
 0x535   : >> { %v3259_v3 = vpop.permute.xlu0 %3258  ;;  %v9340_v42 = vpop.permute.xlu1 %3042  ;;  %v3485_v53 = vpack.c.bf16 %v3436_v28, %v3429_v57 }
 0x536   : >> { %v3386_v20 = vsel %vm1039_vm6, %v3378_v21, %v3259_v3  ;;  %v3163_v21 = vsel %vm3136_vm7, %v8901_v6, %v9274_v43 }
 0x537   : >> { %4030 = vmatprep.mubr.bf16.mxu0 %v3485_v53 }
 0x539   : >> { %v9342_v41 = vpop.permute.xlu0 %3354  ;;  %v2801_v16 = vpop.permute.xlu1 %2800 }
 0x53a   : >> { %v3137_v53 = vsel %vm3136_vm7, %v9165_v50, %v2801_v16  ;;  %v3180_v50 = vsel %vm3153_vm8, %v9253_v55, %v9287_v5  ;;  %v10358_v5 = vld [vmem:[#allocation12_spill] sm:$0xff] }
 0x53d   : >> { %v3283_v45 = vpop.permute.xlu0 %3282  ;;  %v2803_v39 = vpop.permute.xlu1 %2802 }
 0x53e   : >> { %v3394_v32 = vsel %vm3153_vm8, %v3386_v20, %v3283_v45  ;;  %v3138_v18 = vsel %vm3136_vm7, %v9072_v33, %v2803_v39  ;;  %v3165_v33 = vsel %vm3136_vm7, %v8383_v24, %v8895_v35  ;;  %v10357_v35 = vld [vmem:[#allocation128_spill] sm:$0xff] }
 0x53f   : >> { %v9354_v1 = vmul.f32 %v3394_v32, %v10355_v44  ;;  %v3171_v32 = vsel %vm1039_vm6, %v3163_v21, %v2931_v46  ;;  %v3173_v43 = vsel %vm1039_vm6, %v3165_v33, %v8910_v12  ;;  %v10356_v46 = vld [vmem:[#allocation124_spill] sm:$0xff]  ;;  %v10360_v12 = vld [vmem:[#allocation119_spill] sm:$0xff] }
 0x540   : >> { %v3179_v16 = vsel %vm3153_vm8, %v3171_v32, %v2963_v14  ;;  %v3181_v55 = vsel %vm3153_vm8, %v3173_v43, %v10357_v35  ;;  %v10364_v33 = vld [vmem:[#allocation35_spill] sm:$0xff] }
 0x541   : >> { %v3486_v52 = vpack.c.bf16 %v9351_v58, %v9354_v1  ;;  %v2897_v57 = vpop.permute.xlu0 %2896  ;;  %v2835_v48 = vpop.permute.xlu1 %2834 }
 0x542   : >> { %v3146_v20 = vsel %vm1039_vm6, %v3138_v18, %v2835_v48  ;;  %v3162_v6 = vsel %vm3136_vm7, %v9260_v63, %v2897_v57  ;;  %v10359_v57 = vld [vmem:[#allocation28_spill] sm:$0xff]  ;;  %v3140_v18 = vsel %vm3136_vm7, %v10360_v12, %v9295_v8  ;;  %v10370_v12 = vld [vmem:[#allocation90_spill] sm:$0xff] }
 0x543   : >> { %v3155_v39 = vsel %vm3153_vm8, %v3146_v20, %v10356_v46  ;;  %v3441_v48 = vmul.f32 %v3180_v50, %v10359_v57  ;;  %v3148_v20 = vsel %vm1039_vm6, %v3140_v18, %v9299_v29  ;;  %v6170_v46 = vld [vmem:[%s8915_s23 + $0x138] sm:$0xff]   ;;  %v10369_v57 = vld [vmem:[#allocation106_spill] sm:$0xff] }
 0x544   : >> { %v3167_v18 = vsel %vm3136_vm7, %v10370_v12, %v10369_v57  ;;  %v10380_v57 = vld [vmem:[#allocation49_spill] sm:$0xff] }
 0x545   : >> { %v2929_v28 = vpop.permute.xlu0 %2928  ;;  %v9358_v59 = vpop.permute.xlu1 %3022 }
 0x549   : >> { %v2833_v3 = vpop.permute.xlu0 %2832  ;;  %v9364_v17 = vpop.permute.xlu1 %3320 }
 0x54a   : >> { %v3145_v45 = vsel %vm1039_vm6, %v3137_v53, %v2833_v3  ;;  %v10361_v3 = vld [vmem:[#allocation13_spill] sm:$0xff]  ;;  %v10362_v53 = vld [vmem:[#allocation20_spill] sm:$0xff] }
 0x54b   : >> { %v3154_v61 = vsel %vm3153_vm8, %v3145_v45, %v9212_v62  ;;  %v3170_v62 = vsel %vm1039_vm6, %v3162_v6, %v2929_v28  ;;  %v3434_v21 = vmul.f32 %v3179_v16, %v10362_v53  ;;  %v10363_v45 = vld [vmem:[#allocation19_spill] sm:$0xff]  ;;  %v3448_v6 = vmul.f32 %v3181_v55, %v10364_v33  ;;  %v6172_v16 = vld [vmem:[%s8915_s23 + $0x170] sm:$0xff]   ;;  %v10372_v53 = vld [vmem:[#allocation109_spill] sm:$0xff] }
 0x54c   : >> { %v3426_v14 = vmul.f32 %v3154_v61, %v10358_v5  ;;  %v3433_v32 = vmul.f32 %v3155_v39, %v10363_v45  ;;  %v10367_v5 = vld [vmem:[#allocation123_spill] sm:$0xff]  ;;  %v10374_v33 = vld [vmem:[#allocation34_spill] sm:$0xff] }
 0x54d   : >> { %v2961_v44 = vpop.permute.xlu0 %2960  ;;  %v9388_v24 = vpop.permute.xlu1 %3248  ;;  %v3490_v55 = vpack.c.bf16 %v3448_v6, %v3441_v48  ;;  %v10373_v48 = vld [vmem:[#allocation111_spill] sm:$0xff] }
 0x54e   : >> { %v3178_v63 = vsel %vm3153_vm8, %v3170_v62, %v2961_v44  ;;  %v10365_v62 = vld [vmem:[#allocation120_spill] sm:$0xff]  ;;  %v10366_v44 = vld [vmem:[#allocation95_spill] sm:$0xff]  ;;  %v3482_v35 = vpack.c.bf16 %v3433_v32, %v3426_v14  ;;  %v3175_v14 = vsel %vm1039_vm6, %v3167_v18, %v10372_v53  ;;  %v10381_v18 = vld [vmem:[#allocation122_spill] sm:$0xff] }
 0x54f   : >> { %v3427_v28 = vmul.f32 %v3178_v63, %v10361_v3  ;;  %v3166_v8 = vsel %vm3136_vm7, %v10366_v44, %v10365_v62  ;;  %v10368_v63 = vld [vmem:[#allocation100_spill] sm:$0xff]  ;;  %v10371_v3 = vld [vmem:[#allocation126_spill] sm:$0xff]  ;;  %v3183_v32 = vsel %vm3153_vm8, %v3175_v14, %v10373_v48  ;;  %v6178_v53 = vld [vmem:[%s8915_s23 + $0x128] sm:$0xff]  }
 0x550   : >> { %v3174_v29 = vsel %vm1039_vm6, %v3166_v8, %v10367_v5  ;;  %v3157_v39 = vsel %vm3153_vm8, %v3148_v20, %v10368_v63  ;;  %v6174_v20 = vld [vmem:[%s8915_s23 + $0x130] sm:$0xff]   ;;  %v10379_v63 = vld [vmem:[#allocation27_spill] sm:$0xff]  ;;  %v3462_v12 = vmul.f32 %v3183_v32, %v10380_v57  ;;  %v10383_v14 = vld [vmem:[#allocation125_spill] sm:$0xff] }
 0x551   : >> { %v9404_v61 = vpop.permute.xlu0 %3020  ;;  %v9406_v43 = vpop.permute.xlu1 %3344  ;;  %v3483_v50 = vpack.c.bf16 %v3434_v21, %v3427_v28  ;;  %v3182_v28 = vsel %vm3153_vm8, %v3174_v29, %v10371_v3  ;;  %v3447_v6 = vmul.f32 %v3157_v39, %v10374_v33  ;;  %v10375_v62 = vld [vmem:[#allocation42_spill] sm:$0xff]  ;;  %v10378_v29 = vld [vmem:[#allocation132_spill] sm:$0xff] }
 0x552   : >> { %v3455_v44 = vmul.f32 %v3182_v28, %v10375_v62  ;;  %v10376_v8 = vld [vmem:[#allocation130_spill] sm:$0xff]  ;;  %v6180_v62 = vld [vmem:[%s8915_s23 + $0x160] sm:$0xff]  }
 0x553   : >> { %3965 = vmatprep.mubr.bf16.mxu1 %v3483_v50  ;;  %v6176_v50 = vld [vmem:[%s8915_s23 + $0x168] sm:$0xff]   ;;  %v10382_v3 = vld [vmem:[#allocation94_spill] sm:$0xff]  ;;  %v10386_v57 = vld [vmem:[#allocation48_spill] sm:$0xff] }
 0x554   : >> { %3966 = vmatmul.mubr.bf16.vlgmr.msra.gmra.mxu1 %v3482_v35  ;;  %v10377_v35 = vld [vmem:[#allocation93_spill] sm:$0xff]  ;;  %v3141_v39 = vsel %vm3136_vm7, %v10382_v3, %v10381_v18 }
 0x555   : >> { %v9424_v21 = vpop.permute.xlu0 %3266  ;;  %3973 = vmatprep.mubr.bf16.mxu1 %v3490_v55  ;;  %5747 = vmatpush3.bf16.msra.mxu1 %v6170_v46  ;;  %v9426_v45 = vpop.permute.xlu1 %3272  ;;  %v3142_v5 = vsel %vm3136_vm7, %v10377_v35, %v10376_v8  ;;  %v3440_v55 = vmul.f32 %v9281_v2, %v10379_v63  ;;  %v3149_v48 = vsel %vm1039_vm6, %v3141_v39, %v10383_v14  ;;  %v10384_v2 = vld [vmem:[#allocation98_spill] sm:$0xff]  ;;  %v6182_v63 = vld [vmem:[%s8915_s23 + $0x120] sm:$0xff]  }
 0x556   : >> { %5748 = vmatprep.subr.bf16.mxu1 %v6172_v16  ;;  %v3150_v46 = vsel %vm1039_vm6, %v3142_v5, %v10378_v29  ;;  %v3497_v8 = vpack.c.bf16 %v3462_v12, %v3455_v44  ;;  %v10385_v35 = vld [vmem:[#allocation102_spill] sm:$0xff]  ;;  %v10390_v39 = vld [vmem:[#allocation108_spill] sm:$0xff] }
 0x557   : >> { %v3489_v33 = vpack.c.bf16 %v3447_v6, %v3440_v55  ;;  %v3159_v32 = vsel %vm3153_vm8, %v3150_v46, %v10384_v2  ;;  %v3158_v5 = vsel %vm3153_vm8, %v3149_v48, %v10385_v35  ;;  %v6184_v6 = vld [vmem:[%s8915_s23 + $0x158] sm:$0xff]   ;;  %v10388_v55 = vld [vmem:[#allocation89_spill] sm:$0xff]  ;;  %v3187_v2 = vsel %vm3136_vm7, %v8773_v25, %v9305_v31 }
 0x558   : >> { %v3461_v18 = vmul.f32 %v3159_v32, %v10386_v57  ;;  %v10389_v46 = vld [vmem:[#allocation41_spill] sm:$0xff]  ;;  %v10395_v31 = vld [vmem:[#allocation127_spill] sm:$0xff] }
 0x559   : >> { %v9445_v16 = vpop.permute.xlu0 %3362  ;;  %5749 = vmatpush3.bf16.msra.mxu1 %v6174_v20  ;;  %v2911_v28 = vpop.permute.xlu1 %2910  ;;  %v3454_v12 = vmul.f32 %v3158_v5, %v10389_v46  ;;  %v10392_v5 = vld [vmem:[#allocation115_spill] sm:$0xff] }
 0x55a   : >> { %5750 = vmatprep.subr.bf16.mxu1 %v6176_v50  ;;  %v10387_v50 = vld [vmem:[#allocation105_spill] sm:$0xff]  ;;  %v3169_v3 = vsel %vm3136_vm7, %v9218_v54, %v2911_v28  ;;  %v6188_v54 = vld [vmem:[%s8915_s23 + $0x150] sm:$0xff]  }
 0x55b   : >> { %v3143_v44 = vsel %vm3136_vm7, %v10388_v55, %v10387_v50  ;;  %v10391_v28 = vld [vmem:[#allocation57_spill] sm:$0xff]  ;;  %v10394_v50 = vld [vmem:[#allocation99_spill] sm:$0xff] }
 0x55c   : >> { %3974 = vmatmul.mubr.bf16.gmra.mxu1 %v3489_v33  ;;  %v3151_v14 = vsel %vm1039_vm6, %v3143_v44, %v10390_v39  ;;  %v3469_v35 = vmul.f32 %v9174_v19, %v10391_v28  ;;  %v3195_v19 = vsel %vm1039_vm6, %v3187_v2, %v9180_v37  ;;  %v10397_v39 = vld [vmem:[#allocation129_spill] sm:$0xff]  ;;  %v10401_v28 = vld [vmem:[#allocation56_spill] sm:$0xff] }
 0x55d   : >> { %v9455_v29 = vpop.permute.xlu0 %3290  ;;  %3981 = vmatprep.mubr.bf16.mxu1 %v3497_v8  ;;  %5751 = vmatpush3.bf16.msra.mxu1 %v6178_v53  ;;  %v2943_v20 = vpop.permute.xlu1 %2942  ;;  %v3496_v8 = vpack.c.bf16 %v3461_v18, %v3454_v12  ;;  %v3160_v55 = vsel %vm3153_vm8, %v3151_v14, %v10394_v50  ;;  %v10396_v18 = vld [vmem:[#allocation92_spill] sm:$0xff]  ;;  %v10398_v14 = vld [vmem:[#allocation63_spill] sm:$0xff] }
 0x55e   : >> { %5752 = vmatprep.subr.bf16.mxu1 %v6180_v62  ;;  %v3177_v53 = vsel %vm1039_vm6, %v3169_v3, %v2943_v20  ;;  %v6186_v62 = vld [vmem:[%s8915_s23 + $0x118] sm:$0xff]   ;;  %v3402_v20 = vsel %vm3136_vm7, %v10392_v5, %v9303_v47  ;;  %v6190_v3 = vld [vmem:[%s8915_s23 + $0x110] sm:$0xff]  }
 0x55f   : >> { %v3410_v25 = vsel %vm1039_vm6, %v3402_v20, %v9333_v40 }
 0x560   : >> { %v3418_v47 = vsel %vm3153_vm8, %v3410_v25, %v9342_v41  ;;  %v6192_v41 = vld [vmem:[%s8915_s23 + $0x148] sm:$0xff]  }
 0x561   : >> { %v9469_v48 = vpop.permute.xlu0 %3246  ;;  %5753 = vmatpush3.bf16.msra.mxu1 %v6182_v63  ;;  %v2975_v33 = vpop.permute.xlu1 %2974  ;;  %v10393_v63 = vld [vmem:[#allocation64_spill] sm:$0xff] }
 0x562   : >> { %v3185_v32 = vsel %vm3153_vm8, %v3177_v53, %v2975_v33  ;;  %5754 = vmatprep.subr.bf16.mxu1 %v6184_v6  ;;  %v3212_v6 = vsel %vm3136_vm7, %v10396_v18, %v10395_v31  ;;  %v3475_v53 = vmul.f32 %v9206_v15, %v10398_v14  ;;  %v3203_v33 = vsel %vm3153_vm8, %v3195_v19, %v9340_v42  ;;  %v10402_v15 = vld [vmem:[#allocation37_spill] sm:$0xff] }
 0x563   : >> { %v3476_v57 = vmul.f32 %v3185_v32, %v10393_v63  ;;  %v3220_v40 = vsel %vm1039_vm6, %v3212_v6, %v10397_v39  ;;  %v10400_v32 = vld [vmem:[#allocation117_spill] sm:$0xff]  ;;  %v3450_v5 = vmul.f32 %v9064_v4, %v10402_v15  ;;  %v10406_v6 = vld [vmem:[#allocation30_spill] sm:$0xff]  ;;  %v10409_v39 = vld [vmem:[#allocation84_spill] sm:$0xff] }
 0x564   : >> { %3982 = vmatmul.mubr.bf16.gmra.mxu1 %v3496_v8  ;;  %v10403_v42 = vld [vmem:[#allocation17_spill] sm:$0xff] }
 0x565   : >> { %v2985_v44 = vpop.permute.xlu0 %2984  ;;  %5755 = vmatpush3.bf16.msra.mxu1 %v6186_v62  ;;  %v9494_v46 = vpop.permute.xlu1 %3078  ;;  %v3504_v12 = vpack.c.bf16 %v3476_v57, %v3469_v35  ;;  %v10399_v62 = vld [vmem:[#allocation131_spill] sm:$0xff]  ;;  %v3468_v35 = vmul.f32 %v3160_v55, %v10401_v28  ;;  %v3431_v20 = vmul.f32 %v3418_v47, %v10403_v42  ;;  %v10405_v57 = vld [vmem:[#allocation14_spill] sm:$0xff]  ;;  %v6193_v18 = vld [vmem:[%s8915_s23 + $0x108] sm:$0xff]  }
 0x566   : >> { %v3186_v37 = vsel %vm3136_vm7, %v8986_v7, %v2985_v44  ;;  %5756 = vmatprep.subr.bf16.mxu1 %v6188_v54  ;;  %v3228_v2 = vsel %vm3153_vm8, %v3220_v40, %v10399_v62  ;;  %v10404_v54 = vld [vmem:[#allocation22_spill] sm:$0xff]  ;;  %v10407_v19 = vld [vmem:[#allocation25_spill] sm:$0xff]  ;;  %v10413_v28 = vld [vmem:[#allocation112_spill] sm:$0xff]  ;;  %v3217_v1 = vsel %vm3136_vm7, %v9004_v26, %v9494_v46 }
 0x567   : >> { %v3194_v8 = vsel %vm1039_vm6, %v3186_v37, %v10400_v32  ;;  %3989 = vmatprep.mubr.bf16.mxu1 %v3504_v12  ;;  %v3435_v63 = vmul.f32 %v3203_v33, %v10404_v54  ;;  %v3443_v55 = vmul.f32 %v3228_v2, %v10406_v6  ;;  %v3438_v4 = vmul.f32 %v9110_v11, %v10407_v19  ;;  %v10408_v12 = vld [vmem:[#allocation113_spill] sm:$0xff]  ;;  %v6197_v33 = vld [vmem:[%s8915_s23 + $0x180] sm:$0xff]   ;;  %v10410_v37 = vld [vmem:[#allocation110_spill] sm:$0xff] }
 0x568   : >> { %v3202_v7 = vsel %vm3153_vm8, %v3194_v8, %v9301_v49  ;;  %v3503_v47 = vpack.c.bf16 %v3475_v53, %v3468_v35  ;;  %v6194_v49 = vld [vmem:[%s8915_s23 + $0x140] sm:$0xff]   ;;  %v3405_v40 = vsel %vm3136_vm7, %v10409_v39, %v10408_v12  ;;  %v10411_v62 = vld [vmem:[#allocation82_spill] sm:$0xff]  ;;  %v10414_v15 = vld [vmem:[#allocation121_spill] sm:$0xff] }
 0x569   : >> { %v3428_v50 = vmul.f32 %v3202_v7, %v10405_v57  ;;  %v3077_v25 = vpop.permute.xlu0 %3076  ;;  %5757 = vmatpush3.bf16.msra.mxu1 %v6190_v3  ;;  %v9518_v31 = vpop.permute.xlu1 %3316  ;;  %v3487_v14 = vpack.c.bf16 %v3438_v4, %v3431_v20  ;;  %v3492_v3 = vpack.c.bf16 %v3450_v5, %v3443_v55  ;;  %v3214_v2 = vsel %vm3136_vm7, %v10411_v62, %v10410_v37  ;;  %v10412_v32 = vld [vmem:[#allocation116_spill] sm:$0xff]  ;;  %v10415_v5 = vld [vmem:[#allocation114_spill] sm:$0xff] }
 0x56a   : >> { %5758 = vmatprep.subr.bf16.mxu1 %v6192_v41  ;;  %v3413_v11 = vsel %vm1039_vm6, %v3405_v40, %v10412_v32  ;;  %v6195_v41 = vld [vmem:[%s8915_s23 + $0x100] sm:$0xff]   ;;  %v3222_v35 = vsel %vm1039_vm6, %v3214_v2, %v10413_v28  ;;  %v10421_v39 = vld [vmem:[#allocation66_spill] sm:$0xff]  ;;  %v10422_v40 = vpack.c.bf16 %v9090_v22, %v9093_v13  ;;  %v3407_v37 = vsel %vm3136_vm7, %v9147_v56, %v9518_v31  ;;  %v10424_v2 = vld [vmem:[#allocation103_spill] sm:$0xff] }
 0x56b   : >> { %v3484_v44 = vpack.c.bf16 %v3435_v63, %v3428_v50  ;;  %v3421_v42 = vsel %vm3153_vm8, %v3413_v11, %v10414_v15  ;;  %v3230_v20 = vsel %vm3153_vm8, %v3222_v35, %v10415_v5  ;;  %v10416_v7 = vld [vmem:[#allocation32_spill] sm:$0xff]  ;;  %v10417_v63 = vld [vmem:[#allocation51_spill] sm:$0xff] }
 0x56c   : >> { %3990 = vmatmul.mubr.bf16.gmra.mxu1 %v3503_v47  ;;  %v3445_v54 = vmul.f32 %v9061_v0, %v10416_v7  ;;  %v3464_v57 = vmul.f32 %v9240_v9, %v10417_v63  ;;  %v10418_v50 = vld [vmem:[#allocation39_spill] sm:$0xff]  ;;  %v10419_v19 = vld [vmem:[#allocation44_spill] sm:$0xff]  ;;  %v10431_v63 = vld [vmem:[#allocation65_spill] sm:$0xff] }
 0x56d   : >> { %v3101_v8 = vpop.permute.xlu0 %3100  ;;  %4031 = vmatmul.mubr.bf16.vlgmr.msra.gmra.mxu0 %v3484_v44  ;;  %5759 = vmatpush3.bf16.msra.mxu1 %v6193_v18  ;;  %v2999_v53 = vpop.permute.xlu1 %2998  ;;  %v3452_v18 = vmul.f32 %v3421_v42, %v10418_v50  ;;  %v3457_v4 = vmul.f32 %v3230_v20, %v10419_v19  ;;  %v10429_v42 = vld [vmem:[#allocation83_spill] sm:$0xff]  ;;  %v10430_v20 = vld [vmem:[#allocation58_spill] sm:$0xff]  ;;  %v10432_v50 = vld [vmem:[#allocation137_spill] sm:$0xff] }
 0x56e   : >> { %4095 = vmatprep.mubr.bf16.mxu1 %v3487_v14  ;;  %4038 = vmatprep.mubr.bf16.mxu0 %v3492_v3  ;;  %v10423_v3 = vpack.c.bf16 %v9266_v23, %v9263_v38  ;;  %v3192_v38 = vsel %vm3136_vm7, %v10424_v2, %v9189_v34  ;;  %v10425_v23 = vld [vmem:[#allocation133_spill] sm:$0xff] }
 0x56f   : >> { %5760 = vmatprep.subr.bf16.mxu1 %v6194_v49  ;;  %5895 = vmatpush3.bf16.msra.mxu0 %v9187_v51  ;;  %v3494_v47 = vpack.c.bf16 %v3452_v18, %v3445_v54  ;;  %v3499_v0 = vpack.c.bf16 %v3464_v57, %v3457_v4  ;;  %v3216_v49 = vsel %vm3136_vm7, %v9128_v36, %v3077_v25  ;;  %v10420_v36 = vld [vmem:[#allocation59_spill] sm:$0xff]  ;;  %v10428_v34 = vld [vmem:[#allocation101_spill] sm:$0xff]  ;;  %v10433_v18 = vld [vmem:[#allocation104_spill] sm:$0xff] }
 0x570   : >> { %5896 = vmatprep.subr.bf16.mxu0 %v6197_v33  ;;  %v3224_v12 = vsel %vm1039_vm6, %v3216_v49, %v3101_v8  ;;  %v3193_v32 = vsel %vm3136_vm7, %v10425_v23, %v2999_v53  ;;  %v3382_v53 = vsel %vm3136_vm7, %v10429_v42, %v10428_v34  ;;  %v10454_v42 = vld [vmem:[#allocation69_spill] sm:$0xff] }
 0x571   : >> { %v3125_v6 = vpop.permute.xlu0 %3124  ;;  %5761 = vmatpush3.bf16.msra.mxu1 %v6195_v41  ;;  %v3103_v55 = vpop.permute.xlu1 %3102  ;;  %v10427_v41 = vld [vmem:[#allocation54_spill] sm:$0xff]  ;;  %v3201_v28 = vsel %vm1039_vm6, %v3193_v32, %v9358_v59  ;;  %v10446_v32 = vld [vmem:[#allocation107_spill] sm:$0xff] }
 0x572   : >> { %5918 = vmatprep.subr.bf16.mxu1 %v9187_v51  ;;  %v3232_v58 = vsel %vm3153_vm8, %v3224_v12, %v3125_v6  ;;  %v3225_v27 = vsel %vm1039_vm6, %v3217_v1, %v3103_v55  ;;  %v3383_v6 = vsel %vm3136_vm7, %v10433_v18, %v10432_v50  ;;  %v10436_v12 = vld [vmem:[#allocation53_spill] sm:$0xff] }
 0x573   : >> { %5897 = vmatpush3.bf16.msra.mxu0 %v6197_v33  ;;  %v3471_v25 = vmul.f32 %v3232_v58, %v10420_v36 }
 0x574   : >> { %4096 = vmatmul.mubr.bf16.vlgmr.msra.gmra.mxu1 %v3486_v52 }
 0x575   : >> { %v3053_v44 = vpop.permute.xlu0 %3052  ;;  %4039 = vmatmul.mubr.bf16.gmra.mxu0 %v3491_v60  ;;  %4103 = vmatprep.mubr.bf16.mxu1 %v3494_v47  ;;  %v3341_v9 = vpop.permute.xlu1 %3340  ;;  %v10434_v47 = vld [vmem:[#allocation135_spill] sm:$0xff] }
 0x576   : >> { %4046 = vmatprep.mubr.bf16.mxu0 %v3499_v0  ;;  %5920 = vmatpush3.bf16.msra.mxu1 %v9187_v51  ;;  %v3415_v62 = vsel %vm1039_vm6, %v3407_v37, %v3341_v9 }
 0x577   : >> { %5919 = vmatprep.subr.bf16.mxu1 %v6197_v33 }
 0x579   : >> { %v3319_v30 = vpop.permute.xlu0 %3318  ;;  %v3127_v60 = vpop.permute.xlu1 %3126 }
 0x57a   : >> { %v3233_v52 = vsel %vm3153_vm8, %v3225_v27, %v3127_v60  ;;  %5921 = vmatpush3.bf16.msra.mxu1 %v6197_v33  ;;  %v3422_v33 = vsel %vm3153_vm8, %v9201_v10, %v9445_v16  ;;  %v3200_v10 = vsel %vm1039_vm6, %v3192_v38, %v9404_v61  ;;  %v10426_v16 = vld [vmem:[#allocation46_spill] sm:$0xff]  ;;  %v3390_v61 = vsel %vm1039_vm6, %v3382_v53, %v9424_v21  ;;  %v10455_v53 = vld [vmem:[#allocation96_spill] sm:$0xff] }
 0x57b   : >> { %v3478_v51 = vmul.f32 %v3233_v52, %v10421_v39  ;;  %v3459_v8 = vmul.f32 %v3422_v33, %v10426_v16  ;;  %v3208_v31 = vsel %vm3153_vm8, %v3200_v10, %v3053_v44  ;;  %v3398_v59 = vsel %vm3153_vm8, %v3390_v61, %v9455_v29  ;;  %v10435_v44 = vld [vmem:[#allocation45_spill] sm:$0xff]  ;;  %v10437_v29 = vld [vmem:[#allocation118_spill] sm:$0xff]  ;;  %v10443_v33 = vld [vmem:[#allocation68_spill] sm:$0xff] }
 0x57c   : >> { %4104 = vmatmul.mubr.bf16.gmra.mxu1 %v10422_v40  ;;  %v3470_v7 = vmul.f32 %v3208_v31, %v10430_v20  ;;  %v3408_v21 = vsel %vm3136_vm7, %v10434_v47, %v3319_v30  ;;  %v3458_v9 = vmul.f32 %v3398_v59, %v10435_v44  ;;  %v3409_v1 = vsel %vm3136_vm7, %v10437_v29, %v9364_v17  ;;  %v10438_v60 = vld [vmem:[#allocation86_spill] sm:$0xff]  ;;  %v10439_v52 = vld [vmem:[#allocation85_spill] sm:$0xff]  ;;  %v10441_v40 = vld [vmem:[#allocation136_spill] sm:$0xff] }
 0x57d   : >> { %v3343_v14 = vpop.permute.xlu0 %3342  ;;  %4047 = vmatmul.mubr.bf16.gmra.mxu0 %v10423_v3  ;;  %v3269_v26 = vpop.permute.xlu1 %3268  ;;  %v3506_v46 = vpack.c.bf16 %v3478_v51, %v3471_v25  ;;  %v10440_v36 = vpack.c.bf16 %v10438_v60, %v10439_v52  ;;  %v3417_v30 = vsel %vm1039_vm6, %v3409_v1, %v9406_v43  ;;  %v10447_v10 = vld [vmem:[#allocation60_spill] sm:$0xff]  ;;  %v10456_v61 = vld [vmem:[#allocation62_spill] sm:$0xff]  ;;  %v10457_v20 = vld [vmem:[#allocation91_spill] sm:$0xff] }
 0x57e   : >> { %v3391_v55 = vsel %vm1039_vm6, %v3383_v6, %v3269_v26  ;;  %v3416_v49 = vsel %vm1039_vm6, %v3408_v21, %v3343_v14  ;;  %v3384_v14 = vsel %vm3136_vm7, %v10441_v40, %v9469_v48  ;;  %v10442_v26 = vld [vmem:[#allocation61_spill] sm:$0xff] }
 0x57f   : >> { %4054 = vmatprep.mubr.bf16.mxu0 %v3506_v46 }
 0x581   : >> { %v3271_v22 = vpop.permute.xlu0 %3270  ;;  %v3365_v13 = vpop.permute.xlu1 %3364 }
 0x582   : >> { %v3423_v11 = vsel %vm3153_vm8, %v3415_v62, %v3365_v13  ;;  %v3392_v17 = vsel %vm1039_vm6, %v3384_v14, %v3271_v22  ;;  %v10444_v62 = vld [vmem:[#allocation134_spill] sm:$0xff]  ;;  %v10445_v22 = vld [vmem:[#allocation55_spill] sm:$0xff] }
 0x583   : >> { %v3466_v56 = vmul.f32 %v3423_v11, %v10427_v41  ;;  %v3385_v43 = vsel %vm3136_vm7, %v10444_v62, %v9388_v24  ;;  %v3467_v11 = vmul.f32 %v10446_v32, %v10445_v22  ;;  %v10450_v24 = vld [vmem:[#allocation87_spill] sm:$0xff] }
 0x584   : >> { %v3393_v2 = vsel %vm1039_vm6, %v3385_v43, %v9426_v45  ;;  %v10453_v45 = vld [vmem:[#allocation97_spill] sm:$0xff] }
 0x585   : >> { %v3055_v35 = vpop.permute.xlu1 %3054  ;;  %v3501_v15 = vpack.c.bf16 %v3466_v56, %v3459_v8  ;;  %v3367_v54 = vpop.permute.xlu0 %3366  ;;  %v10448_v8 = vld [vmem:[#allocation67_spill] sm:$0xff]  ;;  %v10449_v56 = vld [vmem:[#allocation88_spill] sm:$0xff] }
 0x586   : >> { %v3209_v5 = vsel %vm3153_vm8, %v3201_v28, %v3055_v35  ;;  %v3424_v27 = vsel %vm3153_vm8, %v3416_v49, %v3367_v54  ;;  %v10451_v31 = vpack.c.bf16 %v10449_v56, %v10450_v24  ;;  %v10452_v28 = vld [vmem:[#allocation47_spill] sm:$0xff] }
 0x587   : >> { %v3477_v57 = vmul.f32 %v3209_v5, %v10431_v63  ;;  %4111 = vmatprep.mubr.bf16.mxu1 %v3501_v15  ;;  %v3473_v46 = vmul.f32 %v3424_v27, %v10442_v26  ;;  %v3460_v35 = vmul.f32 %v10453_v45, %v10452_v28  ;;  %v3481_v5 = vmul.f32 %v10455_v53, %v10454_v42  ;;  %v6198_v63 = vld [vmem:[%s4207_s29 + $0x8] sm:$0xff]  }
 0x588   : >> { %5906 = vmatprep.subr.bf16.mxu0 %v6198_v63 }
 0x589   : >> { %v3293_v19 = vpop.permute.xlu1 %3292  ;;  %v3505_v4 = vpack.c.bf16 %v3477_v57, %v3470_v7  ;;  %v3295_v25 = vpop.permute.xlu0 %3294  ;;  %v3502_v34 = vpack.c.bf16 %v3467_v11, %v3460_v35  ;;  %v3474_v7 = vmul.f32 %v10457_v20, %v10456_v61  ;;  %v6199_v57 = vld [vmem:[%s4207_s29] sm:$0xff]  }
 0x58a   : >> { %v3399_v0 = vsel %vm3153_vm8, %v3391_v55, %v3293_v19  ;;  %v3400_v13 = vsel %vm3153_vm8, %v3392_v17, %v3295_v25 }
 0x58b   : >> { %v3465_v58 = vmul.f32 %v3399_v0, %v10436_v12  ;;  %4055 = vmatmul.mubr.bf16.gmra.mxu0 %v3505_v4  ;;  %v3472_v16 = vmul.f32 %v3400_v13, %v10447_v10  ;;  %v3509_v54 = vpack.c.bf16 %v3481_v5, %v3474_v7 }
 0x58c   : >> { %5898 = vmatprep.mubr.msk.bf16.mxu0 %vm3136_vm7, %v10440_v36 }
 0x58d   : >> { %v3369_v39 = vpop.permute.xlu1 %3368  ;;  %v3500_v51 = vpack.c.bf16 %v3465_v58, %v3458_v9 }
 0x58e   : >> { %v3425_v3 = vsel %vm3153_vm8, %v3417_v30, %v3369_v39 }
 0x58f   : >> { %v3480_v37 = vmul.f32 %v3425_v3, %v10443_v33  ;;  %4112 = vmatmul.mubr.bf16.gmra.mxu1 %v3500_v51 }
 0x591   : >> { %v3297_v38 = vpop.permute.xlu1 %3296  ;;  %v3508_v48 = vpack.c.bf16 %v3480_v37, %v3473_v46 }
 0x592   : >> { %v3401_v23 = vsel %vm3153_vm8, %v3393_v2, %v3297_v38 }
 0x593   : >> { %v3479_v41 = vmul.f32 %v3401_v23, %v10448_v8  ;;  %4119 = vmatprep.mubr.bf16.mxu1 %v3508_v48  ;;  %5899 = vmatmul.mubr.msk.bf16.vlgmr.msra.gmra.mxu0 %vm3136_vm7, %v10451_v31  ;;  %v9675_v23 = vld [vmem:[%s3613_s1] ss:$0 sm:$0xff] }
 0x594   : >> { %5907 = vmatpush3.bf16.msra.mxu0 %v6198_v63 }
 0x595   : >> { %v3507_v15 = vpack.c.bf16 %v3479_v41, %v3472_v16  ;;  %5908 = vmatprep.subr.bf16.mxu0 %v6199_v57 }
 0x597   : >> { %4120 = vmatmul.mubr.bf16.gmra.mxu1 %v3507_v15 }
 0x598   : >> { %5902 = vmatprep.mubr.msk.bf16.mxu1 %vm3136_vm7, %v3502_v34  ;;  %5909 = vmatpush3.bf16.msra.mxu0 %v6199_v57 }
 0x59f   : >> { %5903 = vmatmul.mubr.msk.bf16.vlgmr.msra.gmra.mxu1 %vm3136_vm7, %v3509_v54 }
 0x614   : >> { %v5682_v59 = vpop.f32.mrf.mxu1 }
 0x616   : >> { %v5683_v50 = vpop.f32.mrf.mxu1 }
 0x617   : >> { %v5684_v2 = vadd.f32 %v5683_v50, %v5682_v59 }
 0x618   : >> { %v5685_v18 = vpop.f32.mrf.mxu1 }
 0x619   : >> { %v3968_v56 = vadd.f32 %v5684_v2, %v9675_v23 }
 0x61a   : >> { %v5686_v6 = vpop.f32.mrf.mxu1 }
 0x61b   : >> { %v5687_v16 = vadd.f32 %v5686_v6, %v5685_v18 }
 0x61c   : >> { %v5688_v55 = vpop.f32.mrf.mxu1 }
 0x61d   : >> { %v3971_v20 = vadd.f32 %v5687_v16, %v9675_v23 }
 0x61e   : >> { %v5689_v19 = vpop.f32.mrf.mxu1 }
 0x61f   : >> { %v5690_v32 = vadd.f32 %v5689_v19, %v5688_v55 }
 0x620   : >> { %v5691_v4 = vpop.f32.mrf.mxu1 }
 0x621   : >> { %v3976_v42 = vadd.f32 %v5690_v32, %v9675_v23 }
 0x622   : >> { %v5692_v47 = vpop.f32.mrf.mxu1 }
 0x623   : >> { %v5693_v22 = vadd.f32 %v5692_v47, %v5691_v4 }
 0x624   : >> { %v9657_v21 = vpop.f32.mrf.mxu1 }
 0x625   : >> { %v3979_v45 = vadd.f32 %v5693_v22, %v9675_v23 }
 0x626   : >> { %v9659_v0 = vpop.f32.mrf.mxu1 }
 0x628   : >> { %v9661_v44 = vpop.f32.mrf.mxu1 }
 0x62a   : >> { %v9663_v9 = vpop.f32.mrf.mxu1 }
 0x62c   : >> { %v9665_v49 = vpop.f32.mrf.mxu1 }
 0x62d   : >> { %v5722_v12 = vpop.f32.mrf.mxu0 }
 0x62e   : >> { %v9667_v58 = vpop.f32.mrf.mxu1 }
 0x62f   : >> { %v5723_v29 = vpop.f32.mrf.mxu0 }
 0x630   : >> { %v5703_v1 = vpop.f32.mrf.mxu1  ;;  %v5724_v8 = vadd.f32 %v5723_v29, %v5722_v12 }
 0x631   : >> { %v5725_v27 = vpop.f32.mrf.mxu0 }
 0x632   : >> { %v5704_v60 = vpop.f32.mrf.mxu1  ;;  %v4033_v7 = vadd.f32 %v5724_v8, %v3968_v56 }
 0x633   : >> { %v5726_v52 = vpop.f32.mrf.mxu0 }
 0x634   : >> { %v5762_v36 = vpop.f32.mrf.mxu1  ;;  %v5727_v35 = vadd.f32 %v5726_v52, %v5725_v27  ;;  %v5696_v52 = vadd.f32 %v9659_v0, %v9657_v21 }
 0x635   : >> { %v5728_v30 = vpop.f32.mrf.mxu0 }
 0x636   : >> { %v5763_v25 = vpop.f32.mrf.mxu1  ;;  %v4036_v18 = vadd.f32 %v5727_v35, %v3971_v20  ;;  %v3984_v22 = vadd.f32 %v5696_v52, %v9675_v23  ;;  %v10464_v52 = vld [vmem:[#allocation77_spill] sm:$0xff] }
 0x637   : >> { %v5729_v39 = vpop.f32.mrf.mxu0  ;;  %v5764_v15 = vadd.f32 %v5763_v25, %v5762_v36  ;;  %v5705_v36 = vadd.f32 %v5704_v60, %v5703_v1 }
 0x638   : >> { %v5765_v51 = vpop.f32.mrf.mxu1  ;;  %v5730_v24 = vadd.f32 %v5729_v39, %v5728_v30 }
 0x639   : >> { %v5731_v40 = vpop.f32.mrf.mxu0  ;;  %v4098_v6 = vadd.f32 %v5764_v15, %v4033_v7  ;;  %v3995_v21 = vadd.f32 %v5705_v36, %v9675_v23  ;;  %v10465_v36 = vmax.f32 %v10464_v52, 0.0 }
 0x63a   : >> { %v5766_v3 = vpop.f32.mrf.mxu1  ;;  %v4041_v57 = vadd.f32 %v5730_v24, %v3976_v42 }
 0x63b   : >> { %v5732_v14 = vpop.f32.mrf.mxu0  ;;  %v5767_v54 = vadd.f32 %v5766_v3, %v5765_v51 }
 0x63c   : >> { %v5768_v26 = vpop.f32.mrf.mxu1  ;;  %v5733_v41 = vadd.f32 %v5732_v14, %v5731_v40  ;;  %v5699_v40 = vadd.f32 %v9663_v9, %v9661_v44  ;;  %v5702_v14 = vadd.f32 %v9667_v58, %v9665_v49 }
 0x63d   : >> { %v5734_v17 = vpop.f32.mrf.mxu0  ;;  %v4101_v27 = vadd.f32 %v5767_v54, %v4036_v18  ;;  %v5345_v54 = vld [vmem:[%s4212_s22] ss:$0 sm:$0xff]  ;;  %s10493_s22 = sand.u32 (%p2407_p11), 1, %s6360_s25  }
 0x63e   : >> { %v5769_v33 = vpop.f32.mrf.mxu1  ;;  %v4044_v63 = vadd.f32 %v5733_v41, %v3979_v45  ;;  %v3992_v49 = vadd.f32 %v5702_v14, %v9675_v23  ;;  %s10006_s23 = scalar_lea.sflag (%p2407_p11), [#allocation3], %s10493_s22 }
 0x63f   : >> { %v5735_v46 = vpop.f32.mrf.mxu0  ;;  %v5770_v53 = vadd.f32 %v5769_v33, %v5768_v26 }
 0x640   : >> { %v5771_v62 = vpop.f32.mrf.mxu1  ;;  %v5736_v33 = vadd.f32 %v5735_v46, %v5734_v17  ;;  %v3987_v46 = vadd.f32 %v5699_v40, %v9675_v23 }
 0x641   : >> { %v9669_v37 = vpop.f32.mrf.mxu0  ;;  %v4106_v19 = vadd.f32 %v5770_v53, %v4041_v57 }
 0x642   : >> { %v5772_v38 = vpop.f32.mrf.mxu1 }
 0x643   : >> { %v5738_v43 = vpop.f32.mrf.mxu0  ;;  %v5773_v34 = vadd.f32 %v5772_v38, %v5771_v62 }
 0x644   : >> { %v5739_v32 = vadd.f32 %v5738_v43, %v9669_v37 }
 0x645   : >> { %v4109_v55 = vadd.f32 %v5773_v34, %v4044_v63 }
 0x646   : >> { %v4052_v37 = vadd.f32 %v5739_v32, %v3987_v46 }
 0x64b   : >> { %v5740_v13 = vpop.f32.mrf.mxu0 }
 0x64d   : >> { %v5741_v48 = vpop.f32.mrf.mxu0 }
 0x64e   : >> { %v5742_v0 = vadd.f32 %v5741_v48, %v5740_v13 }
 0x64f   : >> { %v5743_v11 = vpop.f32.mrf.mxu0  ;;  %v5774_v10 = vpop.f32.mrf.mxu1 }
 0x650   : >> { %v4057_v13 = vadd.f32 %v5742_v0, %v3992_v49 }
 0x651   : >> { %v5744_v31 = vpop.f32.mrf.mxu0  ;;  %v5775_v28 = vpop.f32.mrf.mxu1 }
 0x652   : >> { %v5745_v62 = vadd.f32 %v5744_v31, %v5743_v11  ;;  %v5776_v16 = vadd.f32 %v5775_v28, %v5774_v10  ;;  %v4049_v11 = vadd.f32 %v5736_v33, %v3984_v22 }
 0x653   : >> { %v5777_v5 = vpop.f32.mrf.mxu1  ;;  %v5900_v61 = vpop.f32.mrf.mxu0 }
 0x654   : >> { %v4171_v30 = vadd.f32 %v5900_v61, %v4106_v19  ;;  %v4060_v41 = vadd.f32 %v5745_v62, %v3995_v21  ;;  %v4114_v43 = vadd.f32 %v5776_v16, %v4049_v11  ;;  %v10470_v62 = vld [vmem:[#allocation80_spill] sm:$0xff]  ;;  %v10473_v21 = vld [vmem:[#allocation78_spill] sm:$0xff]  ;;  %v10476_v16 = vld [vmem:[#allocation81_spill] sm:$0xff] }
 0x655   : >> { %v5778_v59 = vpop.f32.mrf.mxu1  ;;  %v4162_v50 = vpop.f32.mrf.mxu0  ;;  %v10474_v0 = vmax.f32 %v10473_v21, 0.0  ;;  %v6216_v11 = vld [vmem:[%s10059_s13 + $0x64] ss:$16 sps:$4 sm:$0xff] (%p2407_p11)  }
 0x656   : >> { %v4163_v12 = vadd.f32 %v4162_v50, %v4098_v6  ;;  %v4195_v1 = vmax.f32 %v4171_v30, 0.0  ;;  %v5779_v56 = vadd.f32 %v5778_v59, %v5777_v5  ;;  %v10458_v50 = vld [vmem:[#allocation76_spill] sm:$0xff]  ;;  %4467 = vmatprep.subr.bf16.mxu0 (%p2407_p11), %v6216_v11  ;;  %v6263_v21 = vld [vmem:[%s10061_s15 + $0x90] sm:$0xff] (%p2407_p11)  }
 0x657   : >> { %v5780_v4 = vpop.f32.mrf.mxu1  ;;  %v5901_v47 = vpop.f32.mrf.mxu0  ;;  %v10459_v18 = vmax.f32 %v10458_v50, 0.0 }
 0x658   : >> { %v4174_v29 = vadd.f32 %v5901_v47, %v4109_v55  ;;  %v4193_v2 = vmax.f32 %v4163_v12, 0.0  ;;  %v4117_v35 = vadd.f32 %v5779_v56, %v4052_v37  ;;  %v6410_v56 = vmov (%p2407_p11), 0   ;;  %v6224_v37 = vld [vmem:[%s10059_s13 + $0x4c] ss:$16 sps:$4 sm:$0xff] (%p2407_p11)  }
 0x659   : >> { %v5781_v25 = vpop.f32.mrf.mxu1  ;;  %v4165_v39 = vpop.f32.mrf.mxu0  ;;  %4564 = vmatprep.mubr.bf16.mxu1 (%p2407_p11), %v6410_v56 }
 0x65a   : >> { %v4166_v51 = vadd.f32 %v4165_v39, %v4101_v27  ;;  %v4196_v3 = vmax.f32 %v4174_v29, 0.0  ;;  %v5782_v8 = vadd.f32 %v5781_v25, %v5780_v4  ;;  %v10461_v4 = vld [vmem:[#allocation74_spill] sm:$0xff]  ;;  %v10467_v39 = vld [vmem:[#allocation75_spill] sm:$0xff] }
 0x65b   : >> { %v5783_v26 = vpop.f32.mrf.mxu1  ;;  %v10462_v47 = vmax.f32 %v10461_v4, 0.0 }
 0x65c   : >> { %v4194_v38 = vmax.f32 %v4166_v51, 0.0  ;;  %v4202_v58 = vpack.c.bf16 %v4196_v3, %v4195_v1  ;;  %v4122_v24 = vadd.f32 %v5782_v8, %v4057_v13  ;;  %v10468_v51 = vmax.f32 %v10467_v39, 0.0  ;;  %v6220_v13 = vld [vmem:[%s10059_s13 + $0x60] ss:$16 sps:$4 sm:$0xff] (%p2407_p11)  }
 0x65d   : >> { %v5784_v60 = vpop.f32.mrf.mxu1 }
 0x65e   : >> { %v4201_v44 = vpack.c.bf16 %v4194_v38, %v4193_v2  ;;  %v5785_v9 = vadd.f32 %v5784_v60, %v5783_v26  ;;  %v10471_v2 = vmax.f32 %v10470_v62, 0.0  ;;  %v6259_v62 = vld [vmem:[%s10061_s15 + $0x98] sm:$0xff] (%p2407_p11)  }
 0x65f   : >> { %v5904_v17 = vpop.f32.mrf.mxu1 }
 0x660   : >> { %5910 = vmatprep.mubr.msk.bf16.mxu0 %vm3136_vm7, %v4201_v44  ;;  %v4125_v10 = vadd.f32 %v5785_v9, %v4060_v41  ;;  %v4187_v15 = vadd.f32 %v5904_v17, %v4122_v24  ;;  %v10477_v44 = vmax.f32 %v10476_v16, 0.0  ;;  %v6218_v41 = vld [vmem:[%s10059_s13 + $0x6c] ss:$16 sps:$4 sm:$0xff] (%p2407_p11)   ;;  %v6228_v24 = vld [vmem:[%s10059_s13 + $0x24] ss:$16 sps:$4 sm:$0xff] (%p2407_p11)  }
 0x661   : >> { %v4178_v48 = vpop.f32.mrf.mxu1  ;;  %5911 = vmatmul.mubr.msk.bf16.vlgmr.msra.gmra.mxu0 %vm3136_vm7, %v4202_v58  ;;  %v10479_v58 = vld [vmem:[#allocation79_spill] sm:$0xff]  ;;  %4540 = vmatprep.subr.bf16.mxu1 (%p2407_p11), %v6218_v41  ;;  %v6268_v16 = vld [vmem:[%s10061_s15 + $0x40] sm:$0xff] (%p2407_p11)  }
 0x662   : >> { %v4179_v28 = vadd.f32 %v4178_v48, %v4114_v43  ;;  %v4199_v61 = vmax.f32 %v4187_v15, 0.0  ;;  %v10480_v8 = vmax.f32 %v10479_v58, 0.0  ;;  %v6222_v48 = vld [vmem:[%s10059_s13 + $0x44] ss:$16 sps:$4 sm:$0xff] (%p2407_p11)   ;;  %4468 = vmatpush1.bf16.msra.mxu0 (%p2407_p11), %v6220_v13  ;;  %v6226_v43 = vld [vmem:[%s10059_s13 + $0x40] ss:$16 sps:$4 sm:$0xff] (%p2407_p11)  }
 0x663   : >> { %v5905_v31 = vpop.f32.mrf.mxu1  ;;  %4469 = vmatprep.subr.bf16.mxu0 (%p2407_p11), %v6222_v48  ;;  %v6236_v15 = vld [vmem:[%s10059_s13 + $0xc] ss:$16 sps:$4 sm:$0xff] (%p2407_p11)  }
 0x664   : >> { %v4190_v45 = vadd.f32 %v5905_v31, %v4125_v10  ;;  %v4197_v53 = vmax.f32 %v4179_v28, 0.0  ;;  %v6232_v28 = vld [vmem:[%s10059_s13 + $0x20] ss:$16 sps:$4 sm:$0xff] (%p2407_p11)   ;;  %v10490_v58 = vld [vmem:[#allocation21_spill] sm:$0xff] (%p2407_p11) }
 0x665   : >> { %v4181_v23 = vpop.f32.mrf.mxu1  ;;  %v4349_v11 = vsub.s32 (%p2407_p11), 0, %v10490_v58  ;;  %v4357_v41 = vsub.s32 (%p2407_p11), 2, %v10490_v58 }
 0x666   : >> { %v4182_v34 = vadd.f32 %v4181_v23, %v4117_v35  ;;  %v4200_v42 = vmax.f32 %v4190_v45, 0.0  ;;  %v6233_v45 = vld [vmem:[%s10059_s13 + $0x28] ss:$16 sps:$4 sm:$0xff] (%p2407_p11)   ;;  %4470 = vmatpush1.bf16.msra.mxu0 (%p2407_p11), %v6226_v43  ;;  %v6238_v23 = vld [vmem:[%s10059_s13] ss:$16 sps:$4 sm:$0xff] (%p2407_p11)  }
 0x667   : > { %4471 = vmatprep.subr.bf16.mxu0 (%p2407_p11), %v6228_v24 }
 0x668   : >> { %v4198_v5 = vmax.f32 %v4182_v34, 0.0  ;;  %v4204_v7 = vpack.c.bf16 %v4200_v42, %v4199_v61  ;;  %v6242_v61 = vld [vmem:[%s10061_s15 + $0xf8] sm:$0xff] (%p2407_p11)  }
 0x66a   : >> { %v4203_v20 = vpack.c.bf16 %v4198_v5, %v4197_v53  ;;  %v6239_v53 = vld [vmem:[%s10059_s13 + $0x8] ss:$16 sps:$4 sm:$0xff] (%p2407_p11)   ;;  %4472 = vmatpush1.bf16.msra.mxu0 (%p2407_p11), %v6232_v28 }
 0x66b   : > { %v6240_v5 = vld [vmem:[%s10061_s15 + $0x78] sm:$0xff] (%p2407_p11)  }
 0x66c   : >> { %5914 = vmatprep.mubr.msk.bf16.mxu0 %vm3136_vm7, %v4203_v20 }
 0x66d   : >> { %5915 = vmatmul.mubr.msk.bf16.gmra.mxu0 %vm3136_vm7, %v4204_v7  ;;  %v6241_v7 = vld [vmem:[%s10061_s15 + $0x38] sm:$0xff] (%p2407_p11)  }
 0x66e   : > { %4491 = vmatprep.mubr.bf16.mxu0 (%p2407_p11), %v6410_v56 }
 0x721   : >> { %v5912_v63 = vpop.f32.mrf.mxu0 }
 0x722   : >> { %v4287_v57 = vadd.f32 %v5912_v63, %v5345_v54  ;;  %v6244_v63 = vld [vmem:[%s10061_s15 + $0x70] sm:$0xff] (%p2407_p11)  }
 0x723   : >> { %v4278_v59 = vpop.f32.mrf.mxu0 }
 0x724   : >> { %v9702_v35 = vadd.f32 %v4287_v57, %v10459_v18   ;;  %v4279_v55 = vadd.f32 %v5345_v54, %v4278_v59  ;;  %v6246_v59 = vld [vmem:[%s10061_s15 + $0xf0] sm:$0xff] (%p2407_p11)  }
 0x725   : >> { %v5913_v19 = vpop.f32.mrf.mxu0  ;;  %v6245_v18 = vld [vmem:[%s10061_s15 + $0x30] sm:$0xff] (%p2407_p11)  }
 0x726   : >> { %v10460_v6 = vmov %v9702_v35  ;;  %v9706_v26 = vadd.f32 %v4279_v55, %v10462_v47   ;;  %v4290_v29 = vadd.f32 %v5913_v19, %v5345_v54  ;;  %v6248_v55 = vld [vmem:[%s10061_s15 + $0x68] sm:$0xff] (%p2407_p11)  }
 0x727   : >> { %v4281_v27 = vpop.f32.mrf.mxu0  ;;  %v10487_v35 = vmov %v10460_v6  ;;  %v4319_v57 = vmax.f32 (%p2407_p11), %v10460_v6, 0.0  ;;  %v6247_v6 = vld [vmem:[%s10061_s15 + $0xb0] sm:$0xff] (%p2407_p11)   ;;  %v6250_v19 = vld [vmem:[%s10061_s15 + $0xe8] sm:$0xff] (%p2407_p11)  }
 0x728   : >> { %v10463_v12 = vmov %v9706_v26  ;;  %v9710_v17 = vadd.f32 %v4290_v29, %v10465_v36   ;;  %v4282_v25 = vadd.f32 %v5345_v54, %v4281_v27  ;;  %v6234_v35 = vld [vmem:[%s10059_s13 + $0x4] ss:$16 sps:$4 sm:$0xff] (%p2407_p11)   ;;  %v6249_v47 = vld [vmem:[%s10061_s15 + $0x28] sm:$0xff] (%p2407_p11)  }
 0x729   : > { %v4317_v34 = vmax.f32 (%p2407_p11), %v10463_v12, 0.0  ;;  %4473 = vmatprep.subr.bf16.mxu0 (%p2407_p11), %v6234_v35  ;;  %v6252_v29 = vld [vmem:[%s10061_s15 + $0x60] sm:$0xff] (%p2407_p11)  }
 0x72a   : >> { %v10466_v30 = vmov %v9710_v17  ;;  %v9714_v10 = vadd.f32 %v4282_v25, %v10468_v51   ;;  %4474 = vmatpush1.bf16.msra.mxu0 (%p2407_p11), %v6238_v23  ;;  %v6254_v27 = vld [vmem:[%s10061_s15 + $0xe0] sm:$0xff] (%p2407_p11)  }
 0x72b   : >> { %v10486_v17 = vmov %v10466_v30  ;;  %5798 = vmatprep.subr.bf16.mxu0 (%p2407_p11), %v6240_v5  ;;  %v4320_v50 = vmax.f32 (%p2407_p11), %v10466_v30, 0.0  ;;  %v6253_v30 = vld [vmem:[%s10061_s15 + $0x20] sm:$0xff] (%p2407_p11)  }
 0x72c   : >> { %v10469_v40 = vmov %v9714_v10  ;;  %v6221_v17 = vld [vmem:[%s10059_s13 + $0x68] ss:$16 sps:$4 sm:$0xff] (%p2407_p11)   ;;  %v6255_v25 = vld [vmem:[%s10061_s15 + $0xa0] sm:$0xff] (%p2407_p11)  }
 0x72d   : >> { %v5916_v14 = vpop.f32.mrf.mxu0  ;;  %v10488_v10 = vmov %v10469_v40  ;;  %4541 = vmatpush1.bf16.msra.mxu1 (%p2407_p11), %v6221_v17  ;;  %v4318_v42 = vmax.f32 (%p2407_p11), %v10469_v40, 0.0  ;;  %v4326_v4 = vpack.c.bf16 (%p2407_p11), %v4320_v50, %v4319_v57  ;;  %v6256_v40 = vld [vmem:[%s10061_s15 + $0x58] sm:$0xff] (%p2407_p11)  }
 0x72e   : >> { %v4303_v3 = vadd.f32 %v5916_v14, %v5345_v54  ;;  %v6227_v10 = vld [vmem:[%s10059_s13 + $0x48] ss:$16 sps:$4 sm:$0xff] (%p2407_p11)   ;;  %4542 = vmatprep.subr.bf16.mxu1 (%p2407_p11), %v6224_v37 }
 0x72f   : >> { %v4294_v33 = vpop.f32.mrf.mxu0  ;;  %v4325_v20 = vpack.c.bf16 (%p2407_p11), %v4318_v42, %v4317_v34  ;;  %v6258_v14 = vld [vmem:[%s10061_s15 + $0xd8] sm:$0xff] (%p2407_p11)  }
 0x730   : >> { %v9718_v31 = vadd.f32 %v4303_v3, %v10471_v2   ;;  %v4295_v22 = vadd.f32 %v5345_v54, %v4294_v33  ;;  %v6257_v33 = vld [vmem:[%s10061_s15 + $0x18] sm:$0xff] (%p2407_p11)  }
 0x731   : >> { %v5917_v26 = vpop.f32.mrf.mxu0  ;;  %4543 = vmatpush1.bf16.msra.mxu1 (%p2407_p11), %v6227_v10  ;;  %5368 = vmatmul.mubr.msk.bf16.vlgmr.msra.gmra.mxu0 (%p2407_p11), %vm1039_vm6, %v4325_v20 }
 0x732   : >> { %v10472_v38 = vmov %v9718_v31  ;;  %v9722_v3 = vadd.f32 %v4295_v22, %v10474_v0   ;;  %v4306_v60 = vadd.f32 %v5917_v26, %v5345_v54  ;;  %v10489_v26 = vmov %v10463_v12  ;;  %4501 = vmatprep.mubr.bf16.mxu0 (%p2407_p11), %v6410_v56  ;;  %5799 = vmatpush3.bf16.msra.mxu0 (%p2407_p11), %v6241_v7  ;;  %v6251_v12 = vld [vmem:[%s10061_s15 + $0xa8] sm:$0xff] (%p2407_p11)   ;;  %v6262_v22 = vld [vmem:[%s10061_s15 + $0xd0] sm:$0xff] (%p2407_p11)  }
 0x733   : >> { %v4297_v32 = vpop.f32.mrf.mxu0  ;;  %v10483_v31 = vmov %v10472_v38  ;;  %5800 = vmatprep.subr.bf16.mxu0 (%p2407_p11), %v6244_v63  ;;  %v4323_v39 = vmax.f32 (%p2407_p11), %v10472_v38, 0.0  ;;  %v6260_v38 = vld [vmem:[%s10061_s15 + $0x50] sm:$0xff] (%p2407_p11)   ;;  %v6264_v0 = vld [vmem:[%s10061_s15 + $0x48] sm:$0xff] (%p2407_p11)  }
 0x734   : >> { %v10475_v1 = vmov %v9722_v3  ;;  %v9726_v60 = vadd.f32 %v4306_v60, %v10477_v44   ;;  %v4298_v49 = vadd.f32 %v5345_v54, %v4297_v32  ;;  %v6230_v31 = vld [vmem:[%s10059_s13 + $0x2c] ss:$16 sps:$4 sm:$0xff] (%p2407_p11)   ;;  %v6261_v26 = vld [vmem:[%s10061_s15 + $0x10] sm:$0xff] (%p2407_p11)   ;;  %v6270_v44 = vld [vmem:[%s10061_s15 + $0xc0] sm:$0xff] (%p2407_p11)  }
 0x735   : >> { %v10485_v3 = vmov %v10475_v1  ;;  %2409 = sbr.rel (!%p2407_p11) target bundleno = 505 (0x1f9), region = 138  ;;  %4544 = vmatprep.subr.bf16.mxu1 (%p2407_p11), %v6230_v31  ;;  %v4321_v52 = vmax.f32 (%p2407_p11), %v10475_v1, 0.0  ;;  %v6266_v1 = vld [vmem:[%s10061_s15 + $0xc8] sm:$0xff] (%p2407_p11)  }
 0x736   : >> { %v10478_v9 = vmov %v9726_v60  ;;  %v9730_v54 = vadd.f32 %v4298_v49, %v10480_v8   ;;  %4545 = vmatpush1.bf16.msra.mxu1 (%p2407_p11), %v6233_v45  ;;  %5801 = vmatpush3.bf16.msra.mxu0 (%p2407_p11), %v6245_v18  ;;  %v6267_v32 = vld [vmem:[%s10061_s15 + $0x88] sm:$0xff] (%p2407_p11)   ;;  %v6271_v49 = vld [vmem:[%s10061_s15 + $0x80] sm:$0xff] (%p2407_p11)   ;;  %v4353_v8 = vsub.s32 (%p2407_p11), 1, %v10490_v58 }
 0x737   : >> { %v10482_v60 = vmov %v10478_v9  ;;  %4546 = vmatprep.subr.bf16.mxu1 (%p2407_p11), %v6236_v15  ;;  %5802 = vmatprep.subr.bf16.mxu0 (%p2407_p11), %v6248_v55  ;;  %v4324_v51 = vmax.f32 (%p2407_p11), %v10478_v9, 0.0  ;;  %v6269_v9 = vld [vmem:[%s10061_s15] sm:$0xff] (%p2407_p11)  }
 0x738   : >> { %v10481_v46 = vmov %v9730_v54  ;;  %v6265_v60 = vld [vmem:[%s10061_s15 + $0x8] sm:$0xff] (%p2407_p11)  }
 0x739   : >> { %v10484_v54 = vmov %v10481_v46  ;;  %5369 = vmatmul.mubr.msk.bf16.gmra.mxu0 (%p2407_p11), %vm1039_vm6, %v4326_v4  ;;  %v4322_v36 = vmax.f32 (%p2407_p11), %v10481_v46, 0.0  ;;  %v4328_v2 = vpack.c.bf16 (%p2407_p11), %v4324_v51, %v4323_v39  ;;  %v4361_v46 = vsub.s32 (%p2407_p11), 3, %v10490_v58 }
 0x73a   : > { %4547 = vmatpush1.bf16.msra.mxu1 %v6239_v53  ;;  %v6243_v54 = vld [vmem:[%s10061_s15 + $0xb8] sm:$0xff]   ;;  %4511 = vmatprep.mubr.bf16.mxu0 %v6410_v56 }
 0x73b   : > { %5838 = vmatprep.subr.bf16.mxu1 %v6242_v61  ;;  %5803 = vmatpush3.bf16.msra.mxu0 %v6249_v47  ;;  %v4327_v3 = vpack.c.bf16 %v4322_v36, %v4321_v52 }
 0x73c   : > { %5804 = vmatprep.subr.bf16.mxu0 %v6252_v29 }
 0x73d   : > { %5372 = vmatmul.mubr.msk.bf16.vlgmr.msra.gmra.mxu1 %vm1039_vm6, %v4325_v20 }
 0x73e   : > { %4574 = vmatprep.mubr.bf16.mxu1 %v6410_v56  ;;  %5839 = vmatpush3.bf16.msra.mxu1 %v6243_v54 }
 0x73f   : > { %5840 = vmatprep.subr.bf16.mxu1 %v6246_v59  ;;  %5805 = vmatpush3.bf16.msra.mxu0 %v6253_v30 }
 0x740   : > { %5806 = vmatprep.subr.bf16.mxu0 %v6256_v40 }
 0x741   : > { %5370 = vmatmul.mubr.msk.bf16.gmra.mxu0 %vm1039_vm6, %v4327_v3 }
 0x742   : > { %5841 = vmatpush3.bf16.msra.mxu1 %v6247_v6  ;;  %4521 = vmatprep.mubr.bf16.mxu0 %v6410_v56 }
 0x743   : > { %5842 = vmatprep.subr.bf16.mxu1 %v6250_v19  ;;  %5807 = vmatpush3.bf16.msra.mxu0 %v6257_v33 }
 0x744   : > { %5808 = vmatprep.subr.bf16.mxu0 %v6260_v38 }
 0x745   : > { %5373 = vmatmul.mubr.msk.bf16.gmra.mxu1 %vm1039_vm6, %v4326_v4 }
 0x746   : > { %4584 = vmatprep.mubr.bf16.mxu1 %v6410_v56  ;;  %5843 = vmatpush3.bf16.msra.mxu1 %v6251_v12 }
 0x747   : > { %5844 = vmatprep.subr.bf16.mxu1 %v6254_v27  ;;  %5809 = vmatpush3.bf16.msra.mxu0 %v6261_v26 }
 0x748   : > { %5810 = vmatprep.subr.bf16.mxu0 %v6264_v0 }
 0x749   : > { %5371 = vmatmul.mubr.msk.bf16.gmra.mxu0 %vm1039_vm6, %v4328_v2 }
 0x74a   : > { %5845 = vmatpush3.bf16.msra.mxu1 %v6255_v25 }
 0x74b   : > { %5846 = vmatprep.subr.bf16.mxu1 %v6258_v14  ;;  %5811 = vmatpush3.bf16.msra.mxu0 %v6265_v60 }
 0x74c   : > { %5812 = vmatprep.subr.bf16.mxu0 %v6268_v16 }
 0x74d   : > { %5374 = vmatmul.mubr.msk.bf16.gmra.mxu1 %vm1039_vm6, %v4327_v3 }
 0x74e   : > { %4594 = vmatprep.mubr.bf16.mxu1 %v6410_v56  ;;  %5847 = vmatpush3.bf16.msra.mxu1 %v6259_v62  ;;  %v4345_v56 = vld [vmem:[%s10060_s14] sm:$0xf] }
 0x74f   : > { %5848 = vmatprep.subr.bf16.mxu1 %v6262_v22  ;;  %5813 = vmatpush3.bf16.msra.mxu0 %v6269_v9  ;;  %v9934_v48 = vrot.slane %v4345_v56, %v4353_v8  ;;  %v9936_v37 = vrot.slane %v4345_v56, %v4361_v46  ;;  %v9938_v43 = vrot.slane %v4345_v56, %v4349_v11 }
 0x750   : > { %v9940_v10 = vrot.slane %v4345_v56, %v4357_v41 }
 0x752   : > { %5849 = vmatpush3.bf16.msra.mxu1 %v6263_v21 }
 0x753   : > { %5850 = vmatprep.subr.bf16.mxu1 %v6266_v1 }
 0x755   : > { %5375 = vmatmul.mubr.msk.bf16.gmra.mxu1 %vm1039_vm6, %v4328_v2 }
 0x756   : > { %5851 = vmatpush3.bf16.msra.mxu1 %v6267_v32 }
 0x757   : > { %5852 = vmatprep.subr.bf16.mxu1 %v6270_v44 }
 0x75a   : > { %5853 = vmatpush3.bf16.msra.mxu1 %v6271_v49 }
 0x7f1   : > { %v4493_v13 = vpop.f32.mrf.mxu0 }
 0x7f2   : > { %v4494_v42 = vadd.f32 %v4493_v13, %v9938_v43 }
 0x7f3   : > { %v4495_v24 = vpop.f32.mrf.mxu0 }
 0x7f4   : > { %v4496_v35 = vadd.f32 %v4495_v24, %v9934_v48  ;;  %v4605_v19 = vmax.f32 %v4494_v42, 0.0 }
 0x7f5   : > { %v4497_v28 = vpop.f32.mrf.mxu0 }
 0x7f6   : > { %v4498_v23 = vadd.f32 %v4497_v28, %v9938_v43  ;;  %v4606_v50 = vmax.f32 %v4496_v35, 0.0 }
 0x7f7   : > { %v4499_v5 = vpop.f32.mrf.mxu0 }
 0x7f8   : > { %v4500_v20 = vadd.f32 %v4499_v5, %v9934_v48  ;;  %v4609_v54 = vmax.f32 %v4498_v23, 0.0 }
 0x7f9   : > { %v4503_v57 = vpop.f32.mrf.mxu0 }
 0x7fa   : > { %v4610_v6 = vmax.f32 %v4500_v20, 0.0  ;;  %v4637_v52 = vpack.c.bf16 %v4609_v54, %v4605_v19  ;;  %v4504_v3 = vadd.f32 %v4503_v57, %v9938_v43 }
 0x7fb   : > { %v4505_v47 = vpop.f32.mrf.mxu0 }
 0x7fc   : > { %v4638_v29 = vpack.c.bf16 %v4610_v6, %v4606_v50  ;;  %v4506_v30 = vadd.f32 %v4505_v47, %v9934_v48  ;;  %v4613_v9 = vmax.f32 %v4504_v3, 0.0 }
 0x7fd   : > { %v4566_v17 = vpop.f32.mrf.mxu1  ;;  %v4507_v25 = vpop.f32.mrf.mxu0 }
 0x7fe   : > { %v4567_v53 = vadd.f32 %v4566_v17, %v9940_v10  ;;  %v4508_v40 = vadd.f32 %v4507_v25, %v9938_v43  ;;  %4948 = vmatprep.mubr.bf16.mxu0 %v4638_v29  ;;  %v4614_v60 = vmax.f32 %v4506_v30, 0.0 }
 0x7ff   : > { %v4568_v31 = vpop.f32.mrf.mxu1  ;;  %v4509_v62 = vpop.f32.mrf.mxu0  ;;  %4949 = vmatmul.mubr.bf16.vlgmr.msra.gmra.mxu0 %v4637_v52 }
 0x800   : > { %v4569_v15 = vadd.f32 %v4568_v31, %v9936_v37  ;;  %v4607_v4 = vmax.f32 %v4567_v53, 0.0  ;;  %v4510_v38 = vadd.f32 %v4509_v62, %v9934_v48  ;;  %v4617_v26 = vmax.f32 %v4508_v40, 0.0 }
 0x801   : > { %v4570_v45 = vpop.f32.mrf.mxu1  ;;  %v4513_v0 = vpop.f32.mrf.mxu0 }
 0x802   : > { %v4571_v34 = vadd.f32 %v4570_v45, %v9940_v10  ;;  %v4608_v18 = vmax.f32 %v4569_v15, 0.0  ;;  %v4618_v16 = vmax.f32 %v4510_v38, 0.0  ;;  %v4641_v41 = vpack.c.bf16 %v4617_v26, %v4613_v9 }
 0x803   : > { %v4572_v61 = vpop.f32.mrf.mxu1  ;;  %v4515_v58 = vpop.f32.mrf.mxu0  ;;  %v4514_v35 = vadd.f32 %v4513_v0, %v9938_v43 }
 0x804   : > { %v4573_v7 = vadd.f32 %v4572_v61, %v9936_v37  ;;  %v4611_v63 = vmax.f32 %v4571_v34, 0.0  ;;  %v4642_v46 = vpack.c.bf16 %v4618_v16, %v4614_v60  ;;  %v4516_v13 = vadd.f32 %v4515_v58, %v9934_v48 }
 0x805   : > { %v4576_v59 = vpop.f32.mrf.mxu1  ;;  %v4517_v17 = vpop.f32.mrf.mxu0  ;;  %v4621_v50 = vmax.f32 %v4514_v35, 0.0 }
 0x806   : > { %v4612_v55 = vmax.f32 %v4573_v7, 0.0  ;;  %v4639_v36 = vpack.c.bf16 %v4611_v63, %v4607_v4  ;;  %v4577_v33 = vadd.f32 %v4576_v59, %v9940_v10  ;;  %v4518_v28 = vadd.f32 %v4517_v17, %v9938_v43  ;;  %4956 = vmatprep.mubr.bf16.mxu0 %v4642_v46 }
 0x807   : > { %v4578_v12 = vpop.f32.mrf.mxu1  ;;  %v4519_v23 = vpop.f32.mrf.mxu0  ;;  %4957 = vmatmul.mubr.bf16.gmra.mxu0 %v4641_v41  ;;  %v4622_v54 = vmax.f32 %v4516_v13, 0.0 }
 0x808   : > { %v4640_v27 = vpack.c.bf16 %v4612_v55, %v4608_v18  ;;  %v4579_v51 = vadd.f32 %v4578_v12, %v9936_v37  ;;  %v4615_v49 = vmax.f32 %v4577_v33, 0.0  ;;  %v4520_v42 = vadd.f32 %v4519_v23, %v9934_v48 }
 0x809   : > { %v4580_v39 = vpop.f32.mrf.mxu1  ;;  %v4625_v5 = vmax.f32 %v4518_v28, 0.0  ;;  %v4523_v20 = vpop.f32.mrf.mxu0 }
 0x80a   : > { %v4581_v14 = vadd.f32 %v4580_v39, %v9940_v10  ;;  %5013 = vmatprep.mubr.bf16.mxu1 %v4640_v27  ;;  %v4616_v32 = vmax.f32 %v4579_v51, 0.0  ;;  %v4626_v57 = vmax.f32 %v4520_v42, 0.0  ;;  %v4524_v39 = vadd.f32 %v4523_v20, %v9938_v43 }
 0x80b   : > { %v4582_v2 = vpop.f32.mrf.mxu1  ;;  %5014 = vmatmul.mubr.bf16.vlgmr.msra.gmra.mxu1 %v4639_v36  ;;  %v4525_v6 = vpop.f32.mrf.mxu0  ;;  %v4645_v47 = vpack.c.bf16 %v4625_v5, %v4621_v50 }
 0x80c   : > { %v4583_v22 = vadd.f32 %v4582_v2, %v9936_v37  ;;  %v4619_v21 = vmax.f32 %v4581_v14, 0.0  ;;  %v4646_v19 = vpack.c.bf16 %v4626_v57, %v4622_v54  ;;  %v4526_v29 = vadd.f32 %v4525_v6, %v9934_v48 }
 0x80d   : > { %v4586_v1 = vpop.f32.mrf.mxu1  ;;  %v4527_v27 = vpop.f32.mrf.mxu0  ;;  %v4629_v0 = vmax.f32 %v4524_v39, 0.0 }
 0x80e   : > { %v4620_v44 = vmax.f32 %v4583_v22, 0.0  ;;  %v4643_v56 = vpack.c.bf16 %v4619_v21, %v4615_v49  ;;  %v4587_v15 = vadd.f32 %v4586_v1, %v9940_v10  ;;  %v4528_v30 = vadd.f32 %v4527_v27, %v9938_v43  ;;  %4964 = vmatprep.mubr.bf16.mxu0 %v4646_v19 }
 0x80f   : > { %v4588_v8 = vpop.f32.mrf.mxu1  ;;  %v4529_v40 = vpop.f32.mrf.mxu0  ;;  %4965 = vmatmul.mubr.bf16.gmra.mxu0 %v4645_v47  ;;  %v4630_v38 = vmax.f32 %v4526_v29, 0.0 }
 0x810   : > { %v4644_v11 = vpack.c.bf16 %v4620_v44, %v4616_v32  ;;  %v4589_v31 = vadd.f32 %v4588_v8, %v9936_v37  ;;  %v4623_v18 = vmax.f32 %v4587_v15, 0.0  ;;  %v4530_v3 = vadd.f32 %v4529_v40, %v9934_v48 }
 0x811   : > { %v4590_v24 = vpop.f32.mrf.mxu1  ;;  %v4633_v62 = vmax.f32 %v4528_v30, 0.0 }
 0x812   : > { %v4591_v45 = vadd.f32 %v4590_v24, %v9940_v10  ;;  %5021 = vmatprep.mubr.bf16.mxu1 %v4644_v11  ;;  %v4624_v63 = vmax.f32 %v4589_v31, 0.0  ;;  %v4634_v26 = vmax.f32 %v4530_v3, 0.0 }
 0x813   : > { %v4592_v34 = vpop.f32.mrf.mxu1  ;;  %5022 = vmatmul.mubr.bf16.gmra.mxu1 %v4643_v56  ;;  %v4649_v32 = vpack.c.bf16 %v4633_v62, %v4629_v0 }
 0x814   : > { %v4593_v53 = vadd.f32 %v4592_v34, %v9936_v37  ;;  %v4627_v61 = vmax.f32 %v4591_v45, 0.0  ;;  %v4650_v60 = vpack.c.bf16 %v4634_v26, %v4630_v38 }
 0x815   : > { %v4596_v7 = vpop.f32.mrf.mxu1 }
 0x816   : > { %v4628_v59 = vmax.f32 %v4593_v53, 0.0  ;;  %v4647_v12 = vpack.c.bf16 %v4627_v61, %v4623_v18  ;;  %v4597_v51 = vadd.f32 %v4596_v7, %v9940_v10  ;;  %4972 = vmatprep.mubr.bf16.mxu0 %v4650_v60 }
 0x817   : > { %v4598_v55 = vpop.f32.mrf.mxu1  ;;  %4973 = vmatmul.mubr.bf16.gmra.mxu0 %v4649_v32 }
 0x818   : > { %v4648_v4 = vpack.c.bf16 %v4628_v59, %v4624_v63  ;;  %v4599_v36 = vadd.f32 %v4598_v55, %v9936_v37  ;;  %v4631_v1 = vmax.f32 %v4597_v51, 0.0 }
 0x819   : > { %v4600_v52 = vpop.f32.mrf.mxu1 }
 0x81a   : > { %v4601_v25 = vadd.f32 %v4600_v52, %v9940_v10  ;;  %5029 = vmatprep.mubr.bf16.mxu1 %v4648_v4  ;;  %v4632_v22 = vmax.f32 %v4599_v36, 0.0 }
 0x81b   : > { %v4602_v14 = vpop.f32.mrf.mxu1  ;;  %5030 = vmatmul.mubr.bf16.gmra.mxu1 %v4647_v12 }
 0x81c   : > { %v4603_v33 = vadd.f32 %v4602_v14, %v9936_v37  ;;  %v4635_v2 = vmax.f32 %v4601_v25, 0.0  ;;  %v9977_v37 = vld [vmem:[%s10062_s16] ss:$0 sm:$0xff] }
 0x81e   : > { %v4636_v21 = vmax.f32 %v4603_v33, 0.0  ;;  %v4651_v10 = vpack.c.bf16 %v4635_v2, %v4631_v1 }
 0x820   : > { %v4652_v43 = vpack.c.bf16 %v4636_v21, %v4632_v22 }
 0x822   : > { %5037 = vmatprep.mubr.bf16.mxu1 %v4652_v43 }
 0x823   : > { %5038 = vmatmul.mubr.bf16.gmra.mxu1 %v4651_v10 }
 0x8bf   : > { %v5814_v16 = vpop.f32.mrf.mxu0 }
 0x8c1   : > { %v5815_v44 = vpop.f32.mrf.mxu0 }
 0x8c2   : > { %v5816_v49 = vadd.f32 %v5815_v44, %v5814_v16 }
 0x8c3   : > { %v5817_v58 = vpop.f32.mrf.mxu0 }
 0x8c4   : > { %v4951_v46 = vadd.f32 %v5816_v49, %v9977_v37 }
 0x8c5   : > { %v5818_v41 = vpop.f32.mrf.mxu0 }
 0x8c6   : > { %v5819_v17 = vadd.f32 %v5818_v41, %v5817_v58 }
 0x8c7   : > { %v5820_v24 = vpop.f32.mrf.mxu0 }
 0x8c8   : > { %v4954_v28 = vadd.f32 %v5819_v17, %v9977_v37 }
 0x8c9   : > { %v5821_v35 = vpop.f32.mrf.mxu0 }
 0x8ca   : > { %v5822_v34 = vadd.f32 %v5821_v35, %v5820_v24 }
 0x8cb   : > { %v5854_v48 = vpop.f32.mrf.mxu1  ;;  %v5823_v42 = vpop.f32.mrf.mxu0 }
 0x8cc   : > { %v4959_v5 = vadd.f32 %v5822_v34, %v9977_v37 }
 0x8cd   : > { %v5855_v9 = vpop.f32.mrf.mxu1  ;;  %v5824_v20 = vpop.f32.mrf.mxu0 }
 0x8ce   : > { %v5856_v11 = vadd.f32 %v5855_v9, %v5854_v48  ;;  %v5825_v63 = vadd.f32 %v5824_v20, %v5823_v42 }
 0x8cf   : > { %v5857_v8 = vpop.f32.mrf.mxu1  ;;  %v5826_v57 = vpop.f32.mrf.mxu0 }
 0x8d0   : > { %v5016_v13 = vadd.f32 %v5856_v11, %v4951_v46  ;;  %v4962_v50 = vadd.f32 %v5825_v63, %v9977_v37 }
 0x8d1   : > { %v5858_v56 = vpop.f32.mrf.mxu1  ;;  %v5827_v6 = vpop.f32.mrf.mxu0 }
 0x8d2   : > { %5046 = vst [vmem:[%s8195_s17] sm:$0xff] %v5016_v13  ;;  %v5859_v45 = vadd.f32 %v5858_v56, %v5857_v8  ;;  %v5828_v4 = vadd.f32 %v5827_v6, %v5826_v57 }
 0x8d3   : > { %v5860_v31 = vpop.f32.mrf.mxu1  ;;  %v5829_v47 = vpop.f32.mrf.mxu0 }
 0x8d4   : > { %v5019_v23 = vadd.f32 %v5859_v45, %v4954_v28  ;;  %v4967_v29 = vadd.f32 %v5828_v4, %v9977_v37 }
 0x8d5   : > { %v5861_v15 = vpop.f32.mrf.mxu1  ;;  %v5830_v52 = vpop.f32.mrf.mxu0 }
 0x8d6   : > { %5047 = vst [vmem:[%s8195_s17 + $0x8] sm:$0xff] %v5019_v23  ;;  %v5862_v61 = vadd.f32 %v5861_v15, %v5860_v31  ;;  %v5831_v25 = vadd.f32 %v5830_v52, %v5829_v47 }
 0x8d7   : > { %v5863_v53 = vpop.f32.mrf.mxu1  ;;  %v5832_v39 = vpop.f32.mrf.mxu0 }
 0x8d8   : > { %v5024_v54 = vadd.f32 %v5862_v61, %v4959_v5  ;;  %v4970_v40 = vadd.f32 %v5831_v25, %v9977_v37 }
 0x8d9   : > { %v5864_v7 = vpop.f32.mrf.mxu1  ;;  %v5833_v3 = vpop.f32.mrf.mxu0 }
 0x8da   : > { %5048 = vst [vmem:[%s8195_s17 + $0x10] sm:$0xff] %v5024_v54  ;;  %v5865_v18 = vadd.f32 %v5864_v7, %v5863_v53  ;;  %v5834_v2 = vadd.f32 %v5833_v3, %v5832_v39 }
 0x8db   : > { %v5866_v59 = vpop.f32.mrf.mxu1  ;;  %v5835_v38 = vpop.f32.mrf.mxu0 }
 0x8dc   : > { %v5027_v19 = vadd.f32 %v5865_v18, %v4962_v50  ;;  %v4975_v26 = vadd.f32 %v5834_v2, %v9977_v37 }
 0x8dd   : > { %v5867_v55 = vpop.f32.mrf.mxu1  ;;  %v5836_v0 = vpop.f32.mrf.mxu0 }
 0x8de   : > { %5049 = vst [vmem:[%s8195_s17 + $0x18] sm:$0xff] %v5027_v19  ;;  %v5868_v27 = vadd.f32 %v5867_v55, %v5866_v59  ;;  %v5837_v43 = vadd.f32 %v5836_v0, %v5835_v38 }
 0x8df   : > { %v5869_v12 = vpop.f32.mrf.mxu1 }
 0x8e0   : > { %v5032_v30 = vadd.f32 %v5868_v27, %v4967_v29  ;;  %v4978_v32 = vadd.f32 %v5837_v43, %v9977_v37 }
 0x8e1   : > { %v5870_v36 = vpop.f32.mrf.mxu1 }
 0x8e2   : > { %5050 = vst [vmem:[%s8195_s17 + $0x20] sm:$0xff] %v5032_v30  ;;  %v5871_v14 = vadd.f32 %v5870_v36, %v5869_v12 }
 0x8e3   : > { %v5872_v51 = vpop.f32.mrf.mxu1 }
 0x8e4   : > { %v5035_v62 = vadd.f32 %v5871_v14, %v4970_v40 }
 0x8e5   : > { %v5873_v33 = vpop.f32.mrf.mxu1 }
 0x8e6   : > { %5051 = vst [vmem:[%s8195_s17 + $0x28] sm:$0xff] %v5035_v62  ;;  %v5874_v21 = vadd.f32 %v5873_v33, %v5872_v51 }
 0x8e7   : > { %v5875_v22 = vpop.f32.mrf.mxu1 }
 0x8e8   : > { %v5040_v60 = vadd.f32 %v5874_v21, %v4975_v26 }
 0x8e9   : > { %v5876_v1 = vpop.f32.mrf.mxu1 }
 0x8ea   : > { %5052 = vst [vmem:[%s8195_s17 + $0x30] sm:$0xff] %v5040_v60  ;;  %v5877_v10 = vadd.f32 %v5876_v1, %v5875_v22 }
 0x8ec   : > { %v5043_v16 = vadd.f32 %v5877_v10, %v4978_v32 }
 0x8ee   : > { %5053 = vst [vmem:[%s8195_s17 + $0x38] sm:$0xff] %v5043_v16 }
 0x8ef   : > { %6285 = shalt.err (!%p6282_p4)
}
 0x8f0   : > { %s6286_s17 = scalar_lea.hbm %s9999_s20, 1024  ;;  %s6290_s1 = scalar_lea.hbm %s10492_s0, 2048 }
 0x8f1   : > { %p6287_p7 = scmp.ne.s32.totalorder %s9999_s20, %s6286_s17  ;;  %p6291_p10 = scmp.lt.s32.totalorder %s9999_s20, %s10492_s0 }
 0x8f2   : > { %p6292_p11 = scmp.lt.s32.totalorder %s6290_s1, %s6286_s17 }
 0x8f3   : > { %p6288_p8 = pnand %p6287_p7, %p6542_p5 }
 0x8f4   : > { %p6293_p12 = por %p6292_p11, %p6291_p10 }
 0x8f5   : > { %p6289_p9 = pneg %p6288_p8 }
 0x8f7   : > { %p6294_p13 = pnand %p6293_p12, %p6289_p9 }
 0x8f9   : > { %6297 = shalt.err (!%p6294_p13)
}
 0x8fa   : > { %s6412_s28 = smov 128   ;;  %s6413_s27 = smov 8  }
 0x8fb   : > { %5922 = dma.vmem_to_hbm [thread:$0]  (%p6542_p5), %s10001_s19, 1024, %s9999_s20, %s10006_s23, %s6412_s28, %s6412_s28, %s6413_s27  }
 0x8fc PF: > { %s10494_s26 = sld [smem:[#allocation7_spill]] }
 0x8fd   : > { %s10495_s30 = sld [smem:[#allocation5_spill]] }
 0x902   : > { %p5928_p0 = scmp.ge.s32.totalorder %s10494_s26, 2 }
 0x903   : > { %s5083_s2 = sand.u32 1, %s10495_s30  }
 0x904   : > { %p5925_p1 = pnand %p5928_p0, %p6546_p6  ;;  %s5084_s17 = scalar_lea.sflag [#allocation3], %s5083_s2 }
 0x906   : > { %p5926_p2 = pneg %p5925_p1 }
 0x908   : > { %6351 = dma.done.wait (%p5926_p2), %s5084_s17, 1024  }
 0x909   : > { %6353 = vsyncadd (%p5926_p2), %s5084_s17, 4294966272  ;;  %s10497_s27 = sld [smem:[#allocation8_spill]]  ;;  %s10500_s24 = smov %s6360_s25 }
 0x90a   : > { %s10498_s1 = sld [smem:[#allocation6_spill]] }
 0x90b   : > { %s10499_s26 = sld [smem:[#allocation9_spill]] }
 0x90f   : > { %p27_p3 = scmp.ge.s32.totalorder %s10497_s27, 4  }
 0x910   : > { %s10501_s25 = smov %s10498_s1 }
 0x911   :  { %29 = sbr.rel (!%p27_p3) target bundleno = 8 (0x8), region = 149 }
 0x916   :  { %5089 = vsyncpa [#allocation3], 1 }
 0x917   :  { %5091 = vsyncpa [#allocation3 + $0x1], 1 }

</bundles_post_ra>
